<compile_context>
chip_gen: v7x
topology: tpu7x:2x2x1
jax: 0.10.0
libtpu: 0.0.40
codegen_flags: <defaults>
</compile_context>

<pallas_src>
import jax
import jax.numpy as jnp
import numpy as np
from jax.experimental import pallas as pl
from jax.experimental.pallas import tpu as pltpu

N_EMBD = 384
HIDDEN = 4 * N_EMBD          # 1536


def ffn_kernel(x_ref, w1_ref, b1_ref, w2_ref, b2_ref, o_ref):
    # x tile: (TM, C) bf16 rows of the flattened (B*T, C) activation stream.
    h = jnp.dot(x_ref[...], w1_ref[...],
                preferred_element_type=jnp.float32)                   # (TM, 4C) f32 acc
    # bf16 bias + ReLU epilogue (native bf16 VPU on v6e/v7x), feeds second MXU dot.
    h = jnp.maximum(h.astype(jnp.bfloat16) + b1_ref[...], 0)          # (TM, 4C) bf16
    y = jnp.dot(h, w2_ref[...],
                preferred_element_type=jnp.float32) + b2_ref[...]     # (TM, C) f32
    o_ref[...] = y.astype(o_ref.dtype)


def feed_forward(x, params):
    """x: (..., N_EMBD). Returns bf16 output of Linear -> ReLU -> Linear (+ Dropout=id)."""
    orig_shape = x.shape
    C = orig_shape[-1]
    assert C == N_EMBD
    x2d = x.reshape(-1, C)
    if x2d.dtype != jnp.bfloat16:
        # Ideally the producer already emits bf16; cast once at the boundary otherwise.
        x2d = x2d.astype(jnp.bfloat16)
    M = x2d.shape[0]

    tm = 256 if M >= 512 else 128                 # bigger tiles amortize per-step overhead
    n_steps = pl.cdiv(M, tm)
    semantics = ("parallel",) if n_steps >= 2 else ("arbitrary",)

    out2d = pl.pallas_call(
        ffn_kernel,
        out_shape=jax.ShapeDtypeStruct((M, C), jnp.bfloat16),
        grid=(n_steps,),
        in_specs=[
            pl.BlockSpec((tm, C), lambda i: (i, 0)),       # x rows (bf16), per grid step
            pl.BlockSpec((C, HIDDEN), lambda i: (0, 0)),   # W1 (bf16), resident block
            pl.BlockSpec((1, HIDDEN), lambda i: (0, 0)),   # b1 (bf16)
            pl.BlockSpec((HIDDEN, C), lambda i: (0, 0)),   # W2 (bf16), resident block
            pl.BlockSpec((1, C), lambda i: (0, 0)),        # b2 (f32)
        ],
        out_specs=pl.BlockSpec((tm, C), lambda i: (i, 0)), # lane-dense (384-wide) tile
        compiler_params=pltpu.CompilerParams(
            dimension_semantics=semantics,
            vmem_limit_bytes=32 * 1024 * 1024,             # fits v7x's 64 MiB physical VMEM
        ),
    )(x2d, params["w1"], params["b1"], params["w2"], params["b2"])

    return out2d.reshape(orig_shape)


def make_params(key):
    k1, k2, k3, k4 = jax.random.split(key, 4)
    scale = 0.02
    return {
        # Stored (in_features, out_features): y = x @ W + b  (== torch x @ W.T + b).
        "w1": (scale * jax.random.normal(k1, (N_EMBD, HIDDEN), jnp.float32)
               ).astype(jnp.bfloat16),
        "b1": (scale * jax.random.normal(k3, (1, HIDDEN), jnp.float32)
               ).astype(jnp.bfloat16),
        "w2": (scale * jax.random.normal(k2, (HIDDEN, N_EMBD), jnp.float32)
               ).astype(jnp.bfloat16),
        "b2": scale * jax.random.normal(k4, (1, N_EMBD), jnp.float32),
    }


def reference_ffn(x, p):
    """Pure-JAX f32 reference matching the PyTorch module in eval mode."""
    xf = x.astype(jnp.float32)
    w1 = p["w1"].astype(jnp.float32)
    b1 = p["b1"].astype(jnp.float32)
    w2 = p["w2"].astype(jnp.float32)
    h = jnp.maximum(xf @ w1 + b1, 0.0)
    return h @ w2 + p["b2"]


if __name__ == "__main__":
    key = jax.random.PRNGKey(0)
    kx, kx2, kp = jax.random.split(key, 3)
    params = make_params(kp)

    # Case 1: aligned shape, 2 grid steps (exercises "parallel" path).
    B, T = 4, 64                                   # (4, 64, 384): 256 rows
    x = jax.random.normal(kx, (B, T, N_EMBD), jnp.float32).astype(jnp.bfloat16)
    out = jax.block_until_ready(feed_forward(x, params))
    assert out.shape == (B, T, N_EMBD)
    assert bool(jnp.all(jnp.isfinite(out.astype(jnp.float32))))
    np.testing.assert_allclose(np.asarray(out, dtype=np.float32),
                               np.asarray(reference_ffn(x, params)),
                               rtol=2e-2, atol=2e-2)

    # Case 2: ragged row count (150 rows, not a multiple of 128) -> masked last block,
    # no wrapper pad/slice needed.
    B2, T2 = 3, 50
    x2 = jax.random.normal(kx2, (B2, T2, N_EMBD), jnp.float32).astype(jnp.bfloat16)
    out2 = jax.block_until_ready(feed_forward(x2, params))
    assert out2.shape == (B2, T2, N_EMBD)
    assert bool(jnp.all(jnp.isfinite(out2.astype(jnp.float32))))
    np.testing.assert_allclose(np.asarray(out2, dtype=np.float32),
                               np.asarray(reference_ffn(x2, params)),
                               rtol=2e-2, atol=2e-2)

    print("KERNEL_OK")
</pallas_src>

<mosaic_0001>
module attributes {stable_mosaic.version = 11 : i64} {
  func.func @ffn_kernel(%arg0: i32, %arg1: memref<128x384xbf16, #tpu.memory_space<vmem>>, %arg2: memref<384x1536xbf16, #tpu.memory_space<vmem>>, %arg3: memref<1x1536xbf16, #tpu.memory_space<vmem>>, %arg4: memref<1536x384xbf16, #tpu.memory_space<vmem>>, %arg5: memref<1x384xf32, #tpu.memory_space<vmem>>, %arg6: memref<128x384xbf16, #tpu.memory_space<vmem>>) attributes {dimension_semantics = [#tpu.dimension_semantics<parallel>], iteration_bounds = array<i64: 2>, scalar_prefetch = 0 : i64, scratch_operands = 0 : i64, tpu.core_type = #tpu.core_type<tc>, window_params = [{transform_indices = @transform_0, window_bounds = array<i64: 128, 384>}, {pipeline_mode = #tpu.pipeline_mode<synchronous>, transform_indices = @transform_1, window_bounds = array<i64: 384, 1536>}, {pipeline_mode = #tpu.pipeline_mode<synchronous>, transform_indices = @transform_2, window_bounds = array<i64: 1, 1536>}, {pipeline_mode = #tpu.pipeline_mode<synchronous>, transform_indices = @transform_3, window_bounds = array<i64: 1536, 384>}, {pipeline_mode = #tpu.pipeline_mode<synchronous>, transform_indices = @transform_4, window_bounds = array<i64: 1, 384>}, {transform_indices = @transform_5, window_bounds = array<i64: 128, 384>}]} {
    %c0 = arith.constant 0 : index
    %c0_0 = arith.constant 0 : index
    %0 = vector.load %arg1[%c0, %c0_0] : memref<128x384xbf16, #tpu.memory_space<vmem>>, vector<128x384xbf16>
    %c0_1 = arith.constant 0 : index
    %c0_2 = arith.constant 0 : index
    %1 = vector.load %arg2[%c0_1, %c0_2] : memref<384x1536xbf16, #tpu.memory_space<vmem>>, vector<384x1536xbf16>
    %cst = arith.constant dense<0.000000e+00> : vector<128x1536xf32>
    %2 = tpu.matmul %0, %1, %cst {dimension_numbers = #tpu.dot_dimension_numbers<[1], [0], [0], [1], [0, 0, 1, 1], [], []>} : vector<128x384xbf16>, vector<384x1536xbf16>, vector<128x1536xf32> -> vector<128x1536xf32>
    %3 = arith.truncf %2 : vector<128x1536xf32> to vector<128x1536xbf16>
    %c0_3 = arith.constant 0 : index
    %c0_4 = arith.constant 0 : index
    %4 = vector.load %arg3[%c0_3, %c0_4] : memref<1x1536xbf16, #tpu.memory_space<vmem>>, vector<1x1536xbf16>
    %5 = vector.broadcast %4 : vector<1x1536xbf16> to vector<128x1536xbf16>
    %6 = arith.addf %3, %5 : vector<128x1536xbf16>
    %cst_5 = arith.constant 0.000000e+00 : bf16
    %7 = vector.broadcast %cst_5 : bf16 to vector<128x1536xbf16>
    %8 = arith.maximumf %6, %7 : vector<128x1536xbf16>
    %c0_6 = arith.constant 0 : index
    %c0_7 = arith.constant 0 : index
    %9 = vector.load %arg4[%c0_6, %c0_7] : memref<1536x384xbf16, #tpu.memory_space<vmem>>, vector<1536x384xbf16>
    %cst_8 = arith.constant dense<0.000000e+00> : vector<128x384xf32>
    %10 = tpu.matmul %8, %9, %cst_8 {dimension_numbers = #tpu.dot_dimension_numbers<[1], [0], [0], [1], [0, 0, 1, 1], [], []>} : vector<128x1536xbf16>, vector<1536x384xbf16>, vector<128x384xf32> -> vector<128x384xf32>
    %c0_9 = arith.constant 0 : index
    %c0_10 = arith.constant 0 : index
    %11 = vector.load %arg5[%c0_9, %c0_10] : memref<1x384xf32, #tpu.memory_space<vmem>>, vector<1x384xf32>
    %12 = vector.broadcast %11 : vector<1x384xf32> to vector<128x384xf32>
    %13 = arith.addf %10, %12 : vector<128x384xf32>
    %14 = arith.truncf %13 : vector<128x384xf32> to vector<128x384xbf16>
    %c0_11 = arith.constant 0 : index
    %c0_12 = arith.constant 0 : index
    %15 = vector.load %arg6[%c0_11, %c0_12] : memref<128x384xbf16, #tpu.memory_space<vmem>>, vector<128x384xbf16>
    tpu.vector_store %arg6[%c0_11, %c0_12], %14 {strides = array<i32>} : memref<128x384xbf16, #tpu.memory_space<vmem>>, vector<128x384xbf16>,
    return
  }
  func.func @transform_0(%arg0: i32) -> (i32, i32) {
    %c0_i32 = arith.constant 0 : i32
    %c0_i32_0 = arith.constant 0 : i32
    return %arg0, %c0_i32 : i32, i32
  }
  func.func @transform_1(%arg0: i32) -> (i32, i32) {
    %c0_i32 = arith.constant 0 : i32
    %c0_i32_0 = arith.constant 0 : i32
    %c0_i32_1 = arith.constant 0 : i32
    return %c0_i32, %c0_i32_0 : i32, i32
  }
  func.func @transform_2(%arg0: i32) -> (i32, i32) {
    %c0_i32 = arith.constant 0 : i32
    %c0_i32_0 = arith.constant 0 : i32
    %c0_i32_1 = arith.constant 0 : i32
    return %c0_i32, %c0_i32_0 : i32, i32
  }
  func.func @transform_3(%arg0: i32) -> (i32, i32) {
    %c0_i32 = arith.constant 0 : i32
    %c0_i32_0 = arith.constant 0 : i32
    %c0_i32_1 = arith.constant 0 : i32
    return %c0_i32, %c0_i32_0 : i32, i32
  }
  func.func @transform_4(%arg0: i32) -> (i32, i32) {
    %c0_i32 = arith.constant 0 : i32
    %c0_i32_0 = arith.constant 0 : i32
    %c0_i32_1 = arith.constant 0 : i32
    return %c0_i32, %c0_i32_0 : i32, i32
  }
  func.func @transform_5(%arg0: i32) -> (i32, i32) {
    %c0_i32 = arith.constant 0 : i32
    %c0_i32_0 = arith.constant 0 : i32
    return %arg0, %c0_i32 : i32, i32
  }
}

</mosaic_0001>

<bundles_post_ra>
// kernel: tpu_custom_call.1
= control target key start
LH: loop header
LB: loop body
LE: loop exit
PB: predicated region body
PF: predicated region fallthrough
CT: control target
= control target key end

     0   :  { %10 = vsyncpa [#allocation3], 0  ;;  %s12157_s0 = inlined_call_operand.hbm [shape: bf16[256,384], index: 0, kind: input, shape index: {}]   ;;  %s12158_s1 = inlined_call_operand.hbm [shape: bf16[384,1536], index: 1, kind: input, shape index: {}]   ;;  %s12159_s2 = inlined_call_operand.hbm [shape: bf16[1,1536], index: 2, kind: input, shape index: {}]   ;;  %s12160_s3 = inlined_call_operand.hbm [shape: bf16[1536,384], index: 3, kind: input, shape index: {}]   ;;  %s12161_s4 = inlined_call_operand.hbm [shape: f32[1,384], index: 4, kind: input, shape index: {}]   ;;  %s12162_s5 = inlined_call_operand.hbm [shape: bf16[256,384], index: 5, kind: output, shape index: {}]  }
   0x1   :  { %12 = vsyncpa [#allocation3 + $0x1], 0 }
   0x2   :  { %13 = vsyncpa [#allocation6], 0 }
   0x3   :  { %14 = vsyncpa [#allocation9], 0 }
   0x4   :  { %15 = vsyncpa [#allocation4], 0 }
   0x5   :  { %17 = vsyncpa [#allocation4 + $0x1], 0  ;;  %s10212_s18 = smov 0   ;;  %s10214_s19 = smov 0  }
   0x6   :  { %s10216_s20 = smov 0   ;;  %s10218_s21 = smov 0  }
   0x7 LB: > { %s10233_s22 = sadd.s32 4294967295, %s10166_s21   ;;  %s7509_s23 = sadd.s32 4294967294, %s10166_s21   ;;  %s10166_s21 = sphi %s10218_s21, %s12512_s21   ;;  %s10162_s20 = sphi %s10216_s20, %s12511_s20   ;;  %s10158_s19 = sphi %s10214_s19, %s12510_s19   ;;  %s10154_s18 = sphi %s10212_s18, %s12509_s18  }
   0x8   : > { %p43_p0 = scmp.ne.s32.totalorder %s10158_s19, %s10154_s18  ;;  %p12163_p1 = scmp.eq.s32.totalorder %s10233_s22, 0 }
   0x9   : > { %p157_p3 = scmp.eq.s32.totalorder %s7509_s23, 1  ;;  %p7510_p5 = scmp.ge.s32.totalorder %s10166_s21, 1 }
   0xa   : > { %p10242_p4 = por %p12163_p1, %p43_p0  ;;  %p164_p7 = scmp.lt.s32.totalorder %s10166_s21, 3 }
   0xb   : > { %p10247_p6 = por %p157_p3, %p43_p0  ;;  %s10168_s27 = smov [#allocation5]  }
   0xc   : > { %s12245_s24 = scalar_select %p10242_p4, 1, 0 }
   0xd   : > { %s12246_s25 = scalar_select %p10247_p6, 1, 0 }
   0xe   : > { %p10252_p8 = pnand %p7510_p5, %p164_p7  ;;  %s176_s28 = sshll.u32 %s10168_s27, 4  ;;  %s10256_s28 = int_to_ptr.vmem [resolvable:$true] %s176_s28 }
   0xf   : > { %s10169_s30 = smov [#allocation8]   ;;  %s9950_s9 = scalar_lea.hbm %s12158_s1, 36864 }
  0x10   : > { %s12247_s26 = scalar_select %p10252_p8, 1, 0 }
  0x11   : > { %p8986_p9 = pneg %p10252_p8  ;;  %s200_s6 = sshll.u32 %s10169_s30, 4  ;;  %s10267_s6 = int_to_ptr.vmem [resolvable:$true] %s200_s6 }
  0x12   : > { %p9951_p12 = scmp.ne.s32.totalorder %s12158_s1, %s9950_s9  ;;  %p9957_p5 = scmp.lt.u32.totalorder %s9950_s9, %s12158_s1 }
  0x13   : > { %p10263_p11 = pnand %p8986_p9, %p12163_p1 }
  0x15   : > { %p10277_p13 = pneg %p10263_p11 }
  0x17   : > { %p9953_p0 = pnand %p10277_p13, %p9951_p12 }
  0x19   : > { %p9954_p3 = pneg %p9953_p0 }
  0x1b   : > { %p9959_p7 = pnand %p9957_p5, %p9954_p3 }
  0x1d   : > { %9962 = shalt.err (!%p9959_p7)
}
  0x1e   : > { %s9963_s15 = scalar_lea.vmem %s10256_s28, 36864  ;;  %p9971_p2 = scmp.lt.s32.totalorder %s10256_s28, %s10256_s28 }
  0x1f   : > { %p9964_p9 = scmp.ne.s32.totalorder %s10256_s28, %s9963_s15  ;;  %p9972_p6 = scmp.lt.s32.totalorder %s9963_s15, %s9963_s15 }
  0x21   : > { %p9966_p10 = pnand %p9964_p9, %p10277_p13  ;;  %p9973_p12 = por %p9972_p6, %p9971_p2 }
  0x23   : > { %p9967_p1 = pneg %p9966_p10 }
  0x25   : > { %p9974_p0 = pnand %p9973_p12, %p9967_p1 }
  0x27   : > { %9977 = shalt.err (!%p9974_p0)
}
  0x28   : > { %s10170_s16 = smov 768   ;;  %s10171_s17 = smov 48  }
  0x29   : > { %8989 = dma.hbm_to_vmem [thread:$0]  (!%p10263_p11), %s12158_s1, 36864, %s10256_s28, [#allocation6], %s10170_s16, %s10170_s16, %s10171_s17  }
  0x2a   : > { %s9978_s8 = scalar_lea.hbm %s12160_s3, 36864 }
  0x2b   : > { %p9979_p2 = scmp.ne.s32.totalorder %s12160_s3, %s9978_s8  ;;  %p9985_p10 = scmp.lt.u32.totalorder %s9978_s8, %s12160_s3 }
  0x2d   : > { %p9981_p1 = pnand %p9979_p2, %p10277_p13 }
  0x2f   : > { %p9982_p6 = pneg %p9981_p1 }
  0x31   : > { %p9987_p3 = pnand %p9985_p10, %p9982_p6 }
  0x33   : > { %9990 = shalt.err (!%p9987_p3)
}
  0x34   : > { %s9991_s28 = scalar_lea.vmem %s10267_s6, 36864  ;;  %p9999_p12 = scmp.lt.s32.totalorder %s10267_s6, %s10267_s6 }
  0x35   : > { %p9992_p5 = scmp.ne.s32.totalorder %s10267_s6, %s9991_s28  ;;  %p10000_p0 = scmp.lt.s32.totalorder %s9991_s28, %s9991_s28 }
  0x37   : > { %p9994_p7 = pnand %p9992_p5, %p10277_p13  ;;  %p10001_p2 = por %p10000_p0, %p9999_p12 }
  0x39   : > { %p9995_p9 = pneg %p9994_p7 }
  0x3b   : > { %p10002_p1 = pnand %p10001_p2, %p9995_p9 }
  0x3d   : > { %10005 = shalt.err (!%p10002_p1)
}
  0x3e   : > { %s12166_s14 = smov 192   ;;  %s10173_s15 = smov 12  }
  0x3f   : > { %8995 = dma.hbm_to_vmem [thread:$0]  (!%p10263_p11), %s12160_s3, 36864, %s10267_s6, [#allocation9], %s12166_s14, %s12166_s14, %s10173_s15  }
  0x40   : > { %s10174_s23 = smov [#allocation7]   ;;  %s10175_s30 = smov [#allocation10]  }
  0x41   : > { %s190_s27 = sshll.u32 %s10174_s23, 4  ;;  %s214_s7 = sshll.u32 %s10175_s30, 4  ;;  %s191_s27 = int_to_ptr.vmem [resolvable:$true] %s190_s27  ;;  %s10324_s7 = int_to_ptr.vmem [resolvable:$true] %s214_s7 }
  0x42   : > { %s10006_s10 = scalar_lea.hbm %s12159_s2, 192 }
  0x43   : > { %p10007_p6 = scmp.ne.s32.totalorder %s12159_s2, %s10006_s10  ;;  %p10013_p5 = scmp.lt.u32.totalorder %s10006_s10, %s12159_s2 }
  0x45   : > { %p10009_p10 = pnand %p10007_p6, %p10277_p13 }
  0x47   : > { %p10010_p3 = pneg %p10009_p10 }
  0x49   : > { %p10015_p7 = pnand %p10013_p5, %p10010_p3 }
  0x4b   : > { %10018 = shalt.err (!%p10015_p7)
}
  0x4c   : > { %s10019_s16 = scalar_lea.vmem %s191_s27, 192  ;;  %p10027_p2 = scmp.lt.s32.totalorder %s191_s27, %s191_s27 }
  0x4d   : > { %p10020_p9 = scmp.ne.s32.totalorder %s191_s27, %s10019_s16  ;;  %p10028_p1 = scmp.lt.s32.totalorder %s10019_s16, %s10019_s16 }
  0x4f   : > { %p10022_p12 = pnand %p10020_p9, %p10277_p13  ;;  %p10029_p4 = por %p10028_p1, %p10027_p2 }
  0x51   : > { %p10023_p0 = pneg %p10022_p12 }
  0x53   : > { %p10030_p8 = pnand %p10029_p4, %p10023_p0 }
  0x55   : > { %10033 = shalt.err (!%p10030_p8)
}
  0x56   : > { %8992 = dma.hbm_to_vmem [thread:$0]  (!%p10263_p11), %s12159_s2, 192, %s191_s27, [#allocation6]  }
  0x57   : > { %s10034_s9 = scalar_lea.hbm %s12161_s4, 48 }
  0x58   : > { %p10035_p6 = scmp.ne.s32.totalorder %s12161_s4, %s10034_s9  ;;  %p10041_p4 = scmp.lt.u32.totalorder %s10034_s9, %s12161_s4 }
  0x5a   : > { %p10037_p10 = pnand %p10035_p6, %p10277_p13 }
  0x5c   : > { %p10038_p3 = pneg %p10037_p10 }
  0x5e   : > { %p10043_p8 = pnand %p10041_p4, %p10038_p3 }
  0x60   : > { %10046 = shalt.err (!%p10043_p8)
}
  0x61   : > { %s10047_s27 = scalar_lea.vmem %s10324_s7, 48  ;;  %s10054_s6 = scalar_lea.vmem %s10324_s7, 64 }
  0x62   : > { %p10048_p5 = scmp.ne.s32.totalorder %s10324_s7, %s10047_s27  ;;  %p10055_p12 = scmp.lt.s32.totalorder %s10324_s7, %s10324_s7 }
  0x63   : > { %p10056_p0 = scmp.lt.s32.totalorder %s10054_s6, %s10047_s27 }
  0x64   : > { %p10050_p7 = pnand %p10048_p5, %p10277_p13 }
  0x65   : > { %p10057_p2 = por %p10056_p0, %p10055_p12 }
  0x66   : > { %p10051_p9 = pneg %p10050_p7 }
  0x68   : > { %p10058_p1 = pnand %p10057_p2, %p10051_p9 }
  0x6a   : > { %10061 = shalt.err (!%p10058_p1)
}
  0x6b   : > { %8998 = dma.hbm_to_vmem [thread:$0]  (!%p10263_p11), %s12161_s4, 48, %s10324_s7, [#allocation9]  }
  0x6c   : > { %s10369_s12 = sadd.s32 1, %s10166_s21   ;;  %s30_s23 = sadd.s32 1, %s10162_s20 }
  0x6d   : > { %s27_s29 = ssub.s32 %s10166_s21, %s10369_s12  ;;  %p37_p6 = scmp.ne.s32.totalorder %s10162_s20, %s10158_s19 }
  0x6e   : > { %p28_p13 = scmp.eq.s32.totalorder %s27_s29, 0  ;;  %p38_p10 = scmp.eq.s32.totalorder %s10166_s21, 0 }
  0x6f   : > { %p12250_p4 = scmp.eq.s32.totalorder %s10233_s22, 1  ;;  %p9011_p5 = scmp.lt.s32.totalorder %s10166_s21, 2 }
  0x70   : > { %s10378_s30 = scalar_select %p28_p13, %s10162_s20, %s30_s23  }
  0x71   : > { %p39_p3 = por %p38_p10, %p37_p6  ;;  %p10382_p8 = por %p12250_p4, %p37_p6 }
  0x72   : > { %s225_s9 = sand.u32 1, %s10162_s20   ;;  %s8963_s7 = smul.u32 3072, %s10166_s21 }
  0x73   : > { %s8962_s10 = smul.u32 192, %s225_s9  ;;  %p10389_p11 = pnand %p9011_p5, %p39_p3 }
  0x74   : > { %s10396_s27 = scalar_lea.hbm %s12157_s0, %s8963_s7  ;;  %s10400_s17 = scalar_lea.sflag [#allocation3], %s225_s9 }
  0x75   : > { %s229_s6 = scalar_lea.vmem [#allocation2], %s8962_s10  ;;  %s10062_s29 = scalar_lea.hbm %s10396_s27, 3072 }
  0x76   : > { %s237_s16 = sshll.u32 %s229_s6, 4  ;;  %p10063_p7 = scmp.ne.s32.totalorder %s10396_s27, %s10062_s29  ;;  %s10398_s16 = int_to_ptr.vmem [resolvable:$true] %s237_s16 }
  0x77   : > { %p10064_p9 = pneg %p10389_p11  ;;  %s10067_s13 = scalar_lea.hbm %s12157_s0, 6144 }
  0x78   : > { %p10068_p2 = scmp.lt.u32.totalorder %s10396_s27, %s12157_s0  ;;  %p10069_p1 = scmp.lt.u32.totalorder %s10067_s13, %s10062_s29 }
  0x79   : > { %p10065_p12 = pnand %p10064_p9, %p10063_p7  ;;  %p10071_p6 = scmp.lt.u32.totalorder %s10062_s29, %s10396_s27 }
  0x7a   : > { %p10070_p13 = por %p10069_p1, %p10068_p2 }
  0x7b   : > { %p10066_p0 = pneg %p10065_p12 }
  0x7c   : > { %p10072_p10 = por %p10071_p6, %p10070_p13 }
  0x7e   : > { %p10073_p3 = pnand %p10072_p10, %p10066_p0 }
  0x80   : > { %10076 = shalt.err (!%p10073_p3)
}
  0x81   : > { %s10077_s9 = scalar_lea.vmem %s10398_s16, 3072  ;;  %s10176_s10 = smov [#allocation2]  }
  0x82   : > { %p10078_p4 = scmp.ne.s32.totalorder %s10398_s16, %s10077_s9  ;;  %s10082_s6 = sshll.u32 %s10176_s10, 4  ;;  %s10083_s6 = int_to_ptr.vmem [resolvable:$false] %s10082_s6 }
  0x83   : > { %s10084_s14 = scalar_lea.vmem %s10083_s6, 6144  ;;  %p10085_p12 = scmp.lt.s32.totalorder %s10398_s16, %s10083_s6 }
  0x84   : > { %p10080_p5 = pnand %p10078_p4, %p10064_p9  ;;  %p10086_p2 = scmp.lt.s32.totalorder %s10084_s14, %s10077_s9 }
  0x86   : > { %p10081_p7 = pneg %p10080_p5  ;;  %p10087_p1 = por %p10086_p2, %p10085_p12 }
  0x88   : > { %p10088_p13 = pnand %p10087_p1, %p10081_p7 }
  0x8a   : > { %10091 = shalt.err (!%p10088_p13)
}
  0x8b   : > { %s12253_s29 = smov 192   ;;  %p12254_p9 = scmp.ne.s32.totalorder %s12247_s26, 0 }
  0x8c   : > { %9002 = dma.hbm_to_vmem [thread:$0]  (!%p10389_p11), %s10396_s27, 3072, %s10398_s16, %s10400_s17, %s12253_s29, %s12253_s29, %s10173_s15  }
  0x8d   : > { %249 = sbr.rel (%p12254_p9) target bundleno = 1221 (0x4c5), region = 40 }
  0x94   : > { %s10434_s23 = sand.u32 1, %s10158_s19   ;;  %p12255_p0 = scmp.ne.s32.totalorder %s12245_s24, 0 }
  0x95   : > { %s8964_s7 = smul.u32 192, %s10434_s23  ;;  %s252_s13 = scalar_lea.sflag [#allocation3], %s10434_s23 }
  0x97   : > { %s10440_s11 = scalar_lea.vmem [#allocation2], %s8964_s7 }
  0x98   : > { %10137 = dma.done.wait (%p12255_p0), %s252_s13, 3072  }
  0x99   : > { %10139 = vsyncadd (%p12255_p0), %s252_s13, 4294964224  ;;  %p12256_p11 = scmp.eq.s32.totalorder %s10233_s22, 0 }
  0x9b   : > { %10141 = dma.done.wait (%p12256_p11), [#allocation6], 37056   ;;  %p12257_p6 = pmov %p12256_p11 }
  0x9d   : > { %10143 = vsyncadd (%p12257_p6), [#allocation6], 4294930240  ;;  %p12258_p10 = pmov %p12257_p6 }
  0x9e   : > { %p12259_p3 = pmov %p12257_p6 }
  0x9f   : > { %10145 = dma.done.wait (%p12258_p10), [#allocation9], 36912  }
  0xa0   : > { %10147 = vsyncadd (%p12259_p3), [#allocation9], 4294930384  ;;  %v9061_v0 = vld [vmem:[#allocation5 + $0x4] ss:$48 sps:$4 sm:$0xff]   ;;  %v9063_v1 = vld [vmem:[#allocation5 + $0xc] ss:$48 sps:$4 sm:$0xff]  }
  0xa1   : > { %2189 = vmatprep.subr.bf16.mxu0 %v9061_v0  ;;  %v9065_v2 = vld [vmem:[#allocation5] ss:$48 sps:$4 sm:$0xff]   ;;  %v9066_v3 = vld [vmem:[#allocation5 + $0x8] ss:$48 sps:$4 sm:$0xff]   ;;  %2415 = vmatprep.subr.bf16.mxu1 %v9063_v1  ;;  %v9067_v4 = vld [vmem:[#allocation5 + $0x64] ss:$48 sps:$4 sm:$0xff]  }
  0xa2   : > { %2190 = vmatpush1.bf16.msra.mxu0 %v9065_v2  ;;  %2416 = vmatpush1.bf16.msra.mxu1 %v9066_v3  ;;  %v9069_v5 = vld [vmem:[#allocation5 + $0x6c] ss:$48 sps:$4 sm:$0xff]   ;;  %v9071_v6 = vld [vmem:[#allocation5 + $0x60] ss:$48 sps:$4 sm:$0xff]   ;;  %v9072_v7 = vld [vmem:[#allocation5 + $0x68] ss:$48 sps:$4 sm:$0xff]  }
  0xa3   : > { %2191 = vmatprep.subr.bf16.mxu0 %v9067_v4  ;;  %2417 = vmatprep.subr.bf16.mxu1 %v9069_v5  ;;  %v9073_v8 = vld [vmem:[#allocation5 + $0xc4] ss:$48 sps:$4 sm:$0xff]   ;;  %v9075_v9 = vld [vmem:[#allocation5 + $0xcc] ss:$48 sps:$4 sm:$0xff]   ;;  %v9077_v10 = vld [vmem:[#allocation5 + $0xc0] ss:$48 sps:$4 sm:$0xff]  }
  0xa4   : > { %v9078_v11 = vld [vmem:[#allocation5 + $0xc8] ss:$48 sps:$4 sm:$0xff]   ;;  %v9079_v12 = vld [vmem:[#allocation5 + $0x124] ss:$48 sps:$4 sm:$0xff]   ;;  %v9081_v13 = vld [vmem:[#allocation5 + $0x12c] ss:$48 sps:$4 sm:$0xff]  }
  0xa5   : > { %v9083_v14 = vld [vmem:[#allocation5 + $0x120] ss:$48 sps:$4 sm:$0xff]   ;;  %v9084_v15 = vld [vmem:[#allocation5 + $0x128] ss:$48 sps:$4 sm:$0xff]   ;;  %v9085_v16 = vld [vmem:[#allocation5 + $0x184] ss:$48 sps:$4 sm:$0xff]  }
  0xa6   : > { %2192 = vmatpush1.bf16.msra.mxu0 %v9071_v6  ;;  %2418 = vmatpush1.bf16.msra.mxu1 %v9072_v7  ;;  %v9087_v17 = vld [vmem:[#allocation5 + $0x18c] ss:$48 sps:$4 sm:$0xff]   ;;  %v9089_v18 = vld [vmem:[#allocation5 + $0x180] ss:$48 sps:$4 sm:$0xff]   ;;  %v9090_v19 = vld [vmem:[#allocation5 + $0x188] ss:$48 sps:$4 sm:$0xff]  }
  0xa7   : > { %2193 = vmatprep.subr.bf16.mxu0 %v9073_v8  ;;  %2419 = vmatprep.subr.bf16.mxu1 %v9075_v9  ;;  %v9091_v20 = vld [vmem:[#allocation5 + $0x1e4] ss:$48 sps:$4 sm:$0xff]   ;;  %v9093_v21 = vld [vmem:[#allocation5 + $0x1ec] ss:$48 sps:$4 sm:$0xff]   ;;  %v9095_v22 = vld [vmem:[#allocation5 + $0x1e0] ss:$48 sps:$4 sm:$0xff]  }
  0xa8   : > { %v9096_v23 = vld [vmem:[#allocation5 + $0x1e8] ss:$48 sps:$4 sm:$0xff]   ;;  %v9097_v24 = vld [vmem:[#allocation5 + $0x244] ss:$48 sps:$4 sm:$0xff]   ;;  %v9099_v25 = vld [vmem:[#allocation5 + $0x24c] ss:$48 sps:$4 sm:$0xff]  }
  0xa9   : > { %v9101_v26 = vld [vmem:[#allocation5 + $0x240] ss:$48 sps:$4 sm:$0xff]   ;;  %v9102_v27 = vld [vmem:[#allocation5 + $0x248] ss:$48 sps:$4 sm:$0xff]   ;;  %v9103_v28 = vld [vmem:[#allocation5 + $0x2a4] ss:$48 sps:$4 sm:$0xff]  }
  0xaa   : > { %2194 = vmatpush1.bf16.msra.mxu0 %v9077_v10  ;;  %2420 = vmatpush1.bf16.msra.mxu1 %v9078_v11  ;;  %v9105_v29 = vld [vmem:[#allocation5 + $0x2ac] ss:$48 sps:$4 sm:$0xff]   ;;  %v9107_v30 = vld [vmem:[#allocation5 + $0x2a0] ss:$48 sps:$4 sm:$0xff]   ;;  %v9108_v31 = vld [vmem:[#allocation5 + $0x2a8] ss:$48 sps:$4 sm:$0xff]  }
  0xab   : > { %2195 = vmatprep.subr.bf16.mxu0 %v9079_v12  ;;  %2421 = vmatprep.subr.bf16.mxu1 %v9081_v13  ;;  %v9109_v32 = vld [vmem:[#allocation5 + $0x304] ss:$48 sps:$4 sm:$0xff]   ;;  %v9111_v33 = vld [vmem:[#allocation5 + $0x30c] ss:$48 sps:$4 sm:$0xff]   ;;  %v9113_v34 = vld [vmem:[#allocation5 + $0x300] ss:$48 sps:$4 sm:$0xff]  }
  0xac   : > { %v9114_v35 = vld [vmem:[#allocation5 + $0x308] ss:$48 sps:$4 sm:$0xff]   ;;  %v9115_v36 = vld [vmem:[#allocation5 + $0x364] ss:$48 sps:$4 sm:$0xff]   ;;  %v9117_v37 = vld [vmem:[#allocation5 + $0x36c] ss:$48 sps:$4 sm:$0xff]  }
  0xad   : > { %v9119_v38 = vld [vmem:[#allocation5 + $0x360] ss:$48 sps:$4 sm:$0xff]   ;;  %v9120_v39 = vld [vmem:[#allocation5 + $0x368] ss:$48 sps:$4 sm:$0xff]   ;;  %v9121_v40 = vld [vmem:[#allocation5 + $0x3c4] ss:$48 sps:$4 sm:$0xff]  }
  0xae   : > { %2196 = vmatpush1.bf16.msra.mxu0 %v9083_v14  ;;  %2422 = vmatpush1.bf16.msra.mxu1 %v9084_v15  ;;  %v9123_v41 = vld [vmem:[#allocation5 + $0x3cc] ss:$48 sps:$4 sm:$0xff]   ;;  %v9125_v42 = vld [vmem:[#allocation5 + $0x3c0] ss:$48 sps:$4 sm:$0xff]   ;;  %v9126_v43 = vld [vmem:[#allocation5 + $0x3c8] ss:$48 sps:$4 sm:$0xff]  }
  0xaf   : > { %2197 = vmatprep.subr.bf16.mxu0 %v9085_v16  ;;  %2423 = vmatprep.subr.bf16.mxu1 %v9087_v17  ;;  %v9127_v44 = vld [vmem:[#allocation5 + $0x424] ss:$48 sps:$4 sm:$0xff]   ;;  %v9129_v45 = vld [vmem:[#allocation5 + $0x42c] ss:$48 sps:$4 sm:$0xff]   ;;  %v9131_v46 = vld [vmem:[#allocation5 + $0x420] ss:$48 sps:$4 sm:$0xff]  }
  0xb0   : > { %v9132_v47 = vld [vmem:[#allocation5 + $0x428] ss:$48 sps:$4 sm:$0xff]   ;;  %v9157_v48 = vld [vmem:[%s10440_s11 + $0x4] ss:$12 sps:$4 sm:$0xff]   ;;  %v9135_v50 = vld [vmem:[#allocation5 + $0x48c] ss:$48 sps:$4 sm:$0xff]  }
  0xb1   : > { %v9133_v49 = vld [vmem:[#allocation5 + $0x484] ss:$48 sps:$4 sm:$0xff]   ;;  %2221 = vmatprep.mubr.bf16.mxu0 %v9157_v48  ;;  %2447 = vmatprep.mubr.bf16.mxu1 %v9157_v48  ;;  %v9137_v51 = vld [vmem:[#allocation5 + $0x480] ss:$48 sps:$4 sm:$0xff]   ;;  %v9138_v52 = vld [vmem:[#allocation5 + $0x488] ss:$48 sps:$4 sm:$0xff]  }
  0xb2   : > { %2198 = vmatpush1.bf16.msra.mxu0 %v9089_v18  ;;  %2424 = vmatpush1.bf16.msra.mxu1 %v9090_v19  ;;  %v9139_v53 = vld [vmem:[#allocation5 + $0x4e4] ss:$48 sps:$4 sm:$0xff]   ;;  %v9141_v54 = vld [vmem:[#allocation5 + $0x4ec] ss:$48 sps:$4 sm:$0xff]   ;;  %v9143_v55 = vld [vmem:[#allocation5 + $0x4e0] ss:$48 sps:$4 sm:$0xff]  }
  0xb3   : > { %2199 = vmatprep.subr.bf16.mxu0 %v9091_v20  ;;  %2425 = vmatprep.subr.bf16.mxu1 %v9093_v21  ;;  %v9144_v56 = vld [vmem:[#allocation5 + $0x4e8] ss:$48 sps:$4 sm:$0xff]   ;;  %v9145_v57 = vld [vmem:[#allocation5 + $0x544] ss:$48 sps:$4 sm:$0xff]   ;;  %v9147_v58 = vld [vmem:[#allocation5 + $0x54c] ss:$48 sps:$4 sm:$0xff]  }
  0xb4   : > { %v9149_v59 = vld [vmem:[#allocation5 + $0x540] ss:$48 sps:$4 sm:$0xff]   ;;  %v9150_v60 = vld [vmem:[#allocation5 + $0x548] ss:$48 sps:$4 sm:$0xff]   ;;  %v9151_v61 = vld [vmem:[#allocation5 + $0x5a4] ss:$48 sps:$4 sm:$0xff]  }
  0xb5   : > { %v9153_v62 = vld [vmem:[#allocation5 + $0x5ac] ss:$48 sps:$4 sm:$0xff]   ;;  %v9155_v63 = vld [vmem:[#allocation5 + $0x5a0] ss:$48 sps:$4 sm:$0xff]   ;;  %v9156_v0 = vld [vmem:[#allocation5 + $0x5a8] ss:$48 sps:$4 sm:$0xff]  }
  0xb6   : > { %2200 = vmatpush1.bf16.msra.mxu0 %v9095_v22  ;;  %2426 = vmatpush1.bf16.msra.mxu1 %v9096_v23  ;;  %v9162_v1 = vld [vmem:[#allocation5 + $0x60c] ss:$48 sps:$4 sm:$0xff]   ;;  %v9165_v2 = vld [vmem:[#allocation5 + $0x604] ss:$48 sps:$4 sm:$0xff]   ;;  %v9160_v4 = vld [vmem:[#allocation5 + $0x608] ss:$48 sps:$4 sm:$0xff]  }
  0xb7   : > { %2201 = vmatprep.subr.bf16.mxu0 %v9097_v24  ;;  %2427 = vmatprep.subr.bf16.mxu1 %v9099_v25  ;;  %v10456_v3 = vld [vmem:[%s10440_s11] ss:$12 sps:$4 sm:$0xff]   ;;  %v10459_v6 = vld [vmem:[%s10440_s11 + $0x1c] ss:$12 sps:$4 sm:$0xff]   ;;  %v9174_v8 = vld [vmem:[#allocation5 + $0x664] ss:$48 sps:$4 sm:$0xff]  }
  0xb8   : > { %v9163_v5 = vld [vmem:[#allocation5 + $0x600] ss:$48 sps:$4 sm:$0xff]   ;;  %v9171_v7 = vld [vmem:[#allocation5 + $0x66c] ss:$48 sps:$4 sm:$0xff]   ;;  %v9169_v9 = vld [vmem:[#allocation5 + $0x668] ss:$48 sps:$4 sm:$0xff]  }
  0xb9   : > { %v9172_v10 = vld [vmem:[#allocation5 + $0x660] ss:$48 sps:$4 sm:$0xff]   ;;  %v9180_v11 = vld [vmem:[#allocation5 + $0x6cc] ss:$48 sps:$4 sm:$0xff]   ;;  %v9183_v12 = vld [vmem:[#allocation5 + $0x6c4] ss:$48 sps:$4 sm:$0xff]  }
  0xba   : > { %2202 = vmatpush1.bf16.msra.mxu0 %v9101_v26  ;;  %2428 = vmatpush1.bf16.msra.mxu1 %v9102_v27  ;;  %v10466_v13 = vld [vmem:[%s10440_s11 + $0x18] ss:$12 sps:$4 sm:$0xff]   ;;  %v10469_v14 = vld [vmem:[%s10440_s11 + $0x34] ss:$12 sps:$4 sm:$0xff]   ;;  %v9189_v17 = vld [vmem:[#allocation5 + $0x72c] ss:$48 sps:$4 sm:$0xff]  }
  0xbb   : > { %2203 = vmatprep.subr.bf16.mxu0 %v9103_v28  ;;  %2429 = vmatprep.subr.bf16.mxu1 %v9105_v29  ;;  %v9178_v15 = vld [vmem:[#allocation5 + $0x6c8] ss:$48 sps:$4 sm:$0xff]   ;;  %v9181_v16 = vld [vmem:[#allocation5 + $0x6c0] ss:$48 sps:$4 sm:$0xff]   ;;  %v9192_v18 = vld [vmem:[#allocation5 + $0x724] ss:$48 sps:$4 sm:$0xff]  }
  0xbc   : > { %v9187_v19 = vld [vmem:[#allocation5 + $0x728] ss:$48 sps:$4 sm:$0xff]   ;;  %v9190_v20 = vld [vmem:[#allocation5 + $0x720] ss:$48 sps:$4 sm:$0xff]   ;;  %v9198_v21 = vld [vmem:[#allocation5 + $0x78c] ss:$48 sps:$4 sm:$0xff]  }
  0xbd   : > { %v9201_v22 = vld [vmem:[#allocation5 + $0x784] ss:$48 sps:$4 sm:$0xff]   ;;  %v10476_v23 = vld [vmem:[%s10440_s11 + $0x30] ss:$12 sps:$4 sm:$0xff]   ;;  %v10479_v24 = vld [vmem:[%s10440_s11 + $0x4c] ss:$12 sps:$4 sm:$0xff]  }
  0xbe   : > { %2204 = vmatpush1.bf16.msra.mxu0 %v9107_v30  ;;  %2430 = vmatpush1.bf16.msra.mxu1 %v9108_v31  ;;  %v9196_v25 = vld [vmem:[#allocation5 + $0x788] ss:$48 sps:$4 sm:$0xff]   ;;  %v9199_v26 = vld [vmem:[#allocation5 + $0x780] ss:$48 sps:$4 sm:$0xff]   ;;  %v9207_v27 = vld [vmem:[#allocation5 + $0x7ec] ss:$48 sps:$4 sm:$0xff]  }
  0xbf   : > { %2205 = vmatprep.subr.bf16.mxu0 %v9109_v32  ;;  %2431 = vmatprep.subr.bf16.mxu1 %v9111_v33  ;;  %v9210_v28 = vld [vmem:[#allocation5 + $0x7e4] ss:$48 sps:$4 sm:$0xff]   ;;  %v9205_v29 = vld [vmem:[#allocation5 + $0x7e8] ss:$48 sps:$4 sm:$0xff]   ;;  %v9208_v30 = vld [vmem:[#allocation5 + $0x7e0] ss:$48 sps:$4 sm:$0xff]  }
  0xc0   : > { %v9216_v31 = vld [vmem:[#allocation5 + $0x84c] ss:$48 sps:$4 sm:$0xff]   ;;  %v9219_v32 = vld [vmem:[#allocation5 + $0x844] ss:$48 sps:$4 sm:$0xff]   ;;  %s12029_s24 = scalar_lea.vmem [#allocation11], %s8964_s7  ;;  %s8965_s26 = smul.u32 3072, %s10233_s22 }
  0xc1   : > { %v9186_v33 = vld [vmem:[%s10440_s11 + $0x48] ss:$12 sps:$4 sm:$0xff]   ;;  %v9220_v48 = vld [vmem:[%s10440_s11 + $0xac] ss:$12 sps:$4 sm:$0xff]   ;;  %s7398_s15 = sshll.u32 %s12029_s24, 4  ;;  %s7384_s22 = scalar_lea.sflag [#allocation4], %s10434_s23  ;;  %s12110_s15 = int_to_ptr.vmem [resolvable:$true] %s7398_s15 }
  0xc2   : > { %2206 = vmatpush1.bf16.msra.mxu0 %v9113_v34  ;;  %2432 = vmatpush1.bf16.msra.mxu1 %v9114_v35  ;;  %v9193_v34 = vld [vmem:[%s10440_s11 + $0x64] ss:$12 sps:$4 sm:$0xff]   ;;  %v9214_v35 = vld [vmem:[#allocation5 + $0x848] ss:$48 sps:$4 sm:$0xff]   ;;  %s12108_s17 = scalar_lea.hbm %s12162_s5, %s8965_s26  ;;  %s10092_s28 = scalar_lea.vmem %s12110_s15, 3072 }
  0xc3   : > { %2207 = vmatprep.subr.bf16.mxu0 %v9115_v36  ;;  %2433 = vmatprep.subr.bf16.mxu1 %v9117_v37  ;;  %v9217_v36 = vld [vmem:[#allocation5 + $0x840] ss:$48 sps:$4 sm:$0xff]   ;;  %v9225_v37 = vld [vmem:[#allocation5 + $0x8ac] ss:$48 sps:$4 sm:$0xff]   ;;  %p10093_p4 = scmp.ne.s32.totalorder %s12110_s15, %s10092_s28  ;;  %s10179_s9 = smov [#allocation11]  }
  0xc4   : > { %s10096_s10 = sshll.u32 %s10179_s9, 4  ;;  %s10097_s10 = int_to_ptr.vmem [resolvable:$false] %s10096_s10 }
  0xc5   : > { %p10094_p5 = pnand %p10093_p4, %p10382_p8  ;;  %s10098_s6 = scalar_lea.vmem %s10097_s10, 6144 }
  0xc6   : > { %2208 = vmatpush1.bf16.msra.mxu0 %v9119_v38  ;;  %2434 = vmatpush1.bf16.msra.mxu1 %v9120_v39  ;;  %v9228_v38 = vld [vmem:[#allocation5 + $0x8a4] ss:$48 sps:$4 sm:$0xff]   ;;  %v9223_v39 = vld [vmem:[#allocation5 + $0x8a8] ss:$48 sps:$4 sm:$0xff]   ;;  %p10099_p12 = scmp.lt.s32.totalorder %s12110_s15, %s10097_s10  ;;  %p10100_p2 = scmp.lt.s32.totalorder %s10098_s6, %s10092_s28 }
  0xc7   : > { %2209 = vmatprep.subr.bf16.mxu0 %v9121_v40  ;;  %2435 = vmatprep.subr.bf16.mxu1 %v9123_v41  ;;  %v9226_v40 = vld [vmem:[#allocation5 + $0x8a0] ss:$48 sps:$4 sm:$0xff]   ;;  %v9232_v41 = vld [vmem:[#allocation5 + $0x14] ss:$48 sps:$4 sm:$0xff]   ;;  %p10095_p7 = pneg %p10094_p5 }
  0xc8   : > { %p10101_p1 = por %p10100_p2, %p10099_p12 }
  0xca   : > { %2210 = vmatpush1.bf16.msra.mxu0 %v9125_v42  ;;  %2436 = vmatpush1.bf16.msra.mxu1 %v9126_v43  ;;  %v9235_v42 = vld [vmem:[#allocation5 + $0x1c] ss:$48 sps:$4 sm:$0xff]   ;;  %p10102_p13 = pnand %p10101_p1, %p10095_p7 }
  0xcb   : > { %2211 = vmatprep.subr.bf16.mxu0 %v9127_v44  ;;  %2437 = vmatprep.subr.bf16.mxu1 %v9129_v45  ;;  %v9195_v43 = vld [vmem:[%s10440_s11 + $0x60] ss:$12 sps:$4 sm:$0xff]   ;;  %v9202_v44 = vld [vmem:[%s10440_s11 + $0x7c] ss:$12 sps:$4 sm:$0xff]   ;;  %v9204_v45 = vld [vmem:[%s10440_s11 + $0x78] ss:$12 sps:$4 sm:$0xff]  }
  0xce   : > { %2212 = vmatpush1.bf16.msra.mxu0 %v9131_v46  ;;  %2438 = vmatpush1.bf16.msra.mxu1 %v9132_v47  ;;  %v9211_v46 = vld [vmem:[%s10440_s11 + $0x94] ss:$12 sps:$4 sm:$0xff]   ;;  %v9213_v47 = vld [vmem:[%s10440_s11 + $0x90] ss:$12 sps:$4 sm:$0xff]  }
  0xcf   : > { %2213 = vmatprep.subr.bf16.mxu0 %v9133_v49  ;;  %2439 = vmatprep.subr.bf16.mxu1 %v9135_v50  ;;  %v9222_v49 = vld [vmem:[%s10440_s11 + $0xa8] ss:$12 sps:$4 sm:$0xff]   ;;  %v12169_v50 = vmov 0  }
  0xd2   : > { %2214 = vmatpush1.bf16.msra.mxu0 %v9137_v51  ;;  %2440 = vmatpush1.bf16.msra.mxu1 %v9138_v52  ;;  %v9229_v51 = vld [vmem:[%s10440_s11 + $0x8] ss:$12 sps:$4 sm:$0xff]   ;;  %v9230_v52 = vld [vmem:[#allocation5 + $0x10] ss:$48 sps:$4 sm:$0xff]  }
  0xd3   : > { %2215 = vmatprep.subr.bf16.mxu0 %v9139_v53  ;;  %2441 = vmatprep.subr.bf16.mxu1 %v9141_v54  ;;  %v9233_v53 = vld [vmem:[#allocation5 + $0x18] ss:$48 sps:$4 sm:$0xff]   ;;  %v9238_v54 = vld [vmem:[#allocation5 + $0x74] ss:$48 sps:$4 sm:$0xff]  }
  0xd6   : > { %2216 = vmatpush1.bf16.msra.mxu0 %v9143_v55  ;;  %2442 = vmatpush1.bf16.msra.mxu1 %v9144_v56  ;;  %v9241_v55 = vld [vmem:[#allocation5 + $0x7c] ss:$48 sps:$4 sm:$0xff]   ;;  %v9236_v56 = vld [vmem:[#allocation5 + $0x70] ss:$48 sps:$4 sm:$0xff]  }
  0xd7   : > { %2217 = vmatprep.subr.bf16.mxu0 %v9145_v57  ;;  %2443 = vmatprep.subr.bf16.mxu1 %v9147_v58  ;;  %v9239_v57 = vld [vmem:[#allocation5 + $0x78] ss:$48 sps:$4 sm:$0xff]   ;;  %v9245_v58 = vld [vmem:[#allocation5 + $0xd4] ss:$48 sps:$4 sm:$0xff]  }
  0xda   : > { %2218 = vmatpush1.bf16.msra.mxu0 %v9149_v59  ;;  %2444 = vmatpush1.bf16.msra.mxu1 %v9150_v60  ;;  %v9248_v59 = vld [vmem:[#allocation5 + $0xdc] ss:$48 sps:$4 sm:$0xff]  }
  0xdb   : > { %2219 = vmatprep.subr.bf16.mxu0 %v9151_v61  ;;  %2445 = vmatprep.subr.bf16.mxu1 %v9153_v62  ;;  %v9242_v60 = vld [vmem:[%s10440_s11 + $0x20] ss:$12 sps:$4 sm:$0xff]   ;;  %v9246_v62 = vld [vmem:[#allocation5 + $0xd8] ss:$48 sps:$4 sm:$0xff]  }
  0xdc   : > { %v9243_v61 = vld [vmem:[#allocation5 + $0xd0] ss:$48 sps:$4 sm:$0xff]  }
  0xde   : > { %2220 = vmatpush1.bf16.msra.mxu0 %v9155_v63  ;;  %2446 = vmatpush1.bf16.msra.mxu1 %v9156_v0  ;;  %v9251_v63 = vld [vmem:[#allocation5 + $0x134] ss:$48 sps:$4 sm:$0xff]   ;;  %v9254_v0 = vld [vmem:[#allocation5 + $0x13c] ss:$48 sps:$4 sm:$0xff]  }
  0xdf   : > { %2528 = vmatprep.subr.bf16.mxu1 %v9162_v1  ;;  %2302 = vmatprep.subr.bf16.mxu0 %v9165_v2  ;;  %v9249_v1 = vld [vmem:[#allocation5 + $0x130] ss:$48 sps:$4 sm:$0xff]   ;;  %v9252_v2 = vld [vmem:[#allocation5 + $0x138] ss:$48 sps:$4 sm:$0xff]  }
  0xe1   : > { %2222 = vmatmul.mubr.bf16.vlgmr.msra.gmra.mrb[0].mxu0 %v10456_v3  ;;  %2448 = vmatmul.mubr.bf16.vlgmr.msra.gmra.mrb[0].mxu1 %v10456_v3 }
  0xe2   : > { %2529 = vmatpush1.bf16.msra.mxu1 %v9160_v4  ;;  %2303 = vmatpush1.bf16.msra.mxu0 %v9163_v5  ;;  %v9258_v4 = vld [vmem:[#allocation5 + $0x194] ss:$48 sps:$4 sm:$0xff]   ;;  %v9261_v5 = vld [vmem:[#allocation5 + $0x19c] ss:$48 sps:$4 sm:$0xff]  }
  0xe3   : > { %2231 = vmatprep.mubr.bf16.mxu0 %v10459_v6  ;;  %2457 = vmatprep.mubr.bf16.mxu1 %v10459_v6 }
  0xe4   : > { %2530 = vmatprep.subr.bf16.mxu1 %v9171_v7  ;;  %2304 = vmatprep.subr.bf16.mxu0 %v9174_v8  ;;  %v9255_v7 = vld [vmem:[%s10440_s11 + $0x38] ss:$12 sps:$4 sm:$0xff]   ;;  %v9256_v8 = vld [vmem:[#allocation5 + $0x190] ss:$48 sps:$4 sm:$0xff]  }
  0xe6   : > { %2531 = vmatpush1.bf16.msra.mxu1 %v9169_v9  ;;  %2305 = vmatpush1.bf16.msra.mxu0 %v9172_v10  ;;  %v9259_v9 = vld [vmem:[#allocation5 + $0x198] ss:$48 sps:$4 sm:$0xff]   ;;  %v9264_v10 = vld [vmem:[#allocation5 + $0x1f4] ss:$48 sps:$4 sm:$0xff]  }
  0xe7   : > { %2532 = vmatprep.subr.bf16.mxu1 %v9180_v11  ;;  %2306 = vmatprep.subr.bf16.mxu0 %v9183_v12  ;;  %v9267_v11 = vld [vmem:[#allocation5 + $0x1fc] ss:$48 sps:$4 sm:$0xff]   ;;  %v9262_v12 = vld [vmem:[#allocation5 + $0x1f0] ss:$48 sps:$4 sm:$0xff]  }
  0xe9   : > { %2232 = vmatmul.mubr.bf16.gmra.mrb[4].mxu0 %v10466_v13  ;;  %2458 = vmatmul.mubr.bf16.gmra.mrb[4].mxu1 %v10466_v13 }
  0xea   : > { %2241 = vmatprep.mubr.bf16.mxu0 %v10469_v14  ;;  %2467 = vmatprep.mubr.bf16.mxu1 %v10469_v14 }
  0xeb   : > { %2533 = vmatpush1.bf16.msra.mxu1 %v9178_v15  ;;  %2307 = vmatpush1.bf16.msra.mxu0 %v9181_v16  ;;  %v9265_v15 = vld [vmem:[#allocation5 + $0x1f8] ss:$48 sps:$4 sm:$0xff]   ;;  %v9271_v16 = vld [vmem:[#allocation5 + $0x254] ss:$48 sps:$4 sm:$0xff]  }
  0xec   : > { %2534 = vmatprep.subr.bf16.mxu1 %v9189_v17  ;;  %2308 = vmatprep.subr.bf16.mxu0 %v9192_v18  ;;  %v9274_v17 = vld [vmem:[#allocation5 + $0x25c] ss:$48 sps:$4 sm:$0xff]  }
  0xed   : > { %v9268_v18 = vld [vmem:[%s10440_s11 + $0x50] ss:$12 sps:$4 sm:$0xff]  }
  0xef   : > { %2535 = vmatpush1.bf16.msra.mxu1 %v9187_v19  ;;  %2309 = vmatpush1.bf16.msra.mxu0 %v9190_v20  ;;  %v9269_v19 = vld [vmem:[#allocation5 + $0x250] ss:$48 sps:$4 sm:$0xff]   ;;  %v9272_v20 = vld [vmem:[#allocation5 + $0x258] ss:$48 sps:$4 sm:$0xff]  }
  0xf0   : > { %2536 = vmatprep.subr.bf16.mxu1 %v9198_v21  ;;  %2310 = vmatprep.subr.bf16.mxu0 %v9201_v22  ;;  %v9277_v21 = vld [vmem:[#allocation5 + $0x2b4] ss:$48 sps:$4 sm:$0xff]   ;;  %v9280_v22 = vld [vmem:[#allocation5 + $0x2bc] ss:$48 sps:$4 sm:$0xff]  }
  0xf1   : > { %2242 = vmatmul.mubr.bf16.gmra.mrb[8].mxu0 %v10476_v23  ;;  %2468 = vmatmul.mubr.bf16.gmra.mrb[8].mxu1 %v10476_v23 }
  0xf2   : > { %2251 = vmatprep.mubr.bf16.mxu0 %v10479_v24  ;;  %2477 = vmatprep.mubr.bf16.mxu1 %v10479_v24 }
  0xf3   : > { %2537 = vmatpush1.bf16.msra.mxu1 %v9196_v25  ;;  %2311 = vmatpush1.bf16.msra.mxu0 %v9199_v26  ;;  %v9275_v25 = vld [vmem:[#allocation5 + $0x2b0] ss:$48 sps:$4 sm:$0xff]   ;;  %v9278_v26 = vld [vmem:[#allocation5 + $0x2b8] ss:$48 sps:$4 sm:$0xff]  }
  0xf4   : > { %2538 = vmatprep.subr.bf16.mxu1 %v9207_v27  ;;  %2312 = vmatprep.subr.bf16.mxu0 %v9210_v28  ;;  %v9284_v27 = vld [vmem:[#allocation5 + $0x314] ss:$48 sps:$4 sm:$0xff]   ;;  %v9287_v28 = vld [vmem:[#allocation5 + $0x31c] ss:$48 sps:$4 sm:$0xff]  }
  0xf7   : > { %2539 = vmatpush1.bf16.msra.mxu1 %v9205_v29  ;;  %2313 = vmatpush1.bf16.msra.mxu0 %v9208_v30  ;;  %v9281_v29 = vld [vmem:[%s10440_s11 + $0x68] ss:$12 sps:$4 sm:$0xff]   ;;  %v9282_v30 = vld [vmem:[#allocation5 + $0x310] ss:$48 sps:$4 sm:$0xff]  }
  0xf8   : > { %2540 = vmatprep.subr.bf16.mxu1 %v9216_v31  ;;  %2314 = vmatprep.subr.bf16.mxu0 %v9219_v32  ;;  %v9285_v31 = vld [vmem:[#allocation5 + $0x318] ss:$48 sps:$4 sm:$0xff]   ;;  %v9290_v32 = vld [vmem:[#allocation5 + $0x374] ss:$48 sps:$4 sm:$0xff]  }
  0xf9   : > { %2252 = vmatmul.mubr.bf16.gmra.mrb[12].mxu0 %v9186_v33  ;;  %2478 = vmatmul.mubr.bf16.gmra.mrb[12].mxu1 %v9186_v33  ;;  %v9293_v33 = vld [vmem:[#allocation5 + $0x37c] ss:$48 sps:$4 sm:$0xff]  }
  0xfa   : > { %2261 = vmatprep.mubr.bf16.mxu0 %v9193_v34  ;;  %2487 = vmatprep.mubr.bf16.mxu1 %v9193_v34  ;;  %v9288_v34 = vld [vmem:[#allocation5 + $0x370] ss:$48 sps:$4 sm:$0xff]  }
  0xfb   : > { %2541 = vmatpush1.bf16.msra.mxu1 %v9214_v35  ;;  %2315 = vmatpush1.bf16.msra.mxu0 %v9217_v36  ;;  %v9291_v35 = vld [vmem:[#allocation5 + $0x378] ss:$48 sps:$4 sm:$0xff]   ;;  %v9297_v36 = vld [vmem:[#allocation5 + $0x3d4] ss:$48 sps:$4 sm:$0xff]  }
  0xfc   : > { %2542 = vmatprep.subr.bf16.mxu1 %v9225_v37  ;;  %2316 = vmatprep.subr.bf16.mxu0 %v9228_v38  ;;  %v9300_v37 = vld [vmem:[#allocation5 + $0x3dc] ss:$48 sps:$4 sm:$0xff]  }
  0xfd   : > { %v9294_v38 = vld [vmem:[%s10440_s11 + $0x80] ss:$12 sps:$4 sm:$0xff]  }
  0xff   : > { %2543 = vmatpush1.bf16.msra.mxu1 %v9223_v39  ;;  %2317 = vmatpush1.bf16.msra.mxu0 %v9226_v40  ;;  %v9295_v39 = vld [vmem:[#allocation5 + $0x3d0] ss:$48 sps:$4 sm:$0xff]   ;;  %v9298_v40 = vld [vmem:[#allocation5 + $0x3d8] ss:$48 sps:$4 sm:$0xff]  }
 0x100   : > { %2641 = vmatprep.subr.bf16.mxu0 %v9232_v41  ;;  %2867 = vmatprep.subr.bf16.mxu1 %v9235_v42  ;;  %v9303_v41 = vld [vmem:[#allocation5 + $0x434] ss:$48 sps:$4 sm:$0xff]   ;;  %v9306_v42 = vld [vmem:[#allocation5 + $0x43c] ss:$48 sps:$4 sm:$0xff]  }
 0x101   : > { %2262 = vmatmul.mubr.bf16.gmra.mrb[16].mxu0 %v9195_v43  ;;  %2488 = vmatmul.mubr.bf16.gmra.mrb[16].mxu1 %v9195_v43  ;;  %v9301_v43 = vld [vmem:[#allocation5 + $0x430] ss:$48 sps:$4 sm:$0xff]  }
 0x102   : > { %2271 = vmatprep.mubr.bf16.mxu0 %v9202_v44  ;;  %2497 = vmatprep.mubr.bf16.mxu1 %v9202_v44  ;;  %v9304_v44 = vld [vmem:[#allocation5 + $0x438] ss:$48 sps:$4 sm:$0xff]  }
 0x109   : > { %2272 = vmatmul.mubr.bf16.gmra.mrb[20].mxu0 %v9204_v45  ;;  %2498 = vmatmul.mubr.bf16.gmra.mrb[20].mxu1 %v9204_v45  ;;  %v9310_v45 = vld [vmem:[#allocation5 + $0x494] ss:$48 sps:$4 sm:$0xff]  }
 0x10a   : > { %2281 = vmatprep.mubr.bf16.mxu0 %v9211_v46  ;;  %2507 = vmatprep.mubr.bf16.mxu1 %v9211_v46  ;;  %v9313_v46 = vld [vmem:[#allocation5 + $0x49c] ss:$48 sps:$4 sm:$0xff]  }
 0x111   : > { %2282 = vmatmul.mubr.bf16.gmra.mrb[24].mxu0 %v9213_v47  ;;  %2508 = vmatmul.mubr.bf16.gmra.mrb[24].mxu1 %v9213_v47  ;;  %v9307_v47 = vld [vmem:[%s10440_s11 + $0x98] ss:$12 sps:$4 sm:$0xff]  }
 0x112   : > { %2291 = vmatprep.mubr.bf16.mxu0 %v9220_v48  ;;  %2517 = vmatprep.mubr.bf16.mxu1 %v9220_v48  ;;  %v9308_v48 = vld [vmem:[#allocation5 + $0x490] ss:$48 sps:$4 sm:$0xff]  }
 0x119   : > { %2292 = vmatmul.mubr.bf16.gmra.mrb[28].mxu0 %v9222_v49  ;;  %2518 = vmatmul.mubr.bf16.gmra.mrb[28].mxu1 %v9222_v49  ;;  %v9311_v49 = vld [vmem:[#allocation5 + $0x498] ss:$48 sps:$4 sm:$0xff]  }
 0x11a   : > { %2334 = vmatprep.mubr.bf16.mxu0 %v12169_v50  ;;  %2560 = vmatprep.mubr.bf16.mxu1 %v12169_v50 }
 0x121   : > { %2335 = vmatmul.mubr.bf16.vlgmr.msra.gmra.mrb[0].mxu0 %v9229_v51  ;;  %2561 = vmatmul.mubr.bf16.vlgmr.msra.gmra.mrb[0].mxu1 %v9229_v51  ;;  %v9316_v51 = vld [vmem:[#allocation5 + $0x4f4] ss:$48 sps:$4 sm:$0xff]  }
 0x122   : > { %2642 = vmatpush1.bf16.msra.mxu0 %v9230_v52  ;;  %2868 = vmatpush1.bf16.msra.mxu1 %v9233_v53  ;;  %v9319_v52 = vld [vmem:[#allocation5 + $0x4fc] ss:$48 sps:$4 sm:$0xff]   ;;  %v9314_v53 = vld [vmem:[#allocation5 + $0x4f0] ss:$48 sps:$4 sm:$0xff]  }
 0x123   : > { %2643 = vmatprep.subr.bf16.mxu0 %v9238_v54  ;;  %2869 = vmatprep.subr.bf16.mxu1 %v9241_v55  ;;  %v9317_v54 = vld [vmem:[#allocation5 + $0x4f8] ss:$48 sps:$4 sm:$0xff]   ;;  %v9323_v55 = vld [vmem:[#allocation5 + $0x554] ss:$48 sps:$4 sm:$0xff]  }
 0x124   : > { %2344 = vmatprep.mubr.bf16.mxu0 %v12169_v50  ;;  %2570 = vmatprep.mubr.bf16.mxu1 %v12169_v50 }
 0x126   : > { %2644 = vmatpush1.bf16.msra.mxu0 %v9236_v56  ;;  %2870 = vmatpush1.bf16.msra.mxu1 %v9239_v57  ;;  %v9326_v56 = vld [vmem:[#allocation5 + $0x55c] ss:$48 sps:$4 sm:$0xff]  }
 0x127   : > { %2645 = vmatprep.subr.bf16.mxu0 %v9245_v58  ;;  %2871 = vmatprep.subr.bf16.mxu1 %v9248_v59  ;;  %v9320_v57 = vld [vmem:[%s10440_s11 + $0xb0] ss:$12 sps:$4 sm:$0xff]   ;;  %v9324_v59 = vld [vmem:[#allocation5 + $0x558] ss:$48 sps:$4 sm:$0xff]  }
 0x128   : > { %v9321_v58 = vld [vmem:[#allocation5 + $0x550] ss:$48 sps:$4 sm:$0xff]  }
 0x129   : > { %2345 = vmatmul.mubr.bf16.gmra.mrb[4].mxu0 %v9242_v60  ;;  %2571 = vmatmul.mubr.bf16.gmra.mrb[4].mxu1 %v9242_v60  ;;  %v9329_v60 = vld [vmem:[#allocation5 + $0x5b4] ss:$48 sps:$4 sm:$0xff]  }
 0x12a   : > { %2646 = vmatpush1.bf16.msra.mxu0 %v9243_v61  ;;  %2872 = vmatpush1.bf16.msra.mxu1 %v9246_v62  ;;  %v9332_v61 = vld [vmem:[#allocation5 + $0x5bc] ss:$48 sps:$4 sm:$0xff]   ;;  %v9327_v62 = vld [vmem:[#allocation5 + $0x5b0] ss:$48 sps:$4 sm:$0xff]  }
 0x12b   : > { %2647 = vmatprep.subr.bf16.mxu0 %v9251_v63  ;;  %2873 = vmatprep.subr.bf16.mxu1 %v9254_v0  ;;  %v9330_v63 = vld [vmem:[#allocation5 + $0x5b8] ss:$48 sps:$4 sm:$0xff]   ;;  %v9335_v0 = vld [vmem:[#allocation5 + $0x61c] ss:$48 sps:$4 sm:$0xff]  }
 0x12c   : > { %2354 = vmatprep.mubr.bf16.mxu0 %v12169_v50  ;;  %2580 = vmatprep.mubr.bf16.mxu1 %v12169_v50 }
 0x12e   : > { %2648 = vmatpush1.bf16.msra.mxu0 %v9249_v1  ;;  %2874 = vmatpush1.bf16.msra.mxu1 %v9252_v2  ;;  %v9338_v1 = vld [vmem:[#allocation5 + $0x614] ss:$48 sps:$4 sm:$0xff]  }
 0x12f   : > { %2649 = vmatprep.subr.bf16.mxu0 %v9258_v4  ;;  %2875 = vmatprep.subr.bf16.mxu1 %v9261_v5  ;;  %v9910_v2 = vld [vmem:[%s10440_s11 + $0x4] ss:$12 sps:$4 sm:$0xff]   ;;  %v9333_v4 = vld [vmem:[#allocation5 + $0x618] ss:$48 sps:$4 sm:$0xff]  }
 0x130   : > { %v9336_v5 = vld [vmem:[#allocation5 + $0x610] ss:$48 sps:$4 sm:$0xff]  }
 0x131   : > { %2355 = vmatmul.mubr.bf16.gmra.mrb[8].mxu0 %v9255_v7  ;;  %2581 = vmatmul.mubr.bf16.gmra.mrb[8].mxu1 %v9255_v7  ;;  %v9341_v7 = vld [vmem:[#allocation5 + $0x67c] ss:$48 sps:$4 sm:$0xff]  }
 0x132   : > { %2650 = vmatpush1.bf16.msra.mxu0 %v9256_v8  ;;  %2876 = vmatpush1.bf16.msra.mxu1 %v9259_v9  ;;  %v9344_v8 = vld [vmem:[#allocation5 + $0x674] ss:$48 sps:$4 sm:$0xff]   ;;  %v9339_v9 = vld [vmem:[#allocation5 + $0x678] ss:$48 sps:$4 sm:$0xff]  }
 0x133   : > { %2651 = vmatprep.subr.bf16.mxu0 %v9264_v10  ;;  %2877 = vmatprep.subr.bf16.mxu1 %v9267_v11  ;;  %v9342_v10 = vld [vmem:[#allocation5 + $0x670] ss:$48 sps:$4 sm:$0xff]   ;;  %v9347_v11 = vld [vmem:[#allocation5 + $0x6dc] ss:$48 sps:$4 sm:$0xff]  }
 0x134   : > { %2364 = vmatprep.mubr.bf16.mxu0 %v12169_v50  ;;  %2590 = vmatprep.mubr.bf16.mxu1 %v12169_v50 }
 0x136   : > { %2652 = vmatpush1.bf16.msra.mxu0 %v9262_v12  ;;  %2878 = vmatpush1.bf16.msra.mxu1 %v9265_v15  ;;  %v9350_v12 = vld [vmem:[#allocation5 + $0x6d4] ss:$48 sps:$4 sm:$0xff]   ;;  %v9345_v15 = vld [vmem:[#allocation5 + $0x6d8] ss:$48 sps:$4 sm:$0xff]  }
 0x137   : > { %2653 = vmatprep.subr.bf16.mxu0 %v9271_v16  ;;  %2879 = vmatprep.subr.bf16.mxu1 %v9274_v17  ;;  %v9348_v16 = vld [vmem:[#allocation5 + $0x6d0] ss:$48 sps:$4 sm:$0xff]   ;;  %v9353_v17 = vld [vmem:[#allocation5 + $0x73c] ss:$48 sps:$4 sm:$0xff]  }
 0x139   : > { %2365 = vmatmul.mubr.bf16.gmra.mrb[12].mxu0 %v9268_v18  ;;  %2591 = vmatmul.mubr.bf16.gmra.mrb[12].mxu1 %v9268_v18  ;;  %v9356_v18 = vld [vmem:[#allocation5 + $0x734] ss:$48 sps:$4 sm:$0xff]  }
 0x13a   : > { %2654 = vmatpush1.bf16.msra.mxu0 %v9269_v19  ;;  %2880 = vmatpush1.bf16.msra.mxu1 %v9272_v20  ;;  %v9354_v19 = vld [vmem:[#allocation5 + $0x730] ss:$48 sps:$4 sm:$0xff]   ;;  %v9362_v20 = vld [vmem:[#allocation5 + $0x794] ss:$48 sps:$4 sm:$0xff]  }
 0x13b   : > { %2655 = vmatprep.subr.bf16.mxu0 %v9277_v21  ;;  %2881 = vmatprep.subr.bf16.mxu1 %v9280_v22  ;;  %v9357_v21 = vld [vmem:[#allocation5 + $0x798] ss:$48 sps:$4 sm:$0xff]   ;;  %v9360_v22 = vld [vmem:[#allocation5 + $0x790] ss:$48 sps:$4 sm:$0xff]  }
 0x13c   : > { %2374 = vmatprep.mubr.bf16.mxu0 %v12169_v50  ;;  %2600 = vmatprep.mubr.bf16.mxu1 %v12169_v50 }
 0x13e   : > { %2656 = vmatpush1.bf16.msra.mxu0 %v9275_v25  ;;  %2882 = vmatpush1.bf16.msra.mxu1 %v9278_v26  ;;  %v9365_v25 = vld [vmem:[#allocation5 + $0x7fc] ss:$48 sps:$4 sm:$0xff]   ;;  %v9368_v26 = vld [vmem:[#allocation5 + $0x7f4] ss:$48 sps:$4 sm:$0xff]  }
 0x13f   : > { %2657 = vmatprep.subr.bf16.mxu0 %v9284_v27  ;;  %2883 = vmatprep.subr.bf16.mxu1 %v9287_v28  ;;  %v9911_v27 = vld [vmem:[%s10440_s11 + $0x4c] ss:$12 sps:$4 sm:$0xff]  }
 0x140   : > { %v9371_v28 = vld [vmem:[#allocation5 + $0x85c] ss:$48 sps:$4 sm:$0xff]  }
 0x141   : > { %2375 = vmatmul.mubr.bf16.gmra.mrb[16].mxu0 %v9281_v29  ;;  %2601 = vmatmul.mubr.bf16.gmra.mrb[16].mxu1 %v9281_v29  ;;  %v9374_v29 = vld [vmem:[#allocation5 + $0x854] ss:$48 sps:$4 sm:$0xff]  }
 0x142   : > { %2658 = vmatpush1.bf16.msra.mxu0 %v9282_v30  ;;  %2884 = vmatpush1.bf16.msra.mxu1 %v9285_v31  ;;  %v9369_v30 = vld [vmem:[#allocation5 + $0x858] ss:$48 sps:$4 sm:$0xff]   ;;  %v9372_v31 = vld [vmem:[#allocation5 + $0x850] ss:$48 sps:$4 sm:$0xff]  }
 0x143   : > { %2659 = vmatprep.subr.bf16.mxu0 %v9290_v32  ;;  %2885 = vmatprep.subr.bf16.mxu1 %v9293_v33  ;;  %v9377_v32 = vld [vmem:[#allocation5 + $0x8bc] ss:$48 sps:$4 sm:$0xff]   ;;  %v9380_v33 = vld [vmem:[#allocation5 + $0x8b4] ss:$48 sps:$4 sm:$0xff]  }
 0x144   : > { %2384 = vmatprep.mubr.bf16.mxu0 %v12169_v50  ;;  %2610 = vmatprep.mubr.bf16.mxu1 %v12169_v50 }
 0x146   : > { %2660 = vmatpush1.bf16.msra.mxu0 %v9288_v34  ;;  %2886 = vmatpush1.bf16.msra.mxu1 %v9291_v35  ;;  %v9375_v34 = vld [vmem:[#allocation5 + $0x8b8] ss:$48 sps:$4 sm:$0xff]   ;;  %v9378_v35 = vld [vmem:[#allocation5 + $0x8b0] ss:$48 sps:$4 sm:$0xff]  }
 0x147   : > { %2661 = vmatprep.subr.bf16.mxu0 %v9297_v36  ;;  %2887 = vmatprep.subr.bf16.mxu1 %v9300_v37  ;;  %v9383_v36 = vld [vmem:[#allocation5 + $0x24] ss:$48 sps:$4 sm:$0xff]   ;;  %v9386_v37 = vld [vmem:[#allocation5 + $0x2c] ss:$48 sps:$4 sm:$0xff]  }
 0x149   : > { %2385 = vmatmul.mubr.bf16.gmra.mrb[20].mxu0 %v9294_v38  ;;  %2611 = vmatmul.mubr.bf16.gmra.mrb[20].mxu1 %v9294_v38  ;;  %v9914_v38 = vld [vmem:[%s10440_s11 + $0x60] ss:$12 sps:$4 sm:$0xff]  }
 0x14a   : > { %2662 = vmatpush1.bf16.msra.mxu0 %v9295_v39  ;;  %2888 = vmatpush1.bf16.msra.mxu1 %v9298_v40  ;;  %v9915_v39 = vld [vmem:[%s10440_s11 + $0x7c] ss:$12 sps:$4 sm:$0xff]   ;;  %v9916_v40 = vld [vmem:[%s10440_s11 + $0x78] ss:$12 sps:$4 sm:$0xff]  }
 0x14b   : > { %2663 = vmatprep.subr.bf16.mxu0 %v9303_v41  ;;  %2889 = vmatprep.subr.bf16.mxu1 %v9306_v42  ;;  %v9917_v41 = vld [vmem:[%s10440_s11 + $0x94] ss:$12 sps:$4 sm:$0xff]   ;;  %v9918_v42 = vld [vmem:[%s10440_s11 + $0x90] ss:$12 sps:$4 sm:$0xff]  }
 0x14c   : > { %2394 = vmatprep.mubr.bf16.mxu0 %v12169_v50  ;;  %2620 = vmatprep.mubr.bf16.mxu1 %v12169_v50 }
 0x14e   : > { %2664 = vmatpush1.bf16.msra.mxu0 %v9301_v43  ;;  %2890 = vmatpush1.bf16.msra.mxu1 %v9304_v44  ;;  %v9919_v43 = vld [vmem:[%s10440_s11 + $0xac] ss:$12 sps:$4 sm:$0xff]   ;;  %v9920_v44 = vld [vmem:[%s10440_s11 + $0xa8] ss:$12 sps:$4 sm:$0xff]  }
 0x14f   : > { %2665 = vmatprep.subr.bf16.mxu0 %v9310_v45  ;;  %2891 = vmatprep.subr.bf16.mxu1 %v9313_v46  ;;  %v9381_v45 = vld [vmem:[#allocation5 + $0x20] ss:$48 sps:$4 sm:$0xff]   ;;  %v9384_v46 = vld [vmem:[#allocation5 + $0x28] ss:$48 sps:$4 sm:$0xff]  }
 0x151   : > { %2395 = vmatmul.mubr.bf16.gmra.mrb[24].mxu0 %v9307_v47  ;;  %2621 = vmatmul.mubr.bf16.gmra.mrb[24].mxu1 %v9307_v47  ;;  %v9389_v47 = vld [vmem:[#allocation5 + $0x84] ss:$48 sps:$4 sm:$0xff]  }
 0x152   : > { %2666 = vmatpush1.bf16.msra.mxu0 %v9308_v48  ;;  %2892 = vmatpush1.bf16.msra.mxu1 %v9311_v49  ;;  %v9392_v48 = vld [vmem:[#allocation5 + $0x8c] ss:$48 sps:$4 sm:$0xff]   ;;  %v9387_v49 = vld [vmem:[#allocation5 + $0x80] ss:$48 sps:$4 sm:$0xff]  }
 0x153   : > { %2667 = vmatprep.subr.bf16.mxu0 %v9316_v51  ;;  %2893 = vmatprep.subr.bf16.mxu1 %v9319_v52  ;;  %v9921_v51 = vld [vmem:[%s10440_s11 + $0x8] ss:$12 sps:$4 sm:$0xff]  }
 0x154   : > { %2404 = vmatprep.mubr.bf16.mxu0 %v12169_v50  ;;  %2630 = vmatprep.mubr.bf16.mxu1 %v12169_v50  ;;  %v9390_v52 = vld [vmem:[#allocation5 + $0x88] ss:$48 sps:$4 sm:$0xff]  }
 0x156   : > { %2668 = vmatpush1.bf16.msra.mxu0 %v9314_v53  ;;  %2894 = vmatpush1.bf16.msra.mxu1 %v9317_v54  ;;  %v9395_v53 = vld [vmem:[#allocation5 + $0xe4] ss:$48 sps:$4 sm:$0xff]   ;;  %v9398_v54 = vld [vmem:[#allocation5 + $0xec] ss:$48 sps:$4 sm:$0xff]  }
 0x157   : > { %2669 = vmatprep.subr.bf16.mxu0 %v9323_v55  ;;  %2895 = vmatprep.subr.bf16.mxu1 %v9326_v56  ;;  %v9393_v55 = vld [vmem:[#allocation5 + $0xe0] ss:$48 sps:$4 sm:$0xff]   ;;  %v9396_v56 = vld [vmem:[#allocation5 + $0xe8] ss:$48 sps:$4 sm:$0xff]  }
 0x159   : > { %2405 = vmatmul.mubr.bf16.gmra.mrb[28].mxu0 %v9320_v57  ;;  %2631 = vmatmul.mubr.bf16.gmra.mrb[28].mxu1 %v9320_v57  ;;  %v9401_v57 = vld [vmem:[#allocation5 + $0x144] ss:$48 sps:$4 sm:$0xff]  }
 0x15a   : > { %2670 = vmatpush1.bf16.msra.mxu0 %v9321_v58  ;;  %2896 = vmatpush1.bf16.msra.mxu1 %v9324_v59  ;;  %v9404_v58 = vld [vmem:[#allocation5 + $0x14c] ss:$48 sps:$4 sm:$0xff]   ;;  %v9399_v59 = vld [vmem:[#allocation5 + $0x140] ss:$48 sps:$4 sm:$0xff]  }
 0x15b   : > { %2671 = vmatprep.subr.bf16.mxu0 %v9329_v60  ;;  %2897 = vmatprep.subr.bf16.mxu1 %v9332_v61  ;;  %v9922_v60 = vld [vmem:[%s10440_s11 + $0x20] ss:$12 sps:$4 sm:$0xff]   ;;  %v9402_v61 = vld [vmem:[#allocation5 + $0x148] ss:$48 sps:$4 sm:$0xff]  }
 0x15c   : > { %2673 = vmatprep.mubr.bf16.mxu0 %v9910_v2  ;;  %2899 = vmatprep.mubr.bf16.mxu1 %v9910_v2  ;;  %v9413_v2 = vld [vmem:[#allocation5 + $0x204] ss:$48 sps:$4 sm:$0xff]  }
 0x15e   : > { %2672 = vmatpush1.bf16.msra.mxu0 %v9327_v62  ;;  %2898 = vmatpush1.bf16.msra.mxu1 %v9330_v63  ;;  %v9407_v62 = vld [vmem:[#allocation5 + $0x1a4] ss:$48 sps:$4 sm:$0xff]   ;;  %v9410_v63 = vld [vmem:[#allocation5 + $0x1ac] ss:$48 sps:$4 sm:$0xff]  }
 0x15f   : > { %2980 = vmatprep.subr.bf16.mxu1 %v9335_v0  ;;  %2754 = vmatprep.subr.bf16.mxu0 %v9338_v1  ;;  %v9405_v0 = vld [vmem:[#allocation5 + $0x1a0] ss:$48 sps:$4 sm:$0xff]   ;;  %v9408_v1 = vld [vmem:[#allocation5 + $0x1a8] ss:$48 sps:$4 sm:$0xff]  }
 0x161   : > { %2674 = vmatmul.mubr.bf16.vlgmr.msra.gmra.mrb[32].mxu0 %v10456_v3  ;;  %2900 = vmatmul.mubr.bf16.vlgmr.msra.gmra.mrb[32].mxu1 %v10456_v3  ;;  %v9351_v3 = vld [vmem:[#allocation5 + $0x738] ss:$48 sps:$4 sm:$0xff]  }
 0x162   : > { %2981 = vmatpush1.bf16.msra.mxu1 %v9333_v4  ;;  %2755 = vmatpush1.bf16.msra.mxu0 %v9336_v5  ;;  %v9416_v4 = vld [vmem:[#allocation5 + $0x20c] ss:$48 sps:$4 sm:$0xff]   ;;  %v9923_v5 = vld [vmem:[%s10440_s11 + $0x38] ss:$12 sps:$4 sm:$0xff]  }
 0x163   : > { %2683 = vmatprep.mubr.bf16.mxu0 %v10459_v6  ;;  %2909 = vmatprep.mubr.bf16.mxu1 %v10459_v6  ;;  %v9359_v6 = vld [vmem:[#allocation5 + $0x79c] ss:$48 sps:$4 sm:$0xff]  }
 0x164   : > { %2982 = vmatprep.subr.bf16.mxu1 %v9341_v7  ;;  %2756 = vmatprep.subr.bf16.mxu0 %v9344_v8  ;;  %v9411_v7 = vld [vmem:[#allocation5 + $0x200] ss:$48 sps:$4 sm:$0xff]   ;;  %v9414_v8 = vld [vmem:[#allocation5 + $0x208] ss:$48 sps:$4 sm:$0xff]  }
 0x166   : > { %2983 = vmatpush1.bf16.msra.mxu1 %v9339_v9  ;;  %2757 = vmatpush1.bf16.msra.mxu0 %v9342_v10  ;;  %v9419_v9 = vld [vmem:[#allocation5 + $0x264] ss:$48 sps:$4 sm:$0xff]   ;;  %v9422_v10 = vld [vmem:[#allocation5 + $0x26c] ss:$48 sps:$4 sm:$0xff]  }
 0x167   : > { %2984 = vmatprep.subr.bf16.mxu1 %v9347_v11  ;;  %2758 = vmatprep.subr.bf16.mxu0 %v9350_v12  ;;  %v9417_v11 = vld [vmem:[#allocation5 + $0x260] ss:$48 sps:$4 sm:$0xff]   ;;  %v9420_v12 = vld [vmem:[#allocation5 + $0x268] ss:$48 sps:$4 sm:$0xff]  }
 0x169   : > { %2684 = vmatmul.mubr.bf16.gmra.mrb[36].mxu0 %v10466_v13  ;;  %2910 = vmatmul.mubr.bf16.gmra.mrb[36].mxu1 %v10466_v13  ;;  %v9363_v13 = vld [vmem:[#allocation5 + $0x7f8] ss:$48 sps:$4 sm:$0xff]  }
 0x16a   : > { %2693 = vmatprep.mubr.bf16.mxu0 %v10469_v14  ;;  %2919 = vmatprep.mubr.bf16.mxu1 %v10469_v14  ;;  %v9366_v14 = vld [vmem:[#allocation5 + $0x7f0] ss:$48 sps:$4 sm:$0xff]  }
 0x16b   : > { %2985 = vmatpush1.bf16.msra.mxu1 %v9345_v15  ;;  %2759 = vmatpush1.bf16.msra.mxu0 %v9348_v16  ;;  %v9425_v15 = vld [vmem:[#allocation5 + $0x2c4] ss:$48 sps:$4 sm:$0xff]   ;;  %v9428_v16 = vld [vmem:[#allocation5 + $0x2cc] ss:$48 sps:$4 sm:$0xff]  }
 0x16c   : > { %2986 = vmatprep.subr.bf16.mxu1 %v9353_v17  ;;  %2760 = vmatprep.subr.bf16.mxu0 %v9356_v18  ;;  %v9924_v17 = vld [vmem:[%s10440_s11 + $0x50] ss:$12 sps:$4 sm:$0xff]  }
 0x16d   : > { %v9423_v18 = vld [vmem:[#allocation5 + $0x2c0] ss:$48 sps:$4 sm:$0xff]  }
 0x16f   : > { %2987 = vmatpush1.bf16.msra.mxu1 %v9351_v3  ;;  %2761 = vmatpush1.bf16.msra.mxu0 %v9354_v19  ;;  %v9426_v3 = vld [vmem:[#allocation5 + $0x2c8] ss:$48 sps:$4 sm:$0xff]   ;;  %v9431_v19 = vld [vmem:[#allocation5 + $0x324] ss:$48 sps:$4 sm:$0xff]  }
 0x170   : > { %2988 = vmatprep.subr.bf16.mxu1 %v9359_v6  ;;  %2762 = vmatprep.subr.bf16.mxu0 %v9362_v20  ;;  %v9434_v6 = vld [vmem:[#allocation5 + $0x32c] ss:$48 sps:$4 sm:$0xff]   ;;  %v9429_v20 = vld [vmem:[#allocation5 + $0x320] ss:$48 sps:$4 sm:$0xff]  }
 0x171   : > { %2694 = vmatmul.mubr.bf16.gmra.mrb[40].mxu0 %v10476_v23  ;;  %2920 = vmatmul.mubr.bf16.gmra.mrb[40].mxu1 %v10476_v23  ;;  %v9912_v23 = vld [vmem:[%s10440_s11 + $0x48] ss:$12 sps:$4 sm:$0xff]  }
 0x172   : > { %2703 = vmatprep.mubr.bf16.mxu0 %v10479_v24  ;;  %2929 = vmatprep.mubr.bf16.mxu1 %v9911_v27  ;;  %v9913_v24 = vld [vmem:[%s10440_s11 + $0x64] ss:$12 sps:$4 sm:$0xff]  }
 0x173   : > { %2989 = vmatpush1.bf16.msra.mxu1 %v9357_v21  ;;  %2763 = vmatpush1.bf16.msra.mxu0 %v9360_v22  ;;  %v9432_v21 = vld [vmem:[#allocation5 + $0x328] ss:$48 sps:$4 sm:$0xff]   ;;  %v9437_v22 = vld [vmem:[#allocation5 + $0x384] ss:$48 sps:$4 sm:$0xff]  }
 0x174   : > { %2990 = vmatprep.subr.bf16.mxu1 %v9365_v25  ;;  %2764 = vmatprep.subr.bf16.mxu0 %v9368_v26  ;;  %v9440_v25 = vld [vmem:[#allocation5 + $0x38c] ss:$48 sps:$4 sm:$0xff]   ;;  %v9925_v26 = vld [vmem:[%s10440_s11 + $0x68] ss:$12 sps:$4 sm:$0xff]  }
 0x175   : > { %v9443_v27 = vld [vmem:[#allocation5 + $0x3e4] ss:$48 sps:$4 sm:$0xff]  }
 0x177   : > { %2991 = vmatpush1.bf16.msra.mxu1 %v9363_v13  ;;  %2765 = vmatpush1.bf16.msra.mxu0 %v9366_v14  ;;  %v9435_v13 = vld [vmem:[#allocation5 + $0x380] ss:$48 sps:$4 sm:$0xff]   ;;  %v9438_v14 = vld [vmem:[#allocation5 + $0x388] ss:$48 sps:$4 sm:$0xff]  }
 0x178   : > { %2992 = vmatprep.subr.bf16.mxu1 %v9371_v28  ;;  %2766 = vmatprep.subr.bf16.mxu0 %v9374_v29  ;;  %v9446_v28 = vld [vmem:[#allocation5 + $0x3ec] ss:$48 sps:$4 sm:$0xff]   ;;  %v9441_v29 = vld [vmem:[#allocation5 + $0x3e0] ss:$48 sps:$4 sm:$0xff]  }
 0x179   : > { %2704 = vmatmul.mubr.bf16.gmra.mrb[44].mxu0 %v9912_v23  ;;  %2930 = vmatmul.mubr.bf16.gmra.mrb[44].mxu1 %v9912_v23  ;;  %v9447_v23 = vld [vmem:[#allocation5 + $0x440] ss:$48 sps:$4 sm:$0xff]  }
 0x17a   : > { %2713 = vmatprep.mubr.bf16.mxu0 %v9913_v24  ;;  %2939 = vmatprep.mubr.bf16.mxu1 %v9913_v24  ;;  %v9450_v24 = vld [vmem:[#allocation5 + $0x448] ss:$48 sps:$4 sm:$0xff]  }
 0x17b   : > { %2993 = vmatpush1.bf16.msra.mxu1 %v9369_v30  ;;  %2767 = vmatpush1.bf16.msra.mxu0 %v9372_v31  ;;  %v9444_v30 = vld [vmem:[#allocation5 + $0x3e8] ss:$48 sps:$4 sm:$0xff]   ;;  %v9449_v31 = vld [vmem:[#allocation5 + $0x444] ss:$48 sps:$4 sm:$0xff]  }
 0x17c   : > { %2994 = vmatprep.subr.bf16.mxu1 %v9377_v32  ;;  %2768 = vmatprep.subr.bf16.mxu0 %v9380_v33  ;;  %v9452_v32 = vld [vmem:[#allocation5 + $0x44c] ss:$48 sps:$4 sm:$0xff]  }
 0x17d   : > { %v10558_v33 = vld [vmem:[%s10440_s11 + $0x80] ss:$12 sps:$4 sm:$0xff]  }
 0x17f   : > { %2995 = vmatpush1.bf16.msra.mxu1 %v9375_v34  ;;  %2769 = vmatpush1.bf16.msra.mxu0 %v9378_v35  ;;  %v9455_v34 = vld [vmem:[#allocation5 + $0x4a4] ss:$48 sps:$4 sm:$0xff]   ;;  %v9458_v35 = vld [vmem:[#allocation5 + $0x4ac] ss:$48 sps:$4 sm:$0xff]  }
 0x180   : > { %3093 = vmatprep.subr.bf16.mxu0 %v9383_v36  ;;  %3319 = vmatprep.subr.bf16.mxu1 %v9386_v37  ;;  %v9453_v36 = vld [vmem:[#allocation5 + $0x4a0] ss:$48 sps:$4 sm:$0xff]   ;;  %v9456_v37 = vld [vmem:[#allocation5 + $0x4a8] ss:$48 sps:$4 sm:$0xff]  }
 0x181   : > { %2714 = vmatmul.mubr.bf16.gmra.mrb[48].mxu0 %v9914_v38  ;;  %2940 = vmatmul.mubr.bf16.gmra.mrb[48].mxu1 %v9914_v38  ;;  %v9461_v38 = vld [vmem:[#allocation5 + $0x504] ss:$48 sps:$4 sm:$0xff]  }
 0x182   : > { %2723 = vmatprep.mubr.bf16.mxu0 %v9915_v39  ;;  %2949 = vmatprep.mubr.bf16.mxu1 %v9915_v39  ;;  %v9464_v39 = vld [vmem:[#allocation5 + $0x50c] ss:$48 sps:$4 sm:$0xff]  }
 0x189   : > { %2724 = vmatmul.mubr.bf16.gmra.mrb[52].mxu0 %v9916_v40  ;;  %2950 = vmatmul.mubr.bf16.gmra.mrb[52].mxu1 %v9916_v40  ;;  %v10565_v40 = vld [vmem:[%s10440_s11 + $0x98] ss:$12 sps:$4 sm:$0xff]  }
 0x18a   : > { %2733 = vmatprep.mubr.bf16.mxu0 %v9917_v41  ;;  %2959 = vmatprep.mubr.bf16.mxu1 %v9917_v41  ;;  %v9459_v41 = vld [vmem:[#allocation5 + $0x500] ss:$48 sps:$4 sm:$0xff]  }
 0x191   : > { %2734 = vmatmul.mubr.bf16.gmra.mrb[56].mxu0 %v9918_v42  ;;  %2960 = vmatmul.mubr.bf16.gmra.mrb[56].mxu1 %v9918_v42  ;;  %v9462_v42 = vld [vmem:[#allocation5 + $0x508] ss:$48 sps:$4 sm:$0xff]  }
 0x192   : > { %2743 = vmatprep.mubr.bf16.mxu0 %v9919_v43  ;;  %2969 = vmatprep.mubr.bf16.mxu1 %v9919_v43  ;;  %v9467_v43 = vld [vmem:[#allocation5 + $0x564] ss:$48 sps:$4 sm:$0xff]  }
 0x199   : > { %2744 = vmatmul.mubr.bf16.gmra.mrb[60].mxu0 %v9920_v44  ;;  %2970 = vmatmul.mubr.bf16.gmra.mrb[60].mxu1 %v9920_v44  ;;  %v9470_v44 = vld [vmem:[#allocation5 + $0x56c] ss:$48 sps:$4 sm:$0xff]  }
 0x19a   : > { %2786 = vmatprep.mubr.bf16.mxu0 %v12169_v50  ;;  %3012 = vmatprep.mubr.bf16.mxu1 %v12169_v50 }
 0x1a1   : > { %2787 = vmatmul.mubr.bf16.vlgmr.msra.gmra.mrb[32].mxu0 %v9921_v51  ;;  %3013 = vmatmul.mubr.bf16.vlgmr.msra.gmra.mrb[32].mxu1 %v9921_v51  ;;  %v9471_v51 = vld [vmem:[#allocation5 + $0x5c0] ss:$48 sps:$4 sm:$0xff]  }
 0x1a2   : > { %3094 = vmatpush1.bf16.msra.mxu0 %v9381_v45  ;;  %3320 = vmatpush1.bf16.msra.mxu1 %v9384_v46  ;;  %v9465_v45 = vld [vmem:[#allocation5 + $0x560] ss:$48 sps:$4 sm:$0xff]   ;;  %v9468_v46 = vld [vmem:[#allocation5 + $0x568] ss:$48 sps:$4 sm:$0xff]  }
 0x1a3   : > { %3095 = vmatprep.subr.bf16.mxu0 %v9389_v47  ;;  %3321 = vmatprep.subr.bf16.mxu1 %v9392_v48  ;;  %v9473_v47 = vld [vmem:[#allocation5 + $0x5c4] ss:$48 sps:$4 sm:$0xff]   ;;  %v9476_v48 = vld [vmem:[#allocation5 + $0x5cc] ss:$48 sps:$4 sm:$0xff]  }
 0x1a4   : > { %2796 = vmatprep.mubr.bf16.mxu0 %v12169_v50  ;;  %3022 = vmatprep.mubr.bf16.mxu1 %v12169_v50 }
 0x1a6   : > { %3096 = vmatpush1.bf16.msra.mxu0 %v9387_v49  ;;  %3322 = vmatpush1.bf16.msra.mxu1 %v9390_v52  ;;  %v10572_v49 = vld [vmem:[%s10440_s11 + $0xb0] ss:$12 sps:$4 sm:$0xff]   ;;  %v9474_v52 = vld [vmem:[#allocation5 + $0x5c8] ss:$48 sps:$4 sm:$0xff]  }
 0x1a7   : > { %3097 = vmatprep.subr.bf16.mxu0 %v9395_v53  ;;  %3323 = vmatprep.subr.bf16.mxu1 %v9398_v54  ;;  %v9479_v53 = vld [vmem:[#allocation5 + $0x62c] ss:$48 sps:$4 sm:$0xff]   ;;  %v9482_v54 = vld [vmem:[#allocation5 + $0x624] ss:$48 sps:$4 sm:$0xff]  }
 0x1a9   : > { %2797 = vmatmul.mubr.bf16.gmra.mrb[36].mxu0 %v9922_v60  ;;  %3023 = vmatmul.mubr.bf16.gmra.mrb[36].mxu1 %v9922_v60  ;;  %v9930_v60 = vld [vmem:[%s10440_s11] ss:$12 sps:$4 sm:$0xff]  }
 0x1aa   : > { %3098 = vmatpush1.bf16.msra.mxu0 %v9393_v55  ;;  %3324 = vmatpush1.bf16.msra.mxu1 %v9396_v56  ;;  %v9929_v55 = vld [vmem:[%s10440_s11 + $0x4] ss:$12 sps:$4 sm:$0xff]   ;;  %v9477_v56 = vld [vmem:[#allocation5 + $0x628] ss:$48 sps:$4 sm:$0xff]  }
 0x1ab   : > { %3099 = vmatprep.subr.bf16.mxu0 %v9401_v57  ;;  %3325 = vmatprep.subr.bf16.mxu1 %v9404_v58  ;;  %v9480_v57 = vld [vmem:[#allocation5 + $0x620] ss:$48 sps:$4 sm:$0xff]   ;;  %v9485_v58 = vld [vmem:[#allocation5 + $0x68c] ss:$48 sps:$4 sm:$0xff]  }
 0x1ac   : > { %2806 = vmatprep.mubr.bf16.mxu0 %v12169_v50  ;;  %3032 = vmatprep.mubr.bf16.mxu1 %v12169_v50 }
 0x1ae   : > { %3100 = vmatpush1.bf16.msra.mxu0 %v9399_v59  ;;  %3326 = vmatpush1.bf16.msra.mxu1 %v9402_v61  ;;  %v9488_v59 = vld [vmem:[#allocation5 + $0x684] ss:$48 sps:$4 sm:$0xff]   ;;  %v9483_v61 = vld [vmem:[#allocation5 + $0x688] ss:$48 sps:$4 sm:$0xff]  }
 0x1af   : > { %3101 = vmatprep.subr.bf16.mxu0 %v9407_v62  ;;  %3327 = vmatprep.subr.bf16.mxu1 %v9410_v63  ;;  %v9486_v62 = vld [vmem:[#allocation5 + $0x680] ss:$48 sps:$4 sm:$0xff]   ;;  %v9931_v63 = vld [vmem:[%s10440_s11 + $0x1c] ss:$12 sps:$4 sm:$0xff]  }
 0x1b1   : > { %2807 = vmatmul.mubr.bf16.gmra.mrb[40].mxu0 %v9923_v5  ;;  %3033 = vmatmul.mubr.bf16.gmra.mrb[40].mxu1 %v9923_v5  ;;  %v9497_v5 = vld [vmem:[#allocation5 + $0x74c] ss:$48 sps:$4 sm:$0xff]  }
 0x1b2   : > { %3102 = vmatpush1.bf16.msra.mxu0 %v9405_v0  ;;  %3328 = vmatpush1.bf16.msra.mxu1 %v9408_v1  ;;  %v9491_v0 = vld [vmem:[#allocation5 + $0x6ec] ss:$48 sps:$4 sm:$0xff]   ;;  %v9494_v1 = vld [vmem:[#allocation5 + $0x6e4] ss:$48 sps:$4 sm:$0xff]  }
 0x1b3   : > { %3103 = vmatprep.subr.bf16.mxu0 %v9413_v2  ;;  %3329 = vmatprep.subr.bf16.mxu1 %v9416_v4  ;;  %v9489_v2 = vld [vmem:[#allocation5 + $0x6e8] ss:$48 sps:$4 sm:$0xff]   ;;  %v9492_v4 = vld [vmem:[#allocation5 + $0x6e0] ss:$48 sps:$4 sm:$0xff]  }
 0x1b4   : > { %2816 = vmatprep.mubr.bf16.mxu0 %v12169_v50  ;;  %3042 = vmatprep.mubr.bf16.mxu1 %v12169_v50 }
 0x1b6   : > { %3104 = vmatpush1.bf16.msra.mxu0 %v9411_v7  ;;  %3330 = vmatpush1.bf16.msra.mxu1 %v9414_v8  ;;  %v9500_v7 = vld [vmem:[#allocation5 + $0x744] ss:$48 sps:$4 sm:$0xff]  }
 0x1b7   : > { %3105 = vmatprep.subr.bf16.mxu0 %v9419_v9  ;;  %3331 = vmatprep.subr.bf16.mxu1 %v9422_v10  ;;  %v9932_v8 = vld [vmem:[%s10440_s11 + $0x18] ss:$12 sps:$4 sm:$0xff]   ;;  %v9933_v10 = vld [vmem:[%s10440_s11 + $0x34] ss:$12 sps:$4 sm:$0xff]  }
 0x1b8   : > { %v9495_v9 = vld [vmem:[#allocation5 + $0x748] ss:$48 sps:$4 sm:$0xff]  }
 0x1b9   : > { %2817 = vmatmul.mubr.bf16.gmra.mrb[44].mxu0 %v9924_v17  ;;  %3043 = vmatmul.mubr.bf16.gmra.mrb[44].mxu1 %v9924_v17  ;;  %v9504_v17 = vld [vmem:[#allocation5 + $0x7a0] ss:$48 sps:$4 sm:$0xff]  }
 0x1ba   : > { %3106 = vmatpush1.bf16.msra.mxu0 %v9417_v11  ;;  %3332 = vmatpush1.bf16.msra.mxu1 %v9420_v12  ;;  %v9498_v11 = vld [vmem:[#allocation5 + $0x740] ss:$48 sps:$4 sm:$0xff]   ;;  %v9503_v12 = vld [vmem:[#allocation5 + $0x7ac] ss:$48 sps:$4 sm:$0xff]  }
 0x1bb   : > { %3107 = vmatprep.subr.bf16.mxu0 %v9425_v15  ;;  %3333 = vmatprep.subr.bf16.mxu1 %v9428_v16  ;;  %v9506_v15 = vld [vmem:[#allocation5 + $0x7a4] ss:$48 sps:$4 sm:$0xff]   ;;  %v9501_v16 = vld [vmem:[#allocation5 + $0x7a8] ss:$48 sps:$4 sm:$0xff]  }
 0x1bc   : > { %2826 = vmatprep.mubr.bf16.mxu0 %v12169_v50  ;;  %3052 = vmatprep.mubr.bf16.mxu1 %v12169_v50 }
 0x1be   : > { %3108 = vmatpush1.bf16.msra.mxu0 %v9423_v18  ;;  %3334 = vmatpush1.bf16.msra.mxu1 %v9426_v3  ;;  %v9509_v18 = vld [vmem:[#allocation5 + $0x80c] ss:$48 sps:$4 sm:$0xff]   ;;  %v9512_v3 = vld [vmem:[#allocation5 + $0x804] ss:$48 sps:$4 sm:$0xff]  }
 0x1bf   : > { %3109 = vmatprep.subr.bf16.mxu0 %v9431_v19  ;;  %3335 = vmatprep.subr.bf16.mxu1 %v9434_v6  ;;  %v9934_v19 = vld [vmem:[%s10440_s11 + $0x30] ss:$12 sps:$4 sm:$0xff]   ;;  %v9507_v6 = vld [vmem:[#allocation5 + $0x808] ss:$48 sps:$4 sm:$0xff]  }
 0x1c1   : > { %2827 = vmatmul.mubr.bf16.gmra.mrb[48].mxu0 %v9925_v26  ;;  %3053 = vmatmul.mubr.bf16.gmra.mrb[48].mxu1 %v9925_v26 }
 0x1c2   : > { %3110 = vmatpush1.bf16.msra.mxu0 %v9429_v20  ;;  %3336 = vmatpush1.bf16.msra.mxu1 %v9432_v21  ;;  %v9510_v20 = vld [vmem:[#allocation5 + $0x800] ss:$48 sps:$4 sm:$0xff]   ;;  %v9935_v21 = vld [vmem:[%s10440_s11 + $0x4c] ss:$12 sps:$4 sm:$0xff]  }
 0x1c3   : > { %3111 = vmatprep.subr.bf16.mxu0 %v9437_v22  ;;  %3337 = vmatprep.subr.bf16.mxu1 %v9440_v25  ;;  %v9515_v22 = vld [vmem:[#allocation5 + $0x86c] ss:$48 sps:$4 sm:$0xff]  }
 0x1c4   : > { %2836 = vmatprep.mubr.bf16.mxu0 %v12169_v50  ;;  %3062 = vmatprep.mubr.bf16.mxu1 %v12169_v50 }
 0x1c6   : > { %3112 = vmatpush1.bf16.msra.mxu0 %v9435_v13  ;;  %3338 = vmatpush1.bf16.msra.mxu1 %v9438_v14  ;;  %v9518_v13 = vld [vmem:[#allocation5 + $0x864] ss:$48 sps:$4 sm:$0xff]  }
 0x1c7   : > { %3113 = vmatprep.subr.bf16.mxu0 %v9443_v27  ;;  %3339 = vmatprep.subr.bf16.mxu1 %v9446_v28  ;;  %v9513_v28 = vld [vmem:[#allocation5 + $0x868] ss:$48 sps:$4 sm:$0xff]  }
 0x1c9   : > { %2837 = vmatmul.mubr.bf16.gmra.mrb[52].mxu0 %v10558_v33  ;;  %3063 = vmatmul.mubr.bf16.gmra.mrb[52].mxu1 %v10558_v33 }
 0x1ca   : > { %3114 = vmatpush1.bf16.msra.mxu0 %v9441_v29  ;;  %3340 = vmatpush1.bf16.msra.mxu1 %v9444_v30  ;;  %v9516_v29 = vld [vmem:[#allocation5 + $0x860] ss:$48 sps:$4 sm:$0xff]  }
 0x1cb   : > { %3115 = vmatprep.subr.bf16.mxu0 %v9449_v31  ;;  %3341 = vmatprep.subr.bf16.mxu1 %v9452_v32  ;;  %v9521_v32 = vld [vmem:[#allocation5 + $0x8cc] ss:$48 sps:$4 sm:$0xff]  }
 0x1cc   : > { %2846 = vmatprep.mubr.bf16.mxu0 %v12169_v50  ;;  %3072 = vmatprep.mubr.bf16.mxu1 %v12169_v50 }
 0x1ce   : > { %3116 = vmatpush1.bf16.msra.mxu0 %v9447_v23  ;;  %3342 = vmatpush1.bf16.msra.mxu1 %v9450_v24  ;;  %v9529_v24 = vld [vmem:[#allocation8 + $0x8] ss:$12 sps:$4 sm:$0xff]   ;;  %v9544_v23 = vld [vmem:[#allocation8 + $0xf8] ss:$12 sps:$4 sm:$0xff]  }
 0x1cf   : > { %3117 = vmatprep.subr.bf16.mxu0 %v9455_v34  ;;  %3343 = vmatprep.subr.bf16.mxu1 %v9458_v35 }
 0x1d1   : > { %2847 = vmatmul.mubr.bf16.gmra.mrb[56].mxu0 %v10565_v40  ;;  %3073 = vmatmul.mubr.bf16.gmra.mrb[56].mxu1 %v10565_v40 }
 0x1d2   : > { %3118 = vmatpush1.bf16.msra.mxu0 %v9453_v36  ;;  %3344 = vmatpush1.bf16.msra.mxu1 %v9456_v37  ;;  %v9535_v37 = vld [vmem:[#allocation8 + $0x34] ss:$12 sps:$4 sm:$0xff]  }
 0x1d3   : > { %3119 = vmatprep.subr.bf16.mxu0 %v9461_v38  ;;  %3345 = vmatprep.subr.bf16.mxu1 %v9464_v39  ;;  %v9524_v38 = vld [vmem:[#allocation5 + $0x8c4] ss:$48 sps:$4 sm:$0xff]  }
 0x1d4   : > { %2856 = vmatprep.mubr.bf16.mxu0 %v12169_v50  ;;  %3082 = vmatprep.mubr.bf16.mxu1 %v12169_v50  ;;  %v9936_v39 = vld [vmem:[%s10440_s11 + $0x48] ss:$12 sps:$4 sm:$0xff]  }
 0x1d6   : > { %3120 = vmatpush1.bf16.msra.mxu0 %v9459_v41  ;;  %3346 = vmatpush1.bf16.msra.mxu1 %v9462_v42  ;;  %v9519_v41 = vld [vmem:[#allocation5 + $0x8c8] ss:$48 sps:$4 sm:$0xff]   ;;  %v9937_v42 = vld [vmem:[%s10440_s11 + $0x64] ss:$12 sps:$4 sm:$0xff]  }
 0x1d7   : > { %3121 = vmatprep.subr.bf16.mxu0 %v9467_v43  ;;  %3347 = vmatprep.subr.bf16.mxu1 %v9470_v44  ;;  %v9522_v43 = vld [vmem:[#allocation5 + $0x8c0] ss:$48 sps:$4 sm:$0xff]  }
 0x1d8   : > { %v9527_v44 = vld [vmem:[#allocation8 + $0x4] ss:$12 sps:$4 sm:$0xff]  }
 0x1d9   : > { %2857 = vmatmul.mubr.bf16.gmra.mrb[60].mxu0 %v10572_v49  ;;  %3083 = vmatmul.mubr.bf16.gmra.mrb[60].mxu1 %v10572_v49 }
 0x1da   : > { %3122 = vmatpush1.bf16.msra.mxu0 %v9465_v45  ;;  %3348 = vmatpush1.bf16.msra.mxu1 %v9468_v46 }
 0x1db   : > { %3123 = vmatprep.subr.bf16.mxu0 %v9473_v47  ;;  %3349 = vmatprep.subr.bf16.mxu1 %v9476_v48  ;;  %v9528_v47 = vld [vmem:[#allocation8 + $0xc8] ss:$12 sps:$4 sm:$0xff]  }
 0x1dc   : > { %3125 = vmatprep.mubr.bf16.mxu0 %v9929_v55  ;;  %3351 = vmatprep.mubr.bf16.mxu1 %v9929_v55 }
 0x1de   : > { %3124 = vmatpush1.bf16.msra.mxu0 %v9471_v51  ;;  %3350 = vmatpush1.bf16.msra.mxu1 %v9474_v52 }
 0x1df   : > { %3432 = vmatprep.subr.bf16.mxu1 %v9479_v53  ;;  %3206 = vmatprep.subr.bf16.mxu0 %v9482_v54  ;;  %v9945_v54 = vld [vmem:[%s10440_s11 + $0x8] ss:$12 sps:$4 sm:$0xff]  }
 0x1e1   : > { %3126 = vmatmul.mubr.bf16.vlgmr.msra.gmra.mrb[64].mxu0 %v9930_v60  ;;  %3352 = vmatmul.mubr.bf16.vlgmr.msra.gmra.mrb[64].mxu1 %v9930_v60  ;;  %v9938_v60 = vld [vmem:[%s10440_s11 + $0x60] ss:$12 sps:$4 sm:$0xff]  }
 0x1e2   : > { %3433 = vmatpush1.bf16.msra.mxu1 %v9477_v56  ;;  %3207 = vmatpush1.bf16.msra.mxu0 %v9480_v57 }
 0x1e3   : > { %3135 = vmatprep.mubr.bf16.mxu0 %v9931_v63  ;;  %3361 = vmatprep.mubr.bf16.mxu1 %v9931_v63 }
 0x1e4   : > { %3434 = vmatprep.subr.bf16.mxu1 %v9485_v58  ;;  %3208 = vmatprep.subr.bf16.mxu0 %v9488_v59  ;;  %v9537_v58 = vld [vmem:[#allocation8 + $0x20] ss:$12 sps:$4 sm:$0xff]  }
 0x1e6   : > { %3435 = vmatpush1.bf16.msra.mxu1 %v9483_v61  ;;  %3209 = vmatpush1.bf16.msra.mxu0 %v9486_v62  ;;  %v9939_v61 = vld [vmem:[%s10440_s11 + $0x7c] ss:$12 sps:$4 sm:$0xff]  }
 0x1e7   : > { %3436 = vmatprep.subr.bf16.mxu1 %v9491_v0  ;;  %3210 = vmatprep.subr.bf16.mxu0 %v9494_v1 }
 0x1e9   : > { %3136 = vmatmul.mubr.bf16.gmra.mrb[68].mxu0 %v9932_v8  ;;  %3362 = vmatmul.mubr.bf16.gmra.mrb[68].mxu1 %v9932_v8 }
 0x1ea   : > { %3145 = vmatprep.mubr.bf16.mxu0 %v9933_v10  ;;  %3371 = vmatprep.mubr.bf16.mxu1 %v9933_v10  ;;  %v9536_v10 = vld [vmem:[#allocation8 + $0xe0] ss:$12 sps:$4 sm:$0xff]  }
 0x1eb   : > { %3437 = vmatpush1.bf16.msra.mxu1 %v9489_v2  ;;  %3211 = vmatpush1.bf16.msra.mxu0 %v9492_v4 }
 0x1ec   : > { %3438 = vmatprep.subr.bf16.mxu1 %v9497_v5  ;;  %3212 = vmatprep.subr.bf16.mxu0 %v9500_v7 }
 0x1ef   : > { %3439 = vmatpush1.bf16.msra.mxu1 %v9495_v9  ;;  %3213 = vmatpush1.bf16.msra.mxu0 %v9498_v11 }
 0x1f0   : > { %3440 = vmatprep.subr.bf16.mxu1 %v9503_v12  ;;  %3214 = vmatprep.subr.bf16.mxu0 %v9506_v15  ;;  %v9940_v12 = vld [vmem:[%s10440_s11 + $0x78] ss:$12 sps:$4 sm:$0xff]   ;;  %v9941_v15 = vld [vmem:[%s10440_s11 + $0x94] ss:$12 sps:$4 sm:$0xff]  }
 0x1f1   : > { %3146 = vmatmul.mubr.bf16.gmra.mrb[72].mxu0 %v9934_v19  ;;  %3372 = vmatmul.mubr.bf16.gmra.mrb[72].mxu1 %v9934_v19 }
 0x1f2   : > { %3155 = vmatprep.mubr.bf16.mxu0 %v9935_v21  ;;  %3381 = vmatprep.mubr.bf16.mxu1 %v9935_v21  ;;  %v9944_v21 = vld [vmem:[%s10440_s11 + $0xa8] ss:$12 sps:$4 sm:$0xff]  }
 0x1f3   : > { %3441 = vmatpush1.bf16.msra.mxu1 %v9501_v16  ;;  %3215 = vmatpush1.bf16.msra.mxu0 %v9504_v17 }
 0x1f4   : > { %v10583_v25 = vpop.f32.mrb[0].mxu0  ;;  %v10585_v26 = vpop.f32.mrb[0].mxu1  ;;  %3442 = vmatprep.subr.bf16.mxu1 %v9509_v18  ;;  %3216 = vmatprep.subr.bf16.mxu0 %v9512_v3 }
 0x1f5   : > { %v10587_v14 = vpop.f32.mrb[1].mxu0  ;;  %v10589_v27 = vpop.f32.mrb[1].mxu1 }
 0x1f6   : > { %v10591_v30 = vpop.f32.mrb[2].mxu0  ;;  %v10593_v31 = vpop.f32.mrb[2].mxu1 }
 0x1f7   : > { %v10599_v34 = vpop.f32.mrb[3].mxu0  ;;  %v10601_v35 = vpop.f32.mrb[3].mxu1  ;;  %3443 = vmatpush1.bf16.msra.mxu1 %v9507_v6  ;;  %3217 = vmatpush1.bf16.msra.mxu0 %v9510_v20  ;;  %v9532_v20 = vld [vmem:[#allocation8 + $0x1c] ss:$12 sps:$4 sm:$0xff]  }
 0x1f8   : > { %3444 = vmatprep.subr.bf16.mxu1 %v9515_v22  ;;  %3218 = vmatprep.subr.bf16.mxu0 %v9518_v13 }
 0x1f9   : > { %3156 = vmatmul.mubr.bf16.gmra.mrb[76].mxu0 %v9936_v39  ;;  %3382 = vmatmul.mubr.bf16.gmra.mrb[76].mxu1 %v9936_v39 }
 0x1fa   : > { %3165 = vmatprep.mubr.bf16.mxu0 %v9937_v42  ;;  %3391 = vmatprep.mubr.bf16.mxu1 %v9937_v42 }
 0x1fb   : > { %3445 = vmatpush1.bf16.msra.mxu1 %v9513_v28  ;;  %3219 = vmatpush1.bf16.msra.mxu0 %v9516_v29 }
 0x1fc   : > { %v10609_v45 = vpop.f32.mrb[4].mxu0  ;;  %v10611_v46 = vpop.f32.mrb[4].mxu1  ;;  %3446 = vmatprep.subr.bf16.mxu1 %v9521_v32  ;;  %3220 = vmatprep.subr.bf16.mxu0 %v9524_v38  ;;  %v9942_v32 = vld [vmem:[%s10440_s11 + $0x90] ss:$12 sps:$4 sm:$0xff]   ;;  %v9943_v38 = vld [vmem:[%s10440_s11 + $0xac] ss:$12 sps:$4 sm:$0xff]  }
 0x1fd   : > { %v10613_v48 = vpop.f32.mrb[5].mxu0  ;;  %v10615_v51 = vpop.f32.mrb[5].mxu1 }
 0x1fe   : > { %v10617_v52 = vpop.f32.mrb[6].mxu0  ;;  %v10619_v53 = vpop.f32.mrb[6].mxu1 }
 0x1ff   : > { %v10625_v56 = vpop.f32.mrb[7].mxu0  ;;  %v10627_v57 = vpop.f32.mrb[7].mxu1  ;;  %3447 = vmatpush1.bf16.msra.mxu1 %v9519_v41  ;;  %3221 = vmatpush1.bf16.msra.mxu0 %v9522_v43 }
 0x200   : > { %5931 = vmatprep.subr.bf16.mxu0 %v9527_v44  ;;  %8194 = vmatprep.subr.bf16.mxu1 %v9528_v47 }
 0x201   : > { %3166 = vmatmul.mubr.bf16.gmra.mrb[80].mxu0 %v9938_v60  ;;  %3392 = vmatmul.mubr.bf16.gmra.mrb[80].mxu1 %v9938_v60 }
 0x202   : > { %3175 = vmatprep.mubr.bf16.mxu0 %v9939_v61  ;;  %3401 = vmatprep.mubr.bf16.mxu1 %v9939_v61 }
 0x204   : > { %v10635_v62 = vpop.f32.mrb[8].mxu0  ;;  %v10637_v63 = vpop.f32.mrb[8].mxu1 }
 0x205   : > { %v10639_v0 = vpop.f32.mrb[9].mxu0  ;;  %v10641_v1 = vpop.f32.mrb[9].mxu1 }
 0x206   : > { %v10643_v2 = vpop.f32.mrb[10].mxu0  ;;  %v10645_v4 = vpop.f32.mrb[10].mxu1 }
 0x207   : > { %v10651_v8 = vpop.f32.mrb[11].mxu0  ;;  %v10653_v9 = vpop.f32.mrb[11].mxu1 }
 0x209   : > { %3176 = vmatmul.mubr.bf16.gmra.mrb[84].mxu0 %v9940_v12  ;;  %3402 = vmatmul.mubr.bf16.gmra.mrb[84].mxu1 %v9940_v12 }
 0x20a   : > { %3185 = vmatprep.mubr.bf16.mxu0 %v9941_v15  ;;  %3411 = vmatprep.mubr.bf16.mxu1 %v9941_v15 }
 0x20c   : > { %v10661_v16 = vpop.f32.mrb[12].mxu0  ;;  %v10663_v17 = vpop.f32.mrb[12].mxu1 }
 0x20d   : > { %12260 = vst [vmem:[#allocation16_spill] sm:$0xff] %v10663_v17  ;;  %v10665_v18 = vpop.f32.mrb[13].mxu0  ;;  %v10667_v3 = vpop.f32.mrb[13].mxu1 }
 0x20e   : > { %12261 = vst [vmem:[#allocation17_spill] sm:$0xff] %v10667_v3  ;;  %v10669_v19 = vpop.f32.mrb[14].mxu0  ;;  %v10671_v6 = vpop.f32.mrb[14].mxu1 }
 0x20f   : > { %12262 = vst [vmem:[#allocation18_spill] sm:$0xff] %v10671_v6  ;;  %v10677_v22 = vpop.f32.mrb[15].mxu0  ;;  %v10679_v13 = vpop.f32.mrb[15].mxu1  ;;  %v9947_v6 = vld [vmem:[%s10440_s11 + $0x38] ss:$12 sps:$4 sm:$0xff]  }
 0x210   : > { %12263 = vst [vmem:[#allocation19_spill] sm:$0xff] %v10679_v13  ;;  %v9554_v13 = vld [vmem:[#allocation8 + $0xa8] ss:$12 sps:$4 sm:$0xff]  }
 0x211   : > { %3186 = vmatmul.mubr.bf16.gmra.mrb[88].mxu0 %v9942_v32  ;;  %3412 = vmatmul.mubr.bf16.gmra.mrb[88].mxu1 %v9942_v32 }
 0x212   : > { %3195 = vmatprep.mubr.bf16.mxu0 %v9943_v38  ;;  %3421 = vmatprep.mubr.bf16.mxu1 %v9943_v38  ;;  %v9525_v38 = vld [vmem:[#allocation8] ss:$12 sps:$4 sm:$0xff]  }
 0x214   : > { %v10687_v39 = vpop.f32.mrb[16].mxu0  ;;  %v10689_v41 = vpop.f32.mrb[16].mxu1 }
 0x215   : > { %12264 = vst [vmem:[#allocation20_spill] sm:$0xff] %v10689_v41  ;;  %v10691_v42 = vpop.f32.mrb[17].mxu0  ;;  %v10693_v43 = vpop.f32.mrb[17].mxu1  ;;  %v9946_v41 = vld [vmem:[%s10440_s11 + $0x20] ss:$12 sps:$4 sm:$0xff]  }
 0x216   : > { %12265 = vst [vmem:[#allocation21_spill] sm:$0xff] %v10693_v43  ;;  %v10695_v44 = vpop.f32.mrb[18].mxu0  ;;  %v10697_v47 = vpop.f32.mrb[18].mxu1 }
 0x217   : > { %12266 = vst [vmem:[#allocation22_spill] sm:$0xff] %v10697_v47  ;;  %v10703_v12 = vpop.f32.mrb[19].mxu0  ;;  %v10705_v15 = vpop.f32.mrb[19].mxu1  ;;  %v9546_v47 = vld [vmem:[#allocation8 + $0x78] ss:$12 sps:$4 sm:$0xff]  }
 0x218   : > { %12267 = vst [vmem:[#allocation23_spill] sm:$0xff] %v10705_v15  ;;  %v9548_v15 = vld [vmem:[#allocation8 + $0x7c] ss:$12 sps:$4 sm:$0xff]  }
 0x219   : > { %3196 = vmatmul.mubr.bf16.gmra.mrb[92].mxu0 %v9944_v21  ;;  %3422 = vmatmul.mubr.bf16.gmra.mrb[92].mxu1 %v9944_v21  ;;  %v9530_v21 = vld [vmem:[#allocation8 + $0x18] ss:$12 sps:$4 sm:$0xff]  }
 0x21a   : > { %3238 = vmatprep.mubr.bf16.mxu0 %v12169_v50  ;;  %3464 = vmatprep.mubr.bf16.mxu1 %v12169_v50 }
 0x21c   : > { %v10714_v29 = vpop.f32.mrb[20].mxu0  ;;  %v10716_v61 = vpop.f32.mrb[20].mxu1 }
 0x21d   : > { %12268 = vst [vmem:[#allocation24_spill] sm:$0xff] %v10716_v61  ;;  %v10718_v7 = vpop.f32.mrb[21].mxu0  ;;  %v10720_v11 = vpop.f32.mrb[21].mxu1 }
 0x21e   : > { %12269 = vst [vmem:[#allocation25_spill] sm:$0xff] %v10720_v11  ;;  %v10722_v55 = vpop.f32.mrb[22].mxu0  ;;  %v10724_v59 = vpop.f32.mrb[22].mxu1  ;;  %v9540_v11 = vld [vmem:[#allocation8 + $0x4c] ss:$12 sps:$4 sm:$0xff]  }
 0x21f   : > { %12270 = vst [vmem:[#allocation26_spill] sm:$0xff] %v10724_v59  ;;  %v10730_v60 = vpop.f32.mrb[23].mxu0  ;;  %v10732_v32 = vpop.f32.mrb[23].mxu1  ;;  %v9538_v59 = vld [vmem:[#allocation8 + $0x48] ss:$12 sps:$4 sm:$0xff]  }
 0x220   : > { %12271 = vst [vmem:[#allocation27_spill] sm:$0xff] %v10732_v32  ;;  %v9553_v32 = vld [vmem:[#allocation8 + $0x50] ss:$12 sps:$4 sm:$0xff]  }
 0x221   : > { %3239 = vmatmul.mubr.bf16.vlgmr.msra.gmra.mrb[64].mxu0 %v9945_v54  ;;  %3465 = vmatmul.mubr.bf16.vlgmr.msra.gmra.mrb[64].mxu1 %v9945_v54 }
 0x222   : > { %5932 = vmatpush1.bf16.msra.mxu0 %v9525_v38  ;;  %8195 = vmatpush3.bf16.msra.mxu1 %v9529_v24  ;;  %v9552_v38 = vld [vmem:[#allocation8 + $0x110] ss:$12 sps:$4 sm:$0xff]  }
 0x223   : > { %5933 = vmatprep.subr.bf16.mxu0 %v9532_v20  ;;  %3248 = vmatprep.mubr.bf16.mxu0 %v12169_v50  ;;  %v9533_v20 = vld [vmem:[#allocation8 + $0x30] ss:$12 sps:$4 sm:$0xff]  }
 0x224   : > { %v10740_v36 = vpop.f32.mrb[24].mxu0  ;;  %v10742_v61 = vpop.f32.mrb[24].mxu1  ;;  %3474 = vmatprep.mubr.bf16.mxu1 %v12169_v50  ;;  %8196 = vmatprep.subr.bf16.mxu1 %v9536_v10 }
 0x225   : > { %12272 = vst [vmem:[#allocation28_spill] sm:$0xff] %v10742_v61  ;;  %v10745_v5 = vpop.f32.mrb[25].mxu0  ;;  %v10747_v28 = vpop.f32.mrb[25].mxu1  ;;  %v12276_v61 = vmov 0  }
 0x226   : > { %12273 = vst [vmem:[#allocation29_spill] sm:$0xff] %v10747_v28  ;;  %v10749_v24 = vpop.f32.mrb[26].mxu0  ;;  %v10751_v54 = vpop.f32.mrb[26].mxu1  ;;  %5934 = vmatpush1.bf16.msra.mxu0 %v9530_v21  ;;  %8197 = vmatpush3.bf16.msra.mxu1 %v9537_v58  ;;  %v9545_v58 = vld [vmem:[#allocation8 + $0x38] ss:$12 sps:$4 sm:$0xff]  }
 0x227   : > { %12274 = vst [vmem:[#allocation30_spill] sm:$0xff] %v10751_v54  ;;  %v10757_v50 = vpop.f32.mrb[27].mxu0  ;;  %v10759_v10 = vpop.f32.mrb[27].mxu1  ;;  %5935 = vmatprep.subr.bf16.mxu0 %v9535_v37  ;;  %8198 = vmatprep.subr.bf16.mxu1 %v9544_v23  ;;  %v9543_v37 = vld [vmem:[#allocation8 + $0x64] ss:$12 sps:$4 sm:$0xff]  }
 0x228   : > { %12275 = vst [vmem:[#allocation31_spill] sm:$0xff] %v10759_v10  ;;  %v9561_v10 = vld [vmem:[#allocation8 + $0x68] ss:$12 sps:$4 sm:$0xff]  }
 0x229   : > { %3249 = vmatmul.mubr.bf16.gmra.mrb[68].mxu0 %v9946_v41  ;;  %3475 = vmatmul.mubr.bf16.gmra.mrb[68].mxu1 %v9946_v41 }
 0x22a   : > { %5936 = vmatpush1.bf16.msra.mxu0 %v9533_v20  ;;  %3258 = vmatprep.mubr.bf16.mxu0 %v12276_v61 }
 0x22b   : > { %5937 = vmatprep.subr.bf16.mxu0 %v9540_v11  ;;  %3484 = vmatprep.mubr.bf16.mxu1 %v12276_v61  ;;  %v9541_v11 = vld [vmem:[#allocation8 + $0x60] ss:$12 sps:$4 sm:$0xff]  }
 0x22c   : > { %v10768_v23 = vpop.f32.mrb[28].mxu0  ;;  %v10770_v54 = vpop.f32.mrb[28].mxu1  ;;  %8199 = vmatpush3.bf16.msra.mxu1 %v9545_v58 }
 0x22d   : > { %12277 = vst [vmem:[#allocation32_spill] sm:$0xff] %v10770_v54  ;;  %v10772_v21 = vpop.f32.mrb[29].mxu0  ;;  %v10774_v28 = vpop.f32.mrb[29].mxu1  ;;  %8200 = vmatprep.subr.bf16.mxu1 %v9552_v38  ;;  %v9568_v54 = vld [vmem:[#allocation8 + $0x140] ss:$12 sps:$4 sm:$0xff]  }
 0x22e   : > { %12278 = vst [vmem:[#allocation33_spill] sm:$0xff] %v10774_v28  ;;  %v10776_v41 = vpop.f32.mrb[30].mxu0  ;;  %v10778_v20 = vpop.f32.mrb[30].mxu1  ;;  %5938 = vmatpush1.bf16.msra.mxu0 %v9538_v59  ;;  %v9560_v59 = vld [vmem:[#allocation8 + $0x128] ss:$12 sps:$4 sm:$0xff]  }
 0x22f   : > { %12279 = vst [vmem:[#allocation34_spill] sm:$0xff] %v10778_v20  ;;  %v10784_v58 = vpop.f32.mrb[31].mxu0  ;;  %v10786_v43 = vpop.f32.mrb[31].mxu1  ;;  %5939 = vmatprep.subr.bf16.mxu0 %v9543_v37  ;;  %v9551_v37 = vld [vmem:[#allocation8 + $0x94] ss:$12 sps:$4 sm:$0xff]  }
 0x230   : > { %12280 = vst [vmem:[#allocation35_spill] sm:$0xff] %v10786_v43  ;;  %8201 = vmatpush3.bf16.msra.mxu1 %v9553_v32  ;;  %v10178_v38 = vmov 1966171168   ;;  %v3649_v32 = vlaneseq  ;;  %v9549_v20 = vld [vmem:[#allocation8 + $0x90] ss:$12 sps:$4 sm:$0xff]  }
 0x231   : > { %3259 = vmatmul.mubr.bf16.gmra.mrb[72].mxu0 %v9947_v6  ;;  %3485 = vmatmul.mubr.bf16.gmra.mrb[72].mxu1 %v9947_v6  ;;  %v3647_v17 = vunpack.c.l.s4 %v10178_v38  ;;  %v9556_v6 = vld [vmem:[#allocation8 + $0xac] ss:$12 sps:$4 sm:$0xff]   ;;  %v9948_v28 = vld [vmem:[%s10440_s11 + $0x50] ss:$12 sps:$4 sm:$0xff]  }
 0x232   : > { %5940 = vmatpush1.bf16.msra.mxu0 %v9541_v11  ;;  %3268 = vmatprep.mubr.bf16.mxu0 %v12276_v61  ;;  %v9569_v11 = vld [vmem:[#allocation8 + $0x80] ss:$12 sps:$4 sm:$0xff]   ;;  %v9576_v43 = vld [vmem:[#allocation8 + $0x158] ss:$12 sps:$4 sm:$0xff]   ;;  %v9584_v38 = vld [vmem:[#allocation8 + $0x170] ss:$12 sps:$4 sm:$0xff]  }
 0x233   : > { %5941 = vmatprep.subr.bf16.mxu0 %v9548_v15  ;;  %3494 = vmatprep.mubr.bf16.mxu1 %v12276_v61  ;;  %v3648_v3 = vunpack.c.0.s8 %v3647_v17  ;;  %v10796_v15 = vshrl.u32 %v3649_v32, 7  ;;  %v10803_v17 = vld [vmem:[#allocation7] sm:$0xff] }
 0x234   : > { %8202 = vmatprep.subr.bf16.mxu1 %v9560_v59  ;;  %v9949_v59 = vld [vmem:[%s10440_s11 + $0x68] ss:$12 sps:$4 sm:$0xff]  }
 0x235   : > { %8203 = vmatpush3.bf16.msra.mxu1 %v9561_v10  ;;  %12281 = vst [vmem:[#allocation36_spill] sm:$0xff] %v10796_v15  ;;  %v10801_v10 = vsub.s32 %v3648_v3, %v10796_v15  ;;  %v9592_v3 = vld [vmem:[#allocation8 + $0x248] ss:$12 sps:$4 sm:$0xff]  }
 0x236   : > { %5942 = vmatpush1.bf16.msra.mxu0 %v9546_v47  ;;  %8204 = vmatprep.subr.bf16.mxu1 %v9568_v54  ;;  %v9559_v47 = vld [vmem:[#allocation8 + $0xc4] ss:$12 sps:$4 sm:$0xff]  }
 0x237   : > { %5943 = vmatprep.subr.bf16.mxu0 %v9551_v37  ;;  %v9577_v54 = vld [vmem:[#allocation8 + $0x98] ss:$12 sps:$4 sm:$0xff]   ;;  %v9585_v37 = vld [vmem:[#allocation8 + $0xb0] ss:$12 sps:$4 sm:$0xff]   ;;  %v3652_v32 = vrot.slane %v10803_v17, %v10801_v10 }
 0x239   : > { %3269 = vmatmul.mubr.bf16.gmra.mrb[76].mxu0 %v9948_v28  ;;  %3495 = vmatmul.mubr.bf16.gmra.mrb[76].mxu1 %v9948_v28  ;;  %v9557_v28 = vld [vmem:[#allocation8 + $0xc0] ss:$12 sps:$4 sm:$0xff]  }
 0x23a   : > { %5944 = vmatpush1.bf16.msra.mxu0 %v9549_v20  ;;  %3278 = vmatprep.mubr.bf16.mxu0 %v12276_v61  ;;  %v9564_v20 = vld [vmem:[#allocation8 + $0xdc] ss:$12 sps:$4 sm:$0xff]  }
 0x23b   : > { %5945 = vmatprep.subr.bf16.mxu0 %v9556_v6  ;;  %3504 = vmatprep.mubr.bf16.mxu1 %v12276_v61  ;;  %v3660_v6 = vcombine.high %v3652_v32, %v3652_v32 }
 0x23c   : > { %8205 = vmatpush3.bf16.msra.mxu1 %v9569_v11  ;;  %v9565_v11 = vld [vmem:[#allocation8 + $0xf0] ss:$12 sps:$4 sm:$0xff]  }
 0x23d   : > { %8206 = vmatprep.subr.bf16.mxu1 %v9576_v43  ;;  %v9562_v43 = vld [vmem:[#allocation8 + $0xd8] ss:$12 sps:$4 sm:$0xff]  }
 0x23e   : > { %5946 = vmatpush1.bf16.msra.mxu0 %v9554_v13  ;;  %v9567_v13 = vld [vmem:[#allocation8 + $0xf4] ss:$12 sps:$4 sm:$0xff]  }
 0x23f   : > { %5947 = vmatprep.subr.bf16.mxu0 %v9559_v47  ;;  %v9572_v47 = vld [vmem:[#allocation8 + $0x10c] ss:$12 sps:$4 sm:$0xff]  }
 0x240   : > { %8207 = vmatpush3.bf16.msra.mxu1 %v9577_v54  ;;  %v10813_v54 = vrot.slane %v3660_v6, %v10801_v10 }
 0x241   : > { %3279 = vmatmul.mubr.bf16.gmra.mrb[80].mxu0 %v9949_v59  ;;  %3505 = vmatmul.mubr.bf16.gmra.mrb[80].mxu1 %v9949_v59 }
 0x242   : > { %5948 = vmatpush1.bf16.msra.mxu0 %v9557_v28  ;;  %3288 = vmatprep.mubr.bf16.mxu0 %v12276_v61  ;;  %v9570_v28 = vld [vmem:[#allocation8 + $0x108] ss:$12 sps:$4 sm:$0xff]   ;;  %v3726_v59 = vpack.i.b16 %v10813_v54, %v10813_v54 }
 0x243   : > { %5949 = vmatprep.subr.bf16.mxu0 %v9564_v20  ;;  %3514 = vmatprep.mubr.bf16.mxu1 %v12276_v61  ;;  %v9575_v20 = vld [vmem:[#allocation8 + $0x124] ss:$12 sps:$4 sm:$0xff]  }
 0x244   : > { %8208 = vmatprep.subr.bf16.mxu1 %v9584_v38  ;;  %v10818_v38 = vsub.s32 0, %v10796_v15 }
 0x245   : > { %8209 = vmatpush3.bf16.msra.mxu1 %v9585_v37  ;;  %v9573_v37 = vld [vmem:[#allocation8 + $0x120] ss:$12 sps:$4 sm:$0xff]  }
 0x246   : > { %5950 = vmatpush1.bf16.msra.mxu0 %v9562_v43  ;;  %8258 = vmatprep.subr.bf16.mxu1 %v9592_v3  ;;  %v10823_v43 = vrot.slane %v3726_v59, %v10818_v38  ;;  %v10826_v3 = vrot.slane %v3652_v32, %v10801_v10 }
 0x247   : > { %5951 = vmatprep.subr.bf16.mxu0 %v9567_v13  ;;  %v9578_v13 = vld [vmem:[#allocation8 + $0x138] ss:$12 sps:$4 sm:$0xff]  }
 0x248   : > { %v3719_v6 = vpack.i.b16 %v10826_v3, %v10826_v3 }
 0x249   : > { %3289 = vmatmul.mubr.bf16.gmra.mrb[84].mxu0 %v10558_v33  ;;  %3515 = vmatmul.mubr.bf16.gmra.mrb[84].mxu1 %v10558_v33  ;;  %v9580_v33 = vld [vmem:[#allocation8 + $0x13c] ss:$12 sps:$4 sm:$0xff]  }
 0x24a   : > { %5952 = vmatpush1.bf16.msra.mxu0 %v9565_v11  ;;  %3298 = vmatprep.mubr.bf16.mxu0 %v12276_v61  ;;  %v9583_v11 = vld [vmem:[#allocation8 + $0x154] ss:$12 sps:$4 sm:$0xff]  }
 0x24b   : > { %5953 = vmatprep.subr.bf16.mxu0 %v9572_v47  ;;  %3524 = vmatprep.mubr.bf16.mxu1 %v12276_v61  ;;  %v12282_v47 = vpack.c.bf16 %v10599_v34, %v10587_v14  ;;  %v12283_v14 = vpack.c.bf16 %v10591_v30, %v10583_v25  ;;  %v9600_v25 = vld [vmem:[#allocation8 + $0x260] ss:$12 sps:$4 sm:$0xff]   ;;  %v9594_v30 = vld [vmem:[#allocation8 + $0x198] ss:$12 sps:$4 sm:$0xff]  }
 0x24d   : > { %v3803_v32 = vadd.bf16 %v10823_v43, %v12282_v47  ;;  %v9593_v47 = vld [vmem:[#allocation8 + $0x188] ss:$12 sps:$4 sm:$0xff]  }
 0x24e   : > { %5954 = vmatpush1.bf16.msra.mxu0 %v9570_v28  ;;  %v9581_v28 = vld [vmem:[#allocation8 + $0x150] ss:$12 sps:$4 sm:$0xff]  }
 0x24f   : > { %5955 = vmatprep.subr.bf16.mxu0 %v9575_v20  ;;  %v9588_v20 = vld [vmem:[#allocation8 + $0x16c] ss:$12 sps:$4 sm:$0xff]   ;;  %v3899_v59 = vmax.bf16 %v12276_v61, %v3803_v32 }
 0x251   : > { %3299 = vmatmul.mubr.bf16.gmra.mrb[88].mxu0 %v10565_v40  ;;  %3525 = vmatmul.mubr.bf16.gmra.mrb[88].mxu1 %v10565_v40  ;;  %v10839_v40 = vrot.slane %v3719_v6, %v10818_v38 }
 0x252   : > { %5956 = vmatpush1.bf16.msra.mxu0 %v9573_v37  ;;  %3308 = vmatprep.mubr.bf16.mxu0 %v12276_v61  ;;  %v9586_v37 = vld [vmem:[#allocation8 + $0x168] ss:$12 sps:$4 sm:$0xff]  }
 0x253   : > { %5957 = vmatprep.subr.bf16.mxu0 %v9580_v33  ;;  %3534 = vmatprep.mubr.bf16.mxu1 %v12276_v61  ;;  %v3802_v34 = vadd.bf16 %v10839_v40, %v12283_v14  ;;  %v9591_v33 = vld [vmem:[#allocation8 + $0x184] ss:$12 sps:$4 sm:$0xff]  }
 0x256   : > { %5958 = vmatpush1.bf16.msra.mxu0 %v9578_v13  ;;  %v12284_v13 = vpack.c.bf16 %v10625_v56, %v10613_v48  ;;  %v12285_v48 = vpack.c.bf16 %v10617_v52, %v10609_v45  ;;  %v9604_v45 = vld [vmem:[#allocation8 + $0x1cc] ss:$12 sps:$4 sm:$0xff]  }
 0x257   : > { %5959 = vmatprep.subr.bf16.mxu0 %v9583_v11  ;;  %v9589_v11 = vld [vmem:[#allocation8 + $0x180] ss:$12 sps:$4 sm:$0xff]  }
 0x258   : > { %v3815_v6 = vadd.bf16 %v10823_v43, %v12284_v13  ;;  %v3814_v56 = vadd.bf16 %v10839_v40, %v12285_v48 }
 0x259   : > { %3309 = vmatmul.mubr.bf16.gmra.mrb[92].mxu0 %v10572_v49  ;;  %3535 = vmatmul.mubr.bf16.gmra.mrb[92].mxu1 %v10572_v49  ;;  %v3898_v49 = vmax.bf16 %v12276_v61, %v3802_v34  ;;  %v9608_v34 = vld [vmem:[#allocation8 + $0x278] ss:$12 sps:$4 sm:$0xff]  }
 0x25a   : > { %5960 = vmatpush1.bf16.msra.mxu0 %v9581_v28  ;;  %5963 = vmatprep.mubr.bf16.mxu0 %v3899_v59  ;;  %v3911_v32 = vmax.bf16 %v12276_v61, %v3815_v6  ;;  %v9596_v28 = vld [vmem:[#allocation8 + $0x19c] ss:$12 sps:$4 sm:$0xff]   ;;  %v3910_v13 = vmax.bf16 %v12276_v61, %v3814_v56  ;;  %v9609_v6 = vld [vmem:[#allocation8 + $0x1b8] ss:$12 sps:$4 sm:$0xff]  }
 0x25b   : > { %6641 = vmatprep.mubr.bf16.mxu1 %v3899_v59  ;;  %5961 = vmatprep.subr.bf16.mxu0 %v9588_v20  ;;  %v9599_v20 = vld [vmem:[#allocation8 + $0x1b4] ss:$12 sps:$4 sm:$0xff]   ;;  %v9612_v56 = vld [vmem:[#allocation8 + $0x1fc] ss:$12 sps:$4 sm:$0xff]  }
 0x25c   : > { %v9601_v59 = vld [vmem:[#allocation8 + $0x1a0] ss:$12 sps:$4 sm:$0xff]  }
 0x25e   : > { %5962 = vmatpush1.bf16.msra.mxu0 %v9586_v37  ;;  %v12286_v37 = vpack.c.bf16 %v10651_v8, %v10639_v0  ;;  %v9602_v0 = vld [vmem:[#allocation8 + $0x1c8] ss:$12 sps:$4 sm:$0xff]   ;;  %v12287_v8 = vpack.c.bf16 %v10643_v2, %v10635_v62 }
 0x25f   : > { %6044 = vmatprep.subr.bf16.mxu0 %v9591_v33  ;;  %v9597_v33 = vld [vmem:[#allocation8 + $0x1b0] ss:$12 sps:$4 sm:$0xff]   ;;  %v9625_v2 = vld [vmem:[#allocation8 + $0x2a8] ss:$12 sps:$4 sm:$0xff]  }
 0x260   : > { %v3827_v14 = vadd.bf16 %v10823_v43, %v12286_v37 }
 0x261   : > { %5964 = vmatmul.mubr.bf16.vlgmr.msra.gmra.mrb[96].mxu0 %v3898_v49  ;;  %6642 = vmatmul.mubr.bf16.vlgmr.msra.gmra.mrb[96].mxu1 %v3898_v49  ;;  %v3826_v49 = vadd.bf16 %v10839_v40, %v12287_v8 }
 0x262   : > { %5973 = vmatprep.mubr.bf16.mxu0 %v3911_v32  ;;  %6045 = vmatpush1.bf16.msra.mxu0 %v9589_v11  ;;  %v3923_v52 = vmax.bf16 %v12276_v61, %v3827_v14  ;;  %v9617_v11 = vld [vmem:[#allocation8 + $0x290] ss:$12 sps:$4 sm:$0xff]   ;;  %v9616_v14 = vld [vmem:[#allocation8 + $0x214] ss:$12 sps:$4 sm:$0xff]  }
 0x263   : > { %6649 = vmatprep.mubr.bf16.mxu1 %v3911_v32  ;;  %8259 = vmatpush3.bf16.msra.mxu1 %v9593_v47  ;;  %v9607_v47 = vld [vmem:[#allocation8 + $0x1e4] ss:$12 sps:$4 sm:$0xff]   ;;  %v12288_v32 = vpack.c.bf16 %v10677_v22, %v10665_v18  ;;  %v3922_v48 = vmax.bf16 %v12276_v61, %v3826_v49  ;;  %v9633_v22 = vld [vmem:[#allocation8 + $0x2c0] ss:$12 sps:$4 sm:$0xff]  }
 0x264   : > { %6046 = vmatprep.subr.bf16.mxu0 %v9596_v28  ;;  %8260 = vmatprep.subr.bf16.mxu1 %v9600_v25  ;;  %v9618_v25 = vld [vmem:[#allocation8 + $0x1d0] ss:$12 sps:$4 sm:$0xff]   ;;  %v9610_v18 = vld [vmem:[#allocation8 + $0x1f8] ss:$12 sps:$4 sm:$0xff]  }
 0x265   : > { %v3839_v28 = vadd.bf16 %v10823_v43, %v12288_v32 }
 0x266   : > { %6047 = vmatpush1.bf16.msra.mxu0 %v9594_v30  ;;  %v9605_v30 = vld [vmem:[#allocation8 + $0x1e0] ss:$12 sps:$4 sm:$0xff]  }
 0x267   : > { %6048 = vmatprep.subr.bf16.mxu0 %v9599_v20  ;;  %8261 = vmatpush3.bf16.msra.mxu1 %v9601_v59  ;;  %v3935_v62 = vmax.bf16 %v12276_v61, %v3839_v28  ;;  %v9626_v20 = vld [vmem:[#allocation8 + $0x1e8] ss:$12 sps:$4 sm:$0xff]   ;;  %v12289_v59 = vpack.c.bf16 %v10669_v19, %v10661_v16 }
 0x268   : > { %8262 = vmatprep.subr.bf16.mxu1 %v9608_v34  ;;  %v12290_v34 = vpack.c.bf16 %v10703_v12, %v10691_v42  ;;  %v9627_v12 = vld [vmem:[#allocation8 + $0x258] ss:$12 sps:$4 sm:$0xff]   ;;  %v9657_v28 = vld [vmem:[#allocation8 + $0x3c8] ss:$12 sps:$4 sm:$0xff]  }
 0x269   : > { %5974 = vmatmul.mubr.bf16.gmra.mrb[100].mxu0 %v3910_v13  ;;  %6650 = vmatmul.mubr.bf16.gmra.mrb[100].mxu1 %v3910_v13  ;;  %v3838_v37 = vadd.bf16 %v10839_v40, %v12289_v59 }
 0x26a   : > { %5983 = vmatprep.mubr.bf16.mxu0 %v3923_v52  ;;  %6049 = vmatpush1.bf16.msra.mxu0 %v9597_v33  ;;  %v3851_v33 = vadd.bf16 %v10823_v43, %v12290_v34 }
 0x26b   : > { %6657 = vmatprep.mubr.bf16.mxu1 %v3923_v52  ;;  %6050 = vmatprep.subr.bf16.mxu0 %v9604_v45  ;;  %v3934_v49 = vmax.bf16 %v12276_v61, %v3838_v37 }
 0x26c   : > { %8263 = vmatpush3.bf16.msra.mxu1 %v9609_v6 }
 0x26d   : > { %8264 = vmatprep.subr.bf16.mxu1 %v9617_v11  ;;  %v9614_v11 = vld [vmem:[#allocation8 + $0x210] ss:$12 sps:$4 sm:$0xff]  }
 0x26e   : > { %6051 = vmatpush1.bf16.msra.mxu0 %v9602_v0 }
 0x26f   : > { %6052 = vmatprep.subr.bf16.mxu0 %v9607_v47  ;;  %v9621_v47 = vld [vmem:[#allocation8 + $0x22c] ss:$12 sps:$4 sm:$0xff]  }
 0x270   : > { %8265 = vmatpush3.bf16.msra.mxu1 %v9618_v25  ;;  %v3947_v25 = vmax.bf16 %v12276_v61, %v3851_v33 }
 0x271   : > { %5984 = vmatmul.mubr.bf16.gmra.mrb[104].mxu0 %v3922_v48  ;;  %6658 = vmatmul.mubr.bf16.gmra.mrb[104].mxu1 %v3922_v48  ;;  %v9641_v48 = vld [vmem:[#allocation8 + $0x2d8] ss:$12 sps:$4 sm:$0xff]  }
 0x272   : > { %5993 = vmatprep.mubr.bf16.mxu0 %v3935_v62  ;;  %6053 = vmatpush1.bf16.msra.mxu0 %v9605_v30  ;;  %v9634_v30 = vld [vmem:[#allocation8 + $0x200] ss:$12 sps:$4 sm:$0xff]  }
 0x273   : > { %6665 = vmatprep.mubr.bf16.mxu1 %v3935_v62  ;;  %6054 = vmatprep.subr.bf16.mxu0 %v9612_v56  ;;  %v9619_v56 = vld [vmem:[#allocation8 + $0x228] ss:$12 sps:$4 sm:$0xff]   ;;  %v12291_v62 = vpack.c.bf16 %v10695_v44, %v10687_v39 }
 0x274   : > { %v10882_v13 = vpop.f32.mrb[32].mxu0  ;;  %v10884_v45 = vpop.f32.mrb[32].mxu1  ;;  %8266 = vmatprep.subr.bf16.mxu1 %v9625_v2 }
 0x275   : > { %v10886_v52 = vpop.f32.mrb[33].mxu0  ;;  %v10888_v6 = vpop.f32.mrb[33].mxu1  ;;  %8267 = vmatpush3.bf16.msra.mxu1 %v9626_v20  ;;  %v3850_v2 = vadd.bf16 %v10839_v40, %v12291_v62  ;;  %v9624_v20 = vld [vmem:[#allocation8 + $0x244] ss:$12 sps:$4 sm:$0xff]  }
 0x276   : > { %v10890_v16 = vpop.f32.mrb[34].mxu0  ;;  %v10892_v19 = vpop.f32.mrb[34].mxu1  ;;  %6055 = vmatpush1.bf16.msra.mxu0 %v9610_v18  ;;  %8268 = vmatprep.subr.bf16.mxu1 %v9633_v22  ;;  %v12292_v18 = vpack.c.bf16 %v10730_v60, %v10718_v7  ;;  %v9650_v60 = vld [vmem:[#allocation8 + $0x230] ss:$12 sps:$4 sm:$0xff]   ;;  %v9632_v7 = vld [vmem:[#allocation8 + $0x274] ss:$12 sps:$4 sm:$0xff]  }
 0x277   : > { %v10898_v0 = vpop.f32.mrb[35].mxu0  ;;  %v10900_v8 = vpop.f32.mrb[35].mxu1  ;;  %6056 = vmatprep.subr.bf16.mxu0 %v9616_v14  ;;  %v9642_v14 = vld [vmem:[#allocation8 + $0x218] ss:$12 sps:$4 sm:$0xff]  }
 0x278   : > { %v3863_v22 = vadd.bf16 %v10823_v43, %v12292_v18  ;;  %v9649_v18 = vld [vmem:[#allocation8 + $0x2f0] ss:$12 sps:$4 sm:$0xff]  }
 0x279   : > { %5994 = vmatmul.mubr.bf16.gmra.mrb[108].mxu0 %v3934_v49  ;;  %6666 = vmatmul.mubr.bf16.gmra.mrb[108].mxu1 %v3934_v49 }
 0x27a   : > { %6003 = vmatprep.mubr.bf16.mxu0 %v3947_v25  ;;  %6057 = vmatpush1.bf16.msra.mxu0 %v9614_v11  ;;  %v9622_v11 = vld [vmem:[#allocation8 + $0x240] ss:$12 sps:$4 sm:$0xff]   ;;  %v3959_v62 = vmax.bf16 %v12276_v61, %v3863_v22  ;;  %v12294_v22 = vpack.c.bf16 %v10757_v50, %v10745_v5  ;;  %v9635_v5 = vld [vmem:[#allocation8 + $0x288] ss:$12 sps:$4 sm:$0xff]  }
 0x27b   : > { %6673 = vmatprep.mubr.bf16.mxu1 %v3947_v25  ;;  %6058 = vmatprep.subr.bf16.mxu0 %v9621_v47  ;;  %v3946_v25 = vmax.bf16 %v12276_v61, %v3850_v2  ;;  %v12293_v2 = vpack.c.bf16 %v10722_v55, %v10714_v29 }
 0x27c   : > { %v10916_v59 = vpop.f32.mrb[36].mxu0  ;;  %v10918_v37 = vpop.f32.mrb[36].mxu1  ;;  %8269 = vmatpush3.bf16.msra.mxu1 %v9634_v30  ;;  %v9629_v30 = vld [vmem:[#allocation8 + $0x25c] ss:$12 sps:$4 sm:$0xff]  }
 0x27d   : > { %v10920_v34 = vpop.f32.mrb[37].mxu0  ;;  %v10922_v33 = vpop.f32.mrb[37].mxu1  ;;  %8270 = vmatprep.subr.bf16.mxu1 %v9641_v48 }
 0x27e   : > { %v10924_v39 = vpop.f32.mrb[38].mxu0  ;;  %v10926_v44 = vpop.f32.mrb[38].mxu1  ;;  %6059 = vmatpush1.bf16.msra.mxu0 %v9619_v56 }
 0x27f   : > { %v10932_v49 = vpop.f32.mrb[39].mxu0  ;;  %v10934_v47 = vpop.f32.mrb[39].mxu1  ;;  %6060 = vmatprep.subr.bf16.mxu0 %v9624_v20  ;;  %v3862_v20 = vadd.bf16 %v10839_v40, %v12293_v2 }
 0x280   : > { %8271 = vmatpush3.bf16.msra.mxu1 %v9642_v14  ;;  %v3875_v14 = vadd.bf16 %v10823_v43, %v12294_v22  ;;  %v3692_v22 = vcombine.high %v10813_v54, %v10813_v54  ;;  %v9640_v54 = vld [vmem:[#allocation8 + $0x2a4] ss:$12 sps:$4 sm:$0xff]  }
 0x281   : > { %6004 = vmatmul.mubr.bf16.gmra.mrb[112].mxu0 %v3946_v25  ;;  %6674 = vmatmul.mubr.bf16.gmra.mrb[112].mxu1 %v3946_v25  ;;  %v3958_v2 = vmax.bf16 %v12276_v61, %v3862_v20 }
 0x282   : > { %6013 = vmatprep.mubr.bf16.mxu0 %v3959_v62  ;;  %6061 = vmatpush1.bf16.msra.mxu0 %v9622_v11  ;;  %v3971_v50 = vmax.bf16 %v12276_v61, %v3875_v14  ;;  %v3740_v42 = vpack.i.b16 %v3692_v22, %v3692_v22 }
 0x283   : > { %6681 = vmatprep.mubr.bf16.mxu1 %v3959_v62  ;;  %6062 = vmatprep.subr.bf16.mxu0 %v9629_v30  ;;  %v9630_v30 = vld [vmem:[#allocation8 + $0x270] ss:$12 sps:$4 sm:$0xff]  }
 0x284   : > { %v10950_v56 = vpop.f32.mrb[40].mxu0  ;;  %v10952_v25 = vpop.f32.mrb[40].mxu1  ;;  %8272 = vmatprep.subr.bf16.mxu1 %v9649_v18 }
 0x285   : > { %12295 = vst [vmem:[#allocation37_spill] sm:$0xff] %v10952_v25  ;;  %v10954_v11 = vpop.f32.mrb[41].mxu0  ;;  %v10956_v48 = vpop.f32.mrb[41].mxu1  ;;  %8273 = vmatpush3.bf16.msra.mxu1 %v9650_v60  ;;  %v9637_v60 = vld [vmem:[#allocation8 + $0x28c] ss:$12 sps:$4 sm:$0xff]  }
 0x286   : > { %12296 = vst [vmem:[#allocation38_spill] sm:$0xff] %v10956_v48  ;;  %v10958_v55 = vpop.f32.mrb[42].mxu0  ;;  %v10960_v29 = vpop.f32.mrb[42].mxu1  ;;  %6063 = vmatpush1.bf16.msra.mxu0 %v9627_v12  ;;  %8322 = vmatprep.subr.bf16.mxu1 %v9657_v28  ;;  %v12300_v12 = vpack.c.bf16 %v10784_v58, %v10772_v21  ;;  %v9643_v58 = vld [vmem:[#allocation8 + $0x2b8] ss:$12 sps:$4 sm:$0xff]  }
 0x287   : > { %12297 = vst [vmem:[#allocation39_spill] sm:$0xff] %v10960_v29  ;;  %v10966_v62 = vpop.f32.mrb[43].mxu0  ;;  %v10968_v18 = vpop.f32.mrb[43].mxu1  ;;  %6064 = vmatprep.subr.bf16.mxu0 %v9632_v7  ;;  %v12299_v7 = vpack.c.bf16 %v10749_v24, %v10740_v36  ;;  %v9674_v25 = vld [vmem:[#allocation8 + $0x338] ss:$12 sps:$4 sm:$0xff]  }
 0x288   : > { %12298 = vst [vmem:[#allocation40_spill] sm:$0xff] %v10968_v18  ;;  %v3887_v28 = vadd.bf16 %v10823_v43, %v12300_v12 }
 0x289   : > { %6014 = vmatmul.mubr.bf16.gmra.mrb[116].mxu0 %v3958_v2  ;;  %6682 = vmatmul.mubr.bf16.gmra.mrb[116].mxu1 %v3958_v2  ;;  %v3874_v20 = vadd.bf16 %v10839_v40, %v12299_v7  ;;  %v9645_v7 = vld [vmem:[#allocation8 + $0x2bc] ss:$12 sps:$4 sm:$0xff]  }
 0x28a   : > { %6023 = vmatprep.mubr.bf16.mxu0 %v3971_v50  ;;  %6065 = vmatpush1.bf16.msra.mxu0 %v9630_v30  ;;  %v3983_v15 = vmax.bf16 %v12276_v61, %v3887_v28 }
 0x28b   : > { %6689 = vmatprep.mubr.bf16.mxu1 %v3971_v50  ;;  %6066 = vmatprep.subr.bf16.mxu0 %v9637_v60  ;;  %v9638_v50 = vld [vmem:[#allocation8 + $0x2a0] ss:$12 sps:$4 sm:$0xff]   ;;  %v3690_v60 = vcombine.high %v10826_v3, %v10826_v3  ;;  %v3970_v12 = vmax.bf16 %v12276_v61, %v3874_v20  ;;  %v12305_v20 = vpack.c.bf16 %v10776_v41, %v10768_v23  ;;  %v9646_v41 = vld [vmem:[#allocation8 + $0x2d0] ss:$12 sps:$4 sm:$0xff]  }
 0x28c   : > { %v10986_v14 = vpop.f32.mrb[44].mxu0  ;;  %v10988_v2 = vpop.f32.mrb[44].mxu1  ;;  %v12306_v3 = vpack.c.bf16 %v10601_v35, %v10589_v27  ;;  %v9651_v35 = vld [vmem:[#allocation8 + $0x2e8] ss:$12 sps:$4 sm:$0xff]   ;;  %v12311_v27 = vpack.c.bf16 %v10593_v31, %v10585_v26  ;;  %v9654_v31 = vld [vmem:[#allocation8 + $0x300] ss:$12 sps:$4 sm:$0xff]  }
 0x28d   : > { %12301 = vst [vmem:[#allocation41_spill] sm:$0xff] %v10988_v2  ;;  %v10990_v30 = vpop.f32.mrb[45].mxu0  ;;  %v10992_v32 = vpop.f32.mrb[45].mxu1  ;;  %v3733_v2 = vpack.i.b16 %v3690_v60, %v3690_v60 }
 0x28e   : > { %12302 = vst [vmem:[#allocation42_spill] sm:$0xff] %v10992_v32  ;;  %v10994_v36 = vpop.f32.mrb[46].mxu0  ;;  %v10996_v24 = vpop.f32.mrb[46].mxu1  ;;  %6067 = vmatpush1.bf16.msra.mxu0 %v9635_v5  ;;  %v11010_v5 = vrot.slane %v3740_v42, %v10818_v38  ;;  %v3886_v42 = vadd.bf16 %v10839_v40, %v12305_v20  ;;  %v9653_v20 = vld [vmem:[#allocation8 + $0x2ec] ss:$12 sps:$4 sm:$0xff]  }
 0x28f   : > { %12303 = vst [vmem:[#allocation43_spill] sm:$0xff] %v10996_v24  ;;  %v11004_v43 = vpop.f32.mrb[47].mxu0  ;;  %v11006_v22 = vpop.f32.mrb[47].mxu1  ;;  %6068 = vmatprep.subr.bf16.mxu0 %v9640_v54  ;;  %v9648_v54 = vld [vmem:[#allocation8 + $0x2d4] ss:$12 sps:$4 sm:$0xff]  }
 0x290   : > { %12304 = vst [vmem:[#allocation44_spill] sm:$0xff] %v11006_v22  ;;  %v3805_v21 = vadd.bf16 %v11010_v5, %v12306_v3  ;;  %v3982_v3 = vmax.bf16 %v12276_v61, %v3886_v42  ;;  %v9665_v22 = vld [vmem:[#allocation8 + $0x3e0] ss:$12 sps:$4 sm:$0xff]  }
 0x291   : > { %6024 = vmatmul.mubr.bf16.gmra.mrb[120].mxu0 %v3970_v12  ;;  %6690 = vmatmul.mubr.bf16.gmra.mrb[120].mxu1 %v3970_v12 }
 0x292   : > { %6033 = vmatprep.mubr.bf16.mxu0 %v3983_v15  ;;  %6069 = vmatpush1.bf16.msra.mxu0 %v9638_v50  ;;  %v3901_v32 = vmax.bf16 %v12276_v61, %v3805_v21 }
 0x293   : > { %6697 = vmatprep.mubr.bf16.mxu1 %v3983_v15  ;;  %6070 = vmatprep.subr.bf16.mxu0 %v9645_v7  ;;  %v11038_v15 = vrot.slane %v3733_v2, %v10818_v38 }
 0x294   : > { %v11025_v28 = vpop.f32.mrb[48].mxu0  ;;  %v11027_v12 = vpop.f32.mrb[48].mxu1 }
 0x295   : > { %12307 = vst [vmem:[#allocation45_spill] sm:$0xff] %v11027_v12  ;;  %v11029_v50 = vpop.f32.mrb[49].mxu0  ;;  %v11031_v60 = vpop.f32.mrb[49].mxu1  ;;  %v3804_v42 = vadd.bf16 %v11038_v15, %v12311_v27 }
 0x296   : > { %12308 = vst [vmem:[#allocation46_spill] sm:$0xff] %v11031_v60  ;;  %v11033_v24 = vpop.f32.mrb[50].mxu0  ;;  %v11035_v23 = vpop.f32.mrb[50].mxu1  ;;  %6071 = vmatpush1.bf16.msra.mxu0 %v9643_v58  ;;  %v12312_v58 = vpack.c.bf16 %v10627_v57, %v10615_v51  ;;  %v9659_v57 = vld [vmem:[#allocation8 + $0x318] ss:$12 sps:$4 sm:$0xff]   ;;  %v12317_v51 = vpack.c.bf16 %v10619_v53, %v10611_v46 }
 0x297   : > { %12309 = vst [vmem:[#allocation47_spill] sm:$0xff] %v11035_v23  ;;  %v11044_v40 = vpop.f32.mrb[51].mxu0  ;;  %v11046_v7 = vpop.f32.mrb[51].mxu1  ;;  %6072 = vmatprep.subr.bf16.mxu0 %v9648_v54  ;;  %v9656_v54 = vld [vmem:[#allocation8 + $0x304] ss:$12 sps:$4 sm:$0xff]  }
 0x298   : > { %12310 = vst [vmem:[#allocation48_spill] sm:$0xff] %v11046_v7  ;;  %v3817_v2 = vadd.bf16 %v11010_v5, %v12312_v58  ;;  %v9658_v58 = vld [vmem:[#allocation8 + $0x308] ss:$12 sps:$4 sm:$0xff]  }
 0x299   : > { %6034 = vmatmul.mubr.bf16.gmra.mrb[124].mxu0 %v3982_v3  ;;  %6698 = vmatmul.mubr.bf16.gmra.mrb[124].mxu1 %v3982_v3  ;;  %v9661_v7 = vld [vmem:[#allocation8 + $0x31c] ss:$12 sps:$4 sm:$0xff]   ;;  %v9664_v60 = vld [vmem:[#allocation8 + $0x334] ss:$12 sps:$4 sm:$0xff]  }
 0x29a   : > { %6073 = vmatpush1.bf16.msra.mxu0 %v9646_v41  ;;  %6076 = vmatprep.mubr.bf16.mxu0 %v3901_v32 }
 0x29b   : > { %6738 = vmatprep.mubr.bf16.mxu1 %v3901_v32  ;;  %6074 = vmatprep.subr.bf16.mxu0 %v9653_v20  ;;  %v3900_v32 = vmax.bf16 %v12276_v61, %v3804_v42  ;;  %v3913_v42 = vmax.bf16 %v12276_v61, %v3817_v2 }
 0x29c   : > { %v11062_v12 = vpop.f32.mrb[52].mxu0  ;;  %v11064_v21 = vpop.f32.mrb[52].mxu1 }
 0x29d   : > { %12313 = vst [vmem:[#allocation49_spill] sm:$0xff] %v11064_v21  ;;  %v11066_v41 = vpop.f32.mrb[53].mxu0  ;;  %v11068_v3 = vpop.f32.mrb[53].mxu1  ;;  %v9666_v21 = vld [vmem:[#allocation8 + $0x320] ss:$12 sps:$4 sm:$0xff]  }
 0x29e   : > { %12314 = vst [vmem:[#allocation50_spill] sm:$0xff] %v11068_v3  ;;  %v11070_v23 = vpop.f32.mrb[54].mxu0  ;;  %v11072_v26 = vpop.f32.mrb[54].mxu1  ;;  %6075 = vmatpush1.bf16.msra.mxu0 %v9651_v35  ;;  %v12318_v35 = vpack.c.bf16 %v10653_v9, %v10641_v1  ;;  %v9681_v9 = vld [vmem:[#allocation8 + $0x410] ss:$12 sps:$4 sm:$0xff]  }
 0x29f   : > { %12315 = vst [vmem:[#allocation51_spill] sm:$0xff] %v11072_v26  ;;  %v11079_v27 = vpop.f32.mrb[55].mxu0  ;;  %v11081_v20 = vpop.f32.mrb[55].mxu1  ;;  %6157 = vmatprep.subr.bf16.mxu0 %v9656_v54  ;;  %v3816_v54 = vadd.bf16 %v11038_v15, %v12317_v51 }
 0x2a0   : > { %12316 = vst [vmem:[#allocation52_spill] sm:$0xff] %v11081_v20  ;;  %v3829_v2 = vadd.bf16 %v11010_v5, %v12318_v35  ;;  %v12324_v20 = vld [vmem:[#allocation19_spill] sm:$0xff] }
 0x2a1   : > { %6077 = vmatmul.mubr.bf16.vlgmr.msra.gmra.mrb[96].mxu0 %v3900_v32  ;;  %6739 = vmatmul.mubr.bf16.vlgmr.msra.gmra.mrb[128].mxu1 %v3900_v32 }
 0x2a2   : > { %6086 = vmatprep.mubr.bf16.mxu0 %v3913_v42  ;;  %6158 = vmatpush1.bf16.msra.mxu0 %v9654_v31  ;;  %v9673_v31 = vld [vmem:[#allocation8 + $0x3f8] ss:$12 sps:$4 sm:$0xff]   ;;  %v3925_v1 = vmax.bf16 %v12276_v61, %v3829_v2 }
 0x2a3   : > { %6746 = vmatprep.mubr.bf16.mxu1 %v3913_v42  ;;  %8323 = vmatpush3.bf16.msra.mxu1 %v9658_v58  ;;  %v9662_v58 = vld [vmem:[#allocation8 + $0x330] ss:$12 sps:$4 sm:$0xff]   ;;  %v9669_v42 = vld [vmem:[#allocation8 + $0x34c] ss:$12 sps:$4 sm:$0xff]  }
 0x2a4   : > { %v11096_v26 = vpop.f32.mrb[56].mxu0  ;;  %v11098_v32 = vpop.f32.mrb[56].mxu1  ;;  %6159 = vmatprep.subr.bf16.mxu0 %v9661_v7  ;;  %8324 = vmatprep.subr.bf16.mxu1 %v9665_v22  ;;  %v3912_v7 = vmax.bf16 %v12276_v61, %v3816_v54  ;;  %v9672_v54 = vld [vmem:[#allocation8 + $0x364] ss:$12 sps:$4 sm:$0xff]  }
 0x2a5   : > { %12319 = vst [vmem:[#allocation53_spill] sm:$0xff] %v11098_v32  ;;  %v11100_v3 = vpop.f32.mrb[57].mxu0  ;;  %v11102_v46 = vpop.f32.mrb[57].mxu1  ;;  %v9667_v32 = vld [vmem:[#allocation8 + $0x348] ss:$12 sps:$4 sm:$0xff]  }
 0x2a6   : > { %12320 = vst [vmem:[#allocation54_spill] sm:$0xff] %v11102_v46  ;;  %v11104_v53 = vpop.f32.mrb[58].mxu0  ;;  %v11106_v51 = vpop.f32.mrb[58].mxu1  ;;  %6160 = vmatpush1.bf16.msra.mxu0 %v9659_v57  ;;  %v12325_v57 = vld [vmem:[#allocation17_spill] sm:$0xff] }
 0x2a7   : > { %12321 = vst [vmem:[#allocation55_spill] sm:$0xff] %v11106_v51  ;;  %v11112_v35 = vpop.f32.mrb[59].mxu0  ;;  %v11114_v22 = vpop.f32.mrb[59].mxu1  ;;  %6161 = vmatprep.subr.bf16.mxu0 %v9664_v60  ;;  %8325 = vmatpush3.bf16.msra.mxu1 %v9666_v21  ;;  %v12323_v60 = vpack.c.bf16 %v10645_v4, %v10637_v63  ;;  %v12326_v51 = vpack.c.bf16 %v12324_v20, %v12325_v57  ;;  %v9689_v20 = vld [vmem:[#allocation8 + $0x428] ss:$12 sps:$4 sm:$0xff]  }
 0x2a8   : > { %12322 = vst [vmem:[#allocation56_spill] sm:$0xff] %v11114_v22  ;;  %8326 = vmatprep.subr.bf16.mxu1 %v9673_v31 }
 0x2a9   : > { %6087 = vmatmul.mubr.bf16.gmra.mrb[100].mxu0 %v3912_v7  ;;  %6747 = vmatmul.mubr.bf16.gmra.mrb[132].mxu1 %v3912_v7  ;;  %v3828_v21 = vadd.bf16 %v11038_v15, %v12323_v60  ;;  %v3841_v2 = vadd.bf16 %v11010_v5, %v12326_v51  ;;  %v9690_v51 = vld [vmem:[#allocation8 + $0x368] ss:$12 sps:$4 sm:$0xff]  }
 0x2aa   : > { %6096 = vmatprep.mubr.bf16.mxu0 %v3925_v1  ;;  %6162 = vmatpush1.bf16.msra.mxu0 %v9662_v58  ;;  %v9682_v58 = vld [vmem:[#allocation8 + $0x350] ss:$12 sps:$4 sm:$0xff]   ;;  %v9680_v60 = vld [vmem:[#allocation8 + $0x394] ss:$12 sps:$4 sm:$0xff]  }
 0x2ab   : > { %6754 = vmatprep.mubr.bf16.mxu1 %v3925_v1  ;;  %6163 = vmatprep.subr.bf16.mxu0 %v9669_v42  ;;  %v9670_v1 = vld [vmem:[#allocation8 + $0x360] ss:$12 sps:$4 sm:$0xff]   ;;  %v3924_v57 = vmax.bf16 %v12276_v61, %v3828_v21  ;;  %v3937_v29 = vmax.bf16 %v12276_v61, %v3841_v2  ;;  %v12331_v21 = vld [vmem:[#allocation18_spill] sm:$0xff] }
 0x2ac   : > { %v11130_v31 = vpop.f32.mrb[60].mxu0  ;;  %v11132_v7 = vpop.f32.mrb[60].mxu1  ;;  %8327 = vmatpush3.bf16.msra.mxu1 %v9674_v25 }
 0x2ad   : > { %12327 = vst [vmem:[#allocation19_spill] sm:$0xff] %v11132_v7  ;;  %v11134_v46 = vpop.f32.mrb[61].mxu0  ;;  %v11136_v22 = vpop.f32.mrb[61].mxu1  ;;  %8328 = vmatprep.subr.bf16.mxu1 %v9681_v9  ;;  %v9677_v9 = vld [vmem:[#allocation8 + $0x37c] ss:$12 sps:$4 sm:$0xff]  }
 0x2ae   : > { %12328 = vst [vmem:[#allocation17_spill] sm:$0xff] %v11136_v22  ;;  %v11138_v63 = vpop.f32.mrb[62].mxu0  ;;  %v11140_v4 = vpop.f32.mrb[62].mxu1  ;;  %6164 = vmatpush1.bf16.msra.mxu0 %v9667_v32  ;;  %v9675_v7 = vld [vmem:[#allocation8 + $0x378] ss:$12 sps:$4 sm:$0xff]   ;;  %v12334_v32 = vld [vmem:[#allocation23_spill] sm:$0xff] }
 0x2af   : > { %12329 = vst [vmem:[#allocation57_spill] sm:$0xff] %v11140_v4  ;;  %v11146_v42 = vpop.f32.mrb[63].mxu0  ;;  %v11148_v25 = vpop.f32.mrb[63].mxu1  ;;  %6165 = vmatprep.subr.bf16.mxu0 %v9672_v54  ;;  %v9697_v4 = vld [vmem:[#allocation8 + $0x440] ss:$12 sps:$4 sm:$0xff]   ;;  %v12332_v54 = vld [vmem:[#allocation16_spill] sm:$0xff] }
 0x2b0   : > { %12330 = vst [vmem:[#allocation58_spill] sm:$0xff] %v11148_v25  ;;  %8329 = vmatpush3.bf16.msra.mxu1 %v9682_v58  ;;  %v12333_v48 = vpack.c.bf16 %v12331_v21, %v12332_v54  ;;  %v12335_v22 = vld [vmem:[#allocation21_spill] sm:$0xff] }
 0x2b1   : > { %6097 = vmatmul.mubr.bf16.gmra.mrb[104].mxu0 %v3924_v57  ;;  %6755 = vmatmul.mubr.bf16.gmra.mrb[136].mxu1 %v3924_v57  ;;  %v12336_v2 = vpack.c.bf16 %v12334_v32, %v12335_v22  ;;  %v9678_v57 = vld [vmem:[#allocation8 + $0x390] ss:$12 sps:$4 sm:$0xff]   ;;  %v9685_v25 = vld [vmem:[#allocation8 + $0x3ac] ss:$12 sps:$4 sm:$0xff]   ;;  %v9683_v22 = vld [vmem:[#allocation8 + $0x3a8] ss:$12 sps:$4 sm:$0xff]  }
 0x2b2   : > { %6106 = vmatprep.mubr.bf16.mxu0 %v3937_v29  ;;  %6166 = vmatpush1.bf16.msra.mxu0 %v9670_v1  ;;  %v3840_v18 = vadd.bf16 %v11038_v15, %v12333_v48  ;;  %v9698_v48 = vld [vmem:[#allocation8 + $0x380] ss:$12 sps:$4 sm:$0xff]   ;;  %v12338_v32 = vld [vmem:[#allocation20_spill] sm:$0xff] }
 0x2b3   : > { %6762 = vmatprep.mubr.bf16.mxu1 %v3937_v29  ;;  %6167 = vmatprep.subr.bf16.mxu0 %v9677_v9  ;;  %v3853_v58 = vadd.bf16 %v11010_v5, %v12336_v2  ;;  %v9705_v29 = vld [vmem:[#allocation8 + $0x458] ss:$12 sps:$4 sm:$0xff]  }
 0x2b4   : > { %8330 = vmatprep.subr.bf16.mxu1 %v9689_v20  ;;  %v3936_v1 = vmax.bf16 %v12276_v61, %v3840_v18  ;;  %v12337_v9 = vld [vmem:[#allocation22_spill] sm:$0xff]  ;;  %v12340_v18 = vld [vmem:[#allocation27_spill] sm:$0xff] }
 0x2b5   : > { %8331 = vmatpush3.bf16.msra.mxu1 %v9690_v51  ;;  %v3949_v21 = vmax.bf16 %v12276_v61, %v3853_v58  ;;  %v12339_v20 = vpack.c.bf16 %v12337_v9, %v12338_v32  ;;  %v12341_v51 = vld [vmem:[#allocation25_spill] sm:$0xff]  ;;  %v9706_v2 = vld [vmem:[#allocation8 + $0x398] ss:$12 sps:$4 sm:$0xff]   ;;  %v3645_v58 = vcombine.high %v10803_v17, %v10803_v17  ;;  %v9693_v9 = vld [vmem:[#allocation8 + $0x3dc] ss:$12 sps:$4 sm:$0xff]  }
 0x2b6   : > { %6168 = vmatpush1.bf16.msra.mxu0 %v9675_v7  ;;  %8332 = vmatprep.subr.bf16.mxu1 %v9697_v4  ;;  %v9688_v4 = vld [vmem:[#allocation8 + $0x3c4] ss:$12 sps:$4 sm:$0xff]   ;;  %v12343_v17 = vld [vmem:[#allocation26_spill] sm:$0xff] }
 0x2b7   : > { %6169 = vmatprep.subr.bf16.mxu0 %v9680_v60  ;;  %v3852_v7 = vadd.bf16 %v11038_v15, %v12339_v20  ;;  %v12342_v60 = vpack.c.bf16 %v12340_v18, %v12341_v51  ;;  %v9714_v32 = vld [vmem:[#allocation8 + $0x3b0] ss:$12 sps:$4 sm:$0xff]   ;;  %v9721_v20 = vld [vmem:[#allocation8 + $0x548] ss:$12 sps:$4 sm:$0xff]  }
 0x2b8   : > { %v12346_v51 = vld [vmem:[#allocation31_spill] sm:$0xff] }
 0x2b9   : > { %6107 = vmatmul.mubr.bf16.gmra.mrb[108].mxu0 %v3936_v1  ;;  %6763 = vmatmul.mubr.bf16.gmra.mrb[140].mxu1 %v3936_v1  ;;  %v3865_v54 = vadd.bf16 %v11010_v5, %v12342_v60  ;;  %v3948_v1 = vmax.bf16 %v12276_v61, %v3852_v7  ;;  %v12347_v60 = vld [vmem:[#allocation29_spill] sm:$0xff] }
 0x2ba   : > { %6116 = vmatprep.mubr.bf16.mxu0 %v3949_v21  ;;  %6170 = vmatpush1.bf16.msra.mxu0 %v9678_v57  ;;  %v9686_v57 = vld [vmem:[#allocation8 + $0x3c0] ss:$12 sps:$4 sm:$0xff]  }
 0x2bb   : > { %6770 = vmatprep.mubr.bf16.mxu1 %v3949_v21  ;;  %6171 = vmatprep.subr.bf16.mxu0 %v9685_v25  ;;  %v3961_v25 = vmax.bf16 %v12276_v61, %v3865_v54  ;;  %v9713_v21 = vld [vmem:[#allocation8 + $0x470] ss:$12 sps:$4 sm:$0xff]   ;;  %v12348_v54 = vpack.c.bf16 %v12346_v51, %v12347_v60 }
 0x2bc   : > { %8333 = vmatpush3.bf16.msra.mxu1 %v9698_v48  ;;  %v3659_v48 = vrot.slane %v3645_v58, %v10801_v10 }
 0x2bd   : > { %8334 = vmatprep.subr.bf16.mxu1 %v9705_v29  ;;  %v9691_v29 = vld [vmem:[#allocation8 + $0x3d8] ss:$12 sps:$4 sm:$0xff]  }
 0x2be   : > { %6172 = vmatpush1.bf16.msra.mxu0 %v9683_v22  ;;  %v12344_v22 = vld [vmem:[#allocation24_spill] sm:$0xff]  ;;  %v3661_v58 = vcombine.high %v3659_v48, %v3659_v48 }
 0x2bf   : > { %6173 = vmatprep.subr.bf16.mxu0 %v9688_v4  ;;  %v12345_v18 = vpack.c.bf16 %v12343_v17, %v12344_v22  ;;  %v9696_v4 = vld [vmem:[#allocation8 + $0x3f4] ss:$12 sps:$4 sm:$0xff]   ;;  %v9701_v17 = vld [vmem:[#allocation8 + $0x40c] ss:$12 sps:$4 sm:$0xff]  }
 0x2c0   : > { %8335 = vmatpush3.bf16.msra.mxu1 %v9706_v2  ;;  %v3877_v2 = vadd.bf16 %v11010_v5, %v12348_v54 }
 0x2c1   : > { %6117 = vmatmul.mubr.bf16.gmra.mrb[112].mxu0 %v3948_v1  ;;  %6771 = vmatmul.mubr.bf16.gmra.mrb[144].mxu1 %v3948_v1  ;;  %v3864_v7 = vadd.bf16 %v11038_v15, %v12345_v18 }
 0x2c2   : > { %6126 = vmatprep.mubr.bf16.mxu0 %v3961_v25  ;;  %6174 = vmatpush1.bf16.msra.mxu0 %v9686_v57  ;;  %v9694_v57 = vld [vmem:[#allocation8 + $0x3f0] ss:$12 sps:$4 sm:$0xff]   ;;  %v3973_v22 = vmax.bf16 %v12276_v61, %v3877_v2  ;;  %v9702_v2 = vld [vmem:[#allocation8 + $0x420] ss:$12 sps:$4 sm:$0xff]  }
 0x2c3   : > { %6778 = vmatprep.mubr.bf16.mxu1 %v3961_v25  ;;  %6175 = vmatprep.subr.bf16.mxu0 %v9693_v9  ;;  %v3960_v1 = vmax.bf16 %v12276_v61, %v3864_v7  ;;  %v11190_v9 = vrot.slane %v3661_v58, %v10801_v10  ;;  %v9699_v25 = vld [vmem:[#allocation8 + $0x408] ss:$12 sps:$4 sm:$0xff]   ;;  %v12352_v7 = vld [vmem:[#allocation35_spill] sm:$0xff] }
 0x2c4   : > { %8336 = vmatprep.subr.bf16.mxu1 %v9713_v21  ;;  %v12349_v21 = vld [vmem:[#allocation30_spill] sm:$0xff] }
 0x2c5   : > { %8337 = vmatpush3.bf16.msra.mxu1 %v9714_v32  ;;  %v12350_v32 = vld [vmem:[#allocation28_spill] sm:$0xff]  ;;  %v3754_v54 = vpack.i.b16 %v11190_v9, %v11190_v9 }
 0x2c6   : > { %6176 = vmatpush1.bf16.msra.mxu0 %v9691_v29  ;;  %8386 = vmatprep.subr.bf16.mxu1 %v9721_v20  ;;  %v12351_v18 = vpack.c.bf16 %v12349_v21, %v12350_v32  ;;  %v9704_v20 = vld [vmem:[#allocation8 + $0x424] ss:$12 sps:$4 sm:$0xff]   ;;  %v12355_v21 = vld [vmem:[#allocation34_spill] sm:$0xff] }
 0x2c7   : > { %6177 = vmatprep.subr.bf16.mxu0 %v9696_v4  ;;  %v12353_v4 = vld [vmem:[#allocation33_spill] sm:$0xff] }
 0x2c8   : > { %v3876_v29 = vadd.bf16 %v11038_v15, %v12351_v18  ;;  %v12354_v51 = vpack.c.bf16 %v12352_v7, %v12353_v4  ;;  %v9710_v4 = vld [vmem:[#allocation8 + $0x450] ss:$12 sps:$4 sm:$0xff]  }
 0x2c9   : > { %6127 = vmatmul.mubr.bf16.gmra.mrb[116].mxu0 %v3960_v1  ;;  %6779 = vmatmul.mubr.bf16.gmra.mrb[148].mxu1 %v3960_v1  ;;  %v11204_v1 = vrot.slane %v3754_v54, %v10818_v38 }
 0x2ca   : > { %6136 = vmatprep.mubr.bf16.mxu0 %v3973_v22  ;;  %6178 = vmatpush1.bf16.msra.mxu0 %v9694_v57  ;;  %v3889_v60 = vadd.bf16 %v11010_v5, %v12354_v51  ;;  %v3972_v58 = vmax.bf16 %v12276_v61, %v3876_v29  ;;  %v9709_v57 = vld [vmem:[#allocation8 + $0x43c] ss:$12 sps:$4 sm:$0xff]   ;;  %v9707_v5 = vld [vmem:[#allocation8 + $0x438] ss:$12 sps:$4 sm:$0xff]  }
 0x2cb   : > { %6786 = vmatprep.mubr.bf16.mxu1 %v3973_v22  ;;  %6179 = vmatprep.subr.bf16.mxu0 %v9701_v17  ;;  %v11208_v22 = vrot.slane %v3659_v48, %v10801_v10  ;;  %v12358_v48 = vpack.c.bf16 %v10898_v0, %v10886_v52  ;;  %v12359_v52 = vpack.c.bf16 %v10890_v16, %v10882_v13  ;;  %v9729_v13 = vld [vmem:[#allocation8 + $0x560] ss:$12 sps:$4 sm:$0xff]   ;;  %v9723_v16 = vld [vmem:[#allocation8 + $0x498] ss:$12 sps:$4 sm:$0xff]  }
 0x2cc   : > { %v3985_v17 = vmax.bf16 %v12276_v61, %v3889_v60 }
 0x2cd   : > { %v3747_v29 = vpack.i.b16 %v11208_v22, %v11208_v22  ;;  %v3807_v7 = vadd.bf16 %v11204_v1, %v12358_v48  ;;  %v12362_v48 = vpack.c.bf16 %v10966_v62, %v10954_v11  ;;  %v9731_v11 = vld [vmem:[#allocation8 + $0x4c8] ss:$12 sps:$4 sm:$0xff]   ;;  %v12363_v62 = vpack.c.bf16 %v10958_v55, %v10950_v56 }
 0x2ce   : > { %6180 = vmatpush1.bf16.msra.mxu0 %v9699_v25  ;;  %v12356_v25 = vld [vmem:[#allocation32_spill] sm:$0xff] }
 0x2cf   : > { %6181 = vmatprep.subr.bf16.mxu0 %v9704_v20  ;;  %v12357_v32 = vpack.c.bf16 %v12355_v21, %v12356_v25  ;;  %v9712_v20 = vld [vmem:[#allocation8 + $0x454] ss:$12 sps:$4 sm:$0xff]   ;;  %v11221_v51 = vrot.slane %v3747_v29, %v10818_v38  ;;  %v3903_v54 = vmax.bf16 %v12276_v61, %v3807_v7  ;;  %v3831_v7 = vadd.bf16 %v11204_v1, %v12362_v48 }
 0x2d0   : > { %v9722_v25 = vld [vmem:[#allocation8 + $0x488] ss:$12 sps:$4 sm:$0xff]  }
 0x2d1   : > { %6137 = vmatmul.mubr.bf16.gmra.mrb[120].mxu0 %v3972_v58  ;;  %6787 = vmatmul.mubr.bf16.gmra.mrb[152].mxu1 %v3972_v58  ;;  %v3888_v18 = vadd.bf16 %v11038_v15, %v12357_v32  ;;  %v9717_v15 = vld [vmem:[#allocation8 + $0x46c] ss:$12 sps:$4 sm:$0xff]   ;;  %v3806_v0 = vadd.bf16 %v11221_v51, %v12359_v52  ;;  %v9720_v58 = vld [vmem:[#allocation8 + $0x484] ss:$12 sps:$4 sm:$0xff]   ;;  %v9728_v29 = vld [vmem:[#allocation8 + $0x4b4] ss:$12 sps:$4 sm:$0xff]   ;;  %v3830_v52 = vadd.bf16 %v11221_v51, %v12363_v62 }
 0x2d2   : > { %6146 = vmatprep.mubr.bf16.mxu0 %v3985_v17  ;;  %6182 = vmatpush1.bf16.msra.mxu0 %v9702_v2  ;;  %v9715_v2 = vld [vmem:[#allocation8 + $0x468] ss:$12 sps:$4 sm:$0xff]   ;;  %v9762_v62 = vld [vmem:[#allocation8 + $0x500] ss:$12 sps:$4 sm:$0xff]  }
 0x2d3   : > { %6794 = vmatprep.mubr.bf16.mxu1 %v3985_v17  ;;  %6183 = vmatprep.subr.bf16.mxu0 %v9709_v57  ;;  %v3984_v60 = vmax.bf16 %v12276_v61, %v3888_v18  ;;  %v12360_v57 = vpack.c.bf16 %v10932_v49, %v10920_v34  ;;  %v3902_v21 = vmax.bf16 %v12276_v61, %v3806_v0  ;;  %v9725_v18 = vld [vmem:[#allocation8 + $0x49c] ss:$12 sps:$4 sm:$0xff]   ;;  %v9736_v0 = vld [vmem:[#allocation8 + $0x4e4] ss:$12 sps:$4 sm:$0xff]  }
 0x2d4   : > { %v12361_v34 = vpack.c.bf16 %v10924_v39, %v10916_v59  ;;  %v9733_v59 = vld [vmem:[#allocation8 + $0x4cc] ss:$12 sps:$4 sm:$0xff]   ;;  %v3927_v39 = vmax.bf16 %v12276_v61, %v3831_v7  ;;  %v9753_v55 = vld [vmem:[#allocation8 + $0x5a8] ss:$12 sps:$4 sm:$0xff]  }
 0x2d5   : > { %v3819_v17 = vadd.bf16 %v11204_v1, %v12360_v57 }
 0x2d6   : > { %6184 = vmatpush1.bf16.msra.mxu0 %v9707_v5  ;;  %v9718_v5 = vld [vmem:[#allocation8 + $0x480] ss:$12 sps:$4 sm:$0xff]   ;;  %v3818_v49 = vadd.bf16 %v11221_v51, %v12361_v34  ;;  %v12366_v34 = vpack.c.bf16 %v11044_v40, %v11029_v50  ;;  %v12382_v40 = vpack.c.bf16 %v11146_v42, %v11134_v46  ;;  %v9771_v42 = vld [vmem:[#allocation8 + $0x5b8] ss:$12 sps:$4 sm:$0xff]  }
 0x2d7   : > { %6185 = vmatprep.subr.bf16.mxu0 %v9712_v20  ;;  %v3915_v32 = vmax.bf16 %v12276_v61, %v3819_v17  ;;  %v9730_v20 = vld [vmem:[#allocation8 + $0x4a0] ss:$12 sps:$4 sm:$0xff]   ;;  %v9746_v17 = vld [vmem:[#allocation8 + $0x4d0] ss:$12 sps:$4 sm:$0xff]  }
 0x2d9   : > { %6147 = vmatmul.mubr.bf16.gmra.mrb[124].mxu0 %v3984_v60  ;;  %6795 = vmatmul.mubr.bf16.gmra.mrb[156].mxu1 %v3984_v60  ;;  %v9726_v60 = vld [vmem:[#allocation8 + $0x4b0] ss:$12 sps:$4 sm:$0xff]  }
 0x2da   : > { %6186 = vmatpush1.bf16.msra.mxu0 %v9710_v4  ;;  %6189 = vmatprep.mubr.bf16.mxu0 %v3903_v54  ;;  %v9737_v4 = vld [vmem:[#allocation8 + $0x578] ss:$12 sps:$4 sm:$0xff]  }
 0x2db   : > { %6835 = vmatprep.mubr.bf16.mxu1 %v3903_v54  ;;  %6187 = vmatprep.subr.bf16.mxu0 %v9717_v15  ;;  %v3914_v15 = vmax.bf16 %v12276_v61, %v3818_v49  ;;  %v9738_v54 = vld [vmem:[#allocation8 + $0x4b8] ss:$12 sps:$4 sm:$0xff]   ;;  %v3855_v49 = vadd.bf16 %v11204_v1, %v12366_v34  ;;  %v9757_v34 = vld [vmem:[#allocation8 + $0x55c] ss:$12 sps:$4 sm:$0xff]  }
 0x2de   : > { %6188 = vmatpush1.bf16.msra.mxu0 %v9715_v2  ;;  %v9745_v2 = vld [vmem:[#allocation8 + $0x590] ss:$12 sps:$4 sm:$0xff]  }
 0x2df   : > { %6270 = vmatprep.subr.bf16.mxu0 %v9720_v58  ;;  %v12364_v58 = vpack.c.bf16 %v11004_v43, %v10990_v30  ;;  %v9739_v30 = vld [vmem:[#allocation8 + $0x4f8] ss:$12 sps:$4 sm:$0xff]   ;;  %v9761_v43 = vld [vmem:[#allocation8 + $0x5c0] ss:$12 sps:$4 sm:$0xff]  }
 0x2e1   : > { %6190 = vmatmul.mubr.bf16.vlgmr.msra.gmra.mrb[96].mxu0 %v3902_v21  ;;  %6836 = vmatmul.mubr.bf16.vlgmr.msra.gmra.mrb[160].mxu1 %v3902_v21  ;;  %v3843_v57 = vadd.bf16 %v11204_v1, %v12364_v58  ;;  %v3926_v21 = vmax.bf16 %v12276_v61, %v3830_v52  ;;  %v9769_v52 = vld [vmem:[#allocation8 + $0x5d8] ss:$12 sps:$4 sm:$0xff]   ;;  %v12369_v58 = vpack.c.bf16 %v11033_v24, %v11025_v28 }
 0x2e2   : > { %6199 = vmatprep.mubr.bf16.mxu0 %v3915_v32  ;;  %6271 = vmatpush1.bf16.msra.mxu0 %v9718_v5  ;;  %v9734_v5 = vld [vmem:[#allocation8 + $0x4e0] ss:$12 sps:$4 sm:$0xff]  }
 0x2e3   : > { %6843 = vmatprep.mubr.bf16.mxu1 %v3915_v32  ;;  %8387 = vmatpush3.bf16.msra.mxu1 %v9722_v25  ;;  %v9741_v25 = vld [vmem:[#allocation8 + $0x4fc] ss:$12 sps:$4 sm:$0xff]   ;;  %v3939_v56 = vmax.bf16 %v12276_v61, %v3843_v57  ;;  %v3854_v57 = vadd.bf16 %v11221_v51, %v12369_v58 }
 0x2e4   : > { %6272 = vmatprep.subr.bf16.mxu0 %v9725_v18  ;;  %8388 = vmatprep.subr.bf16.mxu1 %v9729_v13  ;;  %v9754_v32 = vld [vmem:[#allocation8 + $0x4e8] ss:$12 sps:$4 sm:$0xff]   ;;  %v12365_v18 = vpack.c.bf16 %v10994_v36, %v10986_v14 }
 0x2e6   : > { %6273 = vmatpush1.bf16.msra.mxu0 %v9723_v16  ;;  %v3842_v13 = vadd.bf16 %v11221_v51, %v12365_v18  ;;  %v9744_v16 = vld [vmem:[#allocation8 + $0x514] ss:$12 sps:$4 sm:$0xff]  }
 0x2e7   : > { %6274 = vmatprep.subr.bf16.mxu0 %v9728_v29  ;;  %8389 = vmatpush3.bf16.msra.mxu1 %v9730_v20 }
 0x2e8   : > { %8390 = vmatprep.subr.bf16.mxu1 %v9737_v4  ;;  %v9742_v4 = vld [vmem:[#allocation8 + $0x510] ss:$12 sps:$4 sm:$0xff]  }
 0x2e9   : > { %6200 = vmatmul.mubr.bf16.gmra.mrb[100].mxu0 %v3914_v15  ;;  %6844 = vmatmul.mubr.bf16.gmra.mrb[164].mxu1 %v3914_v15 }
 0x2ea   : > { %6209 = vmatprep.mubr.bf16.mxu0 %v3927_v39  ;;  %6275 = vmatpush1.bf16.msra.mxu0 %v9726_v60 }
 0x2eb   : > { %6851 = vmatprep.mubr.bf16.mxu1 %v3927_v39  ;;  %6276 = vmatprep.subr.bf16.mxu0 %v9733_v59  ;;  %v3938_v59 = vmax.bf16 %v12276_v61, %v3842_v13  ;;  %v9749_v39 = vld [vmem:[#allocation8 + $0x52c] ss:$12 sps:$4 sm:$0xff]  }
 0x2ec   : > { %8391 = vmatpush3.bf16.msra.mxu1 %v9738_v54 }
 0x2ed   : > { %8392 = vmatprep.subr.bf16.mxu1 %v9745_v2 }
 0x2ee   : > { %6277 = vmatpush1.bf16.msra.mxu0 %v9731_v11  ;;  %v3951_v11 = vmax.bf16 %v12276_v61, %v3855_v49 }
 0x2ef   : > { %6278 = vmatprep.subr.bf16.mxu0 %v9736_v0  ;;  %v9747_v0 = vld [vmem:[#allocation8 + $0x528] ss:$12 sps:$4 sm:$0xff]  }
 0x2f0   : > { %8393 = vmatpush3.bf16.msra.mxu1 %v9746_v17  ;;  %v9752_v17 = vld [vmem:[#allocation8 + $0x544] ss:$12 sps:$4 sm:$0xff]  }
 0x2f1   : > { %6210 = vmatmul.mubr.bf16.gmra.mrb[104].mxu0 %v3926_v21  ;;  %6852 = vmatmul.mubr.bf16.gmra.mrb[168].mxu1 %v3926_v21 }
 0x2f2   : > { %6219 = vmatprep.mubr.bf16.mxu0 %v3939_v56  ;;  %6279 = vmatpush1.bf16.msra.mxu0 %v9734_v5  ;;  %v12370_v5 = vpack.c.bf16 %v11079_v27, %v11066_v41 }
 0x2f3   : > { %6859 = vmatprep.mubr.bf16.mxu1 %v3939_v56  ;;  %6280 = vmatprep.subr.bf16.mxu0 %v9741_v25 }
 0x2f4   : > { %v11263_v29 = vpop.f32.mrb[64].mxu0  ;;  %v11265_v20 = vpop.f32.mrb[64].mxu1  ;;  %8394 = vmatprep.subr.bf16.mxu1 %v9753_v55  ;;  %v3867_v21 = vadd.bf16 %v11204_v1, %v12370_v5  ;;  %v9770_v55 = vld [vmem:[#allocation8 + $0x518] ss:$12 sps:$4 sm:$0xff]  }
 0x2f5   : > { %12367 = vst [vmem:[#allocation18_spill] sm:$0xff] %v11265_v20  ;;  %v11267_v48 = vpop.f32.mrb[65].mxu0  ;;  %v11269_v7 = vpop.f32.mrb[65].mxu1  ;;  %8395 = vmatpush3.bf16.msra.mxu1 %v9754_v32 }
 0x2f6   : > { %v11271_v14 = vpop.f32.mrb[66].mxu0  ;;  %v11273_v36 = vpop.f32.mrb[66].mxu1  ;;  %6281 = vmatpush1.bf16.msra.mxu0 %v9739_v30  ;;  %8396 = vmatprep.subr.bf16.mxu1 %v9761_v43  ;;  %v9750_v43 = vld [vmem:[#allocation8 + $0x540] ss:$12 sps:$4 sm:$0xff]  }
 0x2f7   : > { %12368 = vst [vmem:[#allocation16_spill] sm:$0xff] %v11273_v36  ;;  %v11279_v60 = vpop.f32.mrb[67].mxu0  ;;  %v11281_v15 = vpop.f32.mrb[67].mxu1  ;;  %6282 = vmatprep.subr.bf16.mxu0 %v9744_v16  ;;  %v3950_v16 = vmax.bf16 %v12276_v61, %v3854_v57  ;;  %v9760_v57 = vld [vmem:[#allocation8 + $0x574] ss:$12 sps:$4 sm:$0xff]  }
 0x2f9   : > { %6220 = vmatmul.mubr.bf16.gmra.mrb[108].mxu0 %v3938_v59  ;;  %6860 = vmatmul.mubr.bf16.gmra.mrb[172].mxu1 %v3938_v59  ;;  %v3963_v59 = vmax.bf16 %v12276_v61, %v3867_v21 }
 0x2fa   : > { %6229 = vmatprep.mubr.bf16.mxu0 %v3951_v11  ;;  %6283 = vmatpush1.bf16.msra.mxu0 %v9742_v4 }
 0x2fb   : > { %6867 = vmatprep.mubr.bf16.mxu1 %v3951_v11  ;;  %6284 = vmatprep.subr.bf16.mxu0 %v9749_v39  ;;  %v9777_v39 = vld [vmem:[#allocation8 + $0x5f0] ss:$12 sps:$4 sm:$0xff]  }
 0x2fc   : > { %v11297_v25 = vpop.f32.mrb[68].mxu0  ;;  %v11299_v56 = vpop.f32.mrb[68].mxu1  ;;  %8397 = vmatpush3.bf16.msra.mxu1 %v9762_v62  ;;  %v9778_v11 = vld [vmem:[#allocation8 + $0x530] ss:$12 sps:$4 sm:$0xff]   ;;  %v9755_v62 = vld [vmem:[#allocation8 + $0x558] ss:$12 sps:$4 sm:$0xff]  }
 0x2fd   : > { %12371 = vst [vmem:[#allocation23_spill] sm:$0xff] %v11299_v56  ;;  %v11301_v32 = vpop.f32.mrb[69].mxu0  ;;  %v11303_v30 = vpop.f32.mrb[69].mxu1  ;;  %8398 = vmatprep.subr.bf16.mxu1 %v9769_v52  ;;  %v9785_v52 = vld [vmem:[#allocation8 + $0x6c8] ss:$12 sps:$4 sm:$0xff]  }
 0x2fe   : > { %12372 = vst [vmem:[#allocation21_spill] sm:$0xff] %v11303_v30  ;;  %v11305_v24 = vpop.f32.mrb[70].mxu0  ;;  %v11307_v28 = vpop.f32.mrb[70].mxu1  ;;  %6285 = vmatpush1.bf16.msra.mxu0 %v9747_v0  ;;  %v12375_v0 = vpack.c.bf16 %v11070_v23, %v11062_v12  ;;  %v9806_v56 = vld [vmem:[#allocation8 + $0x690] ss:$12 sps:$4 sm:$0xff]  }
 0x2ff   : > { %12373 = vst [vmem:[#allocation22_spill] sm:$0xff] %v11307_v28  ;;  %v11313_v18 = vpop.f32.mrb[71].mxu0  ;;  %v11315_v13 = vpop.f32.mrb[71].mxu1  ;;  %6286 = vmatprep.subr.bf16.mxu0 %v9752_v17  ;;  %v12376_v17 = vpack.c.bf16 %v11112_v35, %v11100_v3  ;;  %v9763_v35 = vld [vmem:[#allocation8 + $0x588] ss:$12 sps:$4 sm:$0xff]  }
 0x300   : > { %12374 = vst [vmem:[#allocation20_spill] sm:$0xff] %v11315_v13  ;;  %8399 = vmatpush3.bf16.msra.mxu1 %v9770_v55  ;;  %v3866_v58 = vadd.bf16 %v11221_v51, %v12375_v0 }
 0x301   : > { %6230 = vmatmul.mubr.bf16.gmra.mrb[112].mxu0 %v3950_v16  ;;  %6868 = vmatmul.mubr.bf16.gmra.mrb[176].mxu1 %v3950_v16  ;;  %v3879_v5 = vadd.bf16 %v11204_v1, %v12376_v17  ;;  %v3693_v17 = vcombine.high %v11190_v9, %v11190_v9  ;;  %v9768_v9 = vld [vmem:[#allocation8 + $0x5a4] ss:$12 sps:$4 sm:$0xff]  }
 0x302   : > { %6239 = vmatprep.mubr.bf16.mxu0 %v3963_v59  ;;  %6287 = vmatpush1.bf16.msra.mxu0 %v9750_v43  ;;  %v3962_v0 = vmax.bf16 %v12276_v61, %v3866_v58  ;;  %v12381_v58 = vpack.c.bf16 %v11104_v53, %v11096_v26 }
 0x303   : > { %6875 = vmatprep.mubr.bf16.mxu1 %v3963_v59  ;;  %6288 = vmatprep.subr.bf16.mxu0 %v9757_v34  ;;  %v9758_v34 = vld [vmem:[#allocation8 + $0x570] ss:$12 sps:$4 sm:$0xff]   ;;  %v3975_v27 = vmax.bf16 %v12276_v61, %v3879_v5  ;;  %v3768_v4 = vpack.i.b16 %v3693_v17, %v3693_v17 }
 0x304   : > { %v11331_v21 = vpop.f32.mrb[72].mxu0  ;;  %v11333_v55 = vpop.f32.mrb[72].mxu1  ;;  %8400 = vmatprep.subr.bf16.mxu1 %v9777_v39 }
 0x305   : > { %12377 = vst [vmem:[#allocation27_spill] sm:$0xff] %v11333_v55  ;;  %v11335_v43 = vpop.f32.mrb[73].mxu0  ;;  %v11337_v16 = vpop.f32.mrb[73].mxu1  ;;  %8401 = vmatpush3.bf16.msra.mxu1 %v9778_v11  ;;  %v9765_v11 = vld [vmem:[#allocation8 + $0x58c] ss:$12 sps:$4 sm:$0xff]  }
 0x306   : > { %12378 = vst [vmem:[#allocation25_spill] sm:$0xff] %v11337_v16  ;;  %v11339_v12 = vpop.f32.mrb[74].mxu0  ;;  %v11341_v23 = vpop.f32.mrb[74].mxu1  ;;  %6289 = vmatpush1.bf16.msra.mxu0 %v9755_v62  ;;  %8450 = vmatprep.subr.bf16.mxu1 %v9785_v52  ;;  %v3891_v52 = vadd.bf16 %v11204_v1, %v12382_v40 }
 0x307   : > { %12379 = vst [vmem:[#allocation26_spill] sm:$0xff] %v11341_v23  ;;  %v11347_v59 = vpop.f32.mrb[75].mxu0  ;;  %v11349_v39 = vpop.f32.mrb[75].mxu1  ;;  %6290 = vmatprep.subr.bf16.mxu0 %v9760_v57  ;;  %v3878_v57 = vadd.bf16 %v11221_v51, %v12381_v58  ;;  %v9773_v58 = vld [vmem:[#allocation8 + $0x5bc] ss:$12 sps:$4 sm:$0xff]  }
 0x308   : > { %12380 = vst [vmem:[#allocation24_spill] sm:$0xff] %v11349_v39  ;;  %v3987_v3 = vmax.bf16 %v12276_v61, %v3891_v52 }
 0x309   : > { %6240 = vmatmul.mubr.bf16.gmra.mrb[116].mxu0 %v3962_v0  ;;  %6876 = vmatmul.mubr.bf16.gmra.mrb[180].mxu1 %v3962_v0  ;;  %v3974_v17 = vmax.bf16 %v12276_v61, %v3878_v57  ;;  %v12387_v57 = vpack.c.bf16 %v11138_v63, %v11130_v31  ;;  %v9774_v63 = vld [vmem:[#allocation8 + $0x5d0] ss:$12 sps:$4 sm:$0xff]  }
 0x30a   : > { %6249 = vmatprep.mubr.bf16.mxu0 %v3975_v27  ;;  %6291 = vmatpush1.bf16.msra.mxu0 %v9758_v34 }
 0x30b   : > { %6883 = vmatprep.mubr.bf16.mxu1 %v3975_v27  ;;  %6292 = vmatprep.subr.bf16.mxu0 %v9765_v11  ;;  %v9766_v27 = vld [vmem:[#allocation8 + $0x5a0] ss:$12 sps:$4 sm:$0xff]   ;;  %v3691_v11 = vcombine.high %v11208_v22, %v11208_v22  ;;  %v12388_v22 = vpack.c.bf16 %v10900_v8, %v10888_v6  ;;  %v9779_v8 = vld [vmem:[#allocation8 + $0x5e8] ss:$12 sps:$4 sm:$0xff]   ;;  %v12393_v6 = vpack.c.bf16 %v10892_v19, %v10884_v45 }
 0x30c   : > { %v11367_v5 = vpop.f32.mrb[76].mxu0  ;;  %v11369_v0 = vpop.f32.mrb[76].mxu1  ;;  %v9782_v19 = vld [vmem:[#allocation8 + $0x600] ss:$12 sps:$4 sm:$0xff]  }
 0x30d   : > { %12383 = vst [vmem:[#allocation31_spill] sm:$0xff] %v11369_v0  ;;  %v11371_v34 = vpop.f32.mrb[77].mxu0  ;;  %v11373_v2 = vpop.f32.mrb[77].mxu1  ;;  %v3761_v62 = vpack.i.b16 %v3691_v11, %v3691_v11  ;;  %v9800_v0 = vld [vmem:[#allocation8 + $0x664] ss:$12 sps:$4 sm:$0xff]  }
 0x30e   : > { %12384 = vst [vmem:[#allocation29_spill] sm:$0xff] %v11373_v2  ;;  %v11375_v26 = vpop.f32.mrb[78].mxu0  ;;  %v11377_v53 = vpop.f32.mrb[78].mxu1  ;;  %6293 = vmatpush1.bf16.msra.mxu0 %v9763_v35  ;;  %v11391_v35 = vrot.slane %v3768_v4, %v10818_v38  ;;  %v3890_v4 = vadd.bf16 %v11221_v51, %v12387_v57  ;;  %v9781_v57 = vld [vmem:[#allocation8 + $0x5ec] ss:$12 sps:$4 sm:$0xff]   ;;  %v12410_v2 = vld [vmem:[#allocation44_spill] sm:$0xff] }
 0x30f   : > { %12385 = vst [vmem:[#allocation30_spill] sm:$0xff] %v11377_v53  ;;  %v11385_v1 = vpop.f32.mrb[79].mxu0  ;;  %v11387_v40 = vpop.f32.mrb[79].mxu1  ;;  %6294 = vmatprep.subr.bf16.mxu0 %v9768_v9  ;;  %v9776_v9 = vld [vmem:[#allocation8 + $0x5d4] ss:$12 sps:$4 sm:$0xff]   ;;  %v11419_v51 = vrot.slane %v3761_v62, %v10818_v38 }
 0x310   : > { %12386 = vst [vmem:[#allocation28_spill] sm:$0xff] %v11387_v40  ;;  %v3809_v46 = vadd.bf16 %v11391_v35, %v12388_v22  ;;  %v3986_v22 = vmax.bf16 %v12276_v61, %v3890_v4  ;;  %v9802_v53 = vld [vmem:[#allocation8 + $0x638] ss:$12 sps:$4 sm:$0xff]  }
 0x311   : > { %6250 = vmatmul.mubr.bf16.gmra.mrb[120].mxu0 %v3974_v17  ;;  %6884 = vmatmul.mubr.bf16.gmra.mrb[184].mxu1 %v3974_v17  ;;  %v3808_v4 = vadd.bf16 %v11419_v51, %v12393_v6 }
 0x312   : > { %6259 = vmatprep.mubr.bf16.mxu0 %v3987_v3  ;;  %6295 = vmatpush1.bf16.msra.mxu0 %v9766_v27  ;;  %v3905_v49 = vmax.bf16 %v12276_v61, %v3809_v46 }
 0x313   : > { %6891 = vmatprep.mubr.bf16.mxu1 %v3987_v3  ;;  %6296 = vmatprep.subr.bf16.mxu0 %v9773_v58 }
 0x314   : > { %v11406_v52 = vpop.f32.mrb[80].mxu0  ;;  %v11408_v17 = vpop.f32.mrb[80].mxu1 }
 0x315   : > { %12389 = vst [vmem:[#allocation35_spill] sm:$0xff] %v11408_v17  ;;  %v11410_v27 = vpop.f32.mrb[81].mxu0  ;;  %v11412_v11 = vpop.f32.mrb[81].mxu1  ;;  %v9792_v17 = vld [vmem:[#allocation8 + $0x634] ss:$12 sps:$4 sm:$0xff]  }
 0x316   : > { %12390 = vst [vmem:[#allocation33_spill] sm:$0xff] %v11412_v11  ;;  %v11414_v41 = vpop.f32.mrb[82].mxu0  ;;  %v11416_v31 = vpop.f32.mrb[82].mxu1  ;;  %6297 = vmatpush1.bf16.msra.mxu0 %v9771_v42  ;;  %v12394_v42 = vpack.c.bf16 %v10934_v47, %v10922_v33  ;;  %v9793_v11 = vld [vmem:[#allocation8 + $0x6e0] ss:$12 sps:$4 sm:$0xff]   ;;  %v12399_v33 = vpack.c.bf16 %v10926_v44, %v10918_v37 }
 0x317   : > { %12391 = vst [vmem:[#allocation34_spill] sm:$0xff] %v11416_v31  ;;  %v11425_v3 = vpop.f32.mrb[83].mxu0  ;;  %v11427_v58 = vpop.f32.mrb[83].mxu1  ;;  %6298 = vmatprep.subr.bf16.mxu0 %v9776_v9  ;;  %v9784_v9 = vld [vmem:[#allocation8 + $0x604] ss:$12 sps:$4 sm:$0xff]  }
 0x318   : > { %12392 = vst [vmem:[#allocation32_spill] sm:$0xff] %v11427_v58  ;;  %v3821_v62 = vadd.bf16 %v11391_v35, %v12394_v42  ;;  %v9786_v42 = vld [vmem:[#allocation8 + $0x608] ss:$12 sps:$4 sm:$0xff]   ;;  %v9787_v47 = vld [vmem:[#allocation8 + $0x618] ss:$12 sps:$4 sm:$0xff]  }
 0x319   : > { %6260 = vmatmul.mubr.bf16.gmra.mrb[124].mxu0 %v3986_v22  ;;  %6892 = vmatmul.mubr.bf16.gmra.mrb[188].mxu1 %v3986_v22  ;;  %v9789_v31 = vld [vmem:[#allocation8 + $0x61c] ss:$12 sps:$4 sm:$0xff]  }
 0x31a   : > { %6299 = vmatpush1.bf16.msra.mxu0 %v9774_v63  ;;  %6302 = vmatprep.mubr.bf16.mxu0 %v3905_v49 }
 0x31b   : > { %6932 = vmatprep.mubr.bf16.mxu1 %v3905_v49  ;;  %6300 = vmatprep.subr.bf16.mxu0 %v9781_v57  ;;  %v3904_v49 = vmax.bf16 %v12276_v61, %v3808_v4  ;;  %v3917_v4 = vmax.bf16 %v12276_v61, %v3821_v62 }
 0x31c   : > { %v11443_v50 = vpop.f32.mrb[84].mxu0  ;;  %v11445_v46 = vpop.f32.mrb[84].mxu1 }
 0x31d   : > { %12395 = vst [vmem:[#allocation59_spill] sm:$0xff] %v11445_v46  ;;  %v11447_v63 = vpop.f32.mrb[85].mxu0  ;;  %v11449_v22 = vpop.f32.mrb[85].mxu1  ;;  %v9794_v46 = vld [vmem:[#allocation8 + $0x620] ss:$12 sps:$4 sm:$0xff]  }
 0x31e   : > { %12396 = vst [vmem:[#allocation60_spill] sm:$0xff] %v11449_v22  ;;  %v11451_v54 = vpop.f32.mrb[86].mxu0  ;;  %v11453_v45 = vpop.f32.mrb[86].mxu1  ;;  %6301 = vmatpush1.bf16.msra.mxu0 %v9779_v8  ;;  %v12401_v8 = vld [vmem:[#allocation38_spill] sm:$0xff] }
 0x31f   : > { %12397 = vst [vmem:[#allocation61_spill] sm:$0xff] %v11453_v45  ;;  %v11460_v6 = vpop.f32.mrb[87].mxu0  ;;  %v11462_v57 = vpop.f32.mrb[87].mxu1  ;;  %6383 = vmatprep.subr.bf16.mxu0 %v9784_v9  ;;  %v3820_v9 = vadd.bf16 %v11419_v51, %v12399_v33  ;;  %v12400_v45 = vld [vmem:[#allocation40_spill] sm:$0xff] }
 0x320   : > { %12398 = vst [vmem:[#allocation62_spill] sm:$0xff] %v11462_v57  ;;  %v12402_v22 = vpack.c.bf16 %v12400_v45, %v12401_v8  ;;  %v9809_v45 = vld [vmem:[#allocation8 + $0x710] ss:$12 sps:$4 sm:$0xff]  }
 0x321   : > { %6303 = vmatmul.mubr.bf16.vlgmr.msra.gmra.mrb[96].mxu0 %v3904_v49  ;;  %6933 = vmatmul.mubr.bf16.vlgmr.msra.gmra.mrb[192].mxu1 %v3904_v49 }
 0x322   : > { %6312 = vmatprep.mubr.bf16.mxu0 %v3917_v4  ;;  %6384 = vmatpush1.bf16.msra.mxu0 %v9782_v19  ;;  %v3833_v62 = vadd.bf16 %v11391_v35, %v12402_v22  ;;  %v9801_v19 = vld [vmem:[#allocation8 + $0x6f8] ss:$12 sps:$4 sm:$0xff]  }
 0x323   : > { %6940 = vmatprep.mubr.bf16.mxu1 %v3917_v4  ;;  %8451 = vmatpush3.bf16.msra.mxu1 %v9786_v42  ;;  %v9790_v42 = vld [vmem:[#allocation8 + $0x630] ss:$12 sps:$4 sm:$0xff]   ;;  %v9797_v4 = vld [vmem:[#allocation8 + $0x64c] ss:$12 sps:$4 sm:$0xff]  }
 0x324   : > { %v11477_v57 = vpop.f32.mrb[88].mxu0  ;;  %v11479_v49 = vpop.f32.mrb[88].mxu1  ;;  %6385 = vmatprep.subr.bf16.mxu0 %v9789_v31  ;;  %8452 = vmatprep.subr.bf16.mxu1 %v9793_v11  ;;  %v3916_v31 = vmax.bf16 %v12276_v61, %v3820_v9  ;;  %v3929_v22 = vmax.bf16 %v12276_v61, %v3833_v62  ;;  %v12407_v9 = vld [vmem:[#allocation39_spill] sm:$0xff] }
 0x325   : > { %12403 = vst [vmem:[#allocation40_spill] sm:$0xff] %v11479_v49  ;;  %v11481_v58 = vpop.f32.mrb[89].mxu0  ;;  %v11483_v37 = vpop.f32.mrb[89].mxu1  ;;  %v9795_v49 = vld [vmem:[#allocation8 + $0x648] ss:$12 sps:$4 sm:$0xff]  }
 0x326   : > { %12404 = vst [vmem:[#allocation38_spill] sm:$0xff] %v11483_v37  ;;  %v11485_v44 = vpop.f32.mrb[90].mxu0  ;;  %v11487_v33 = vpop.f32.mrb[90].mxu1  ;;  %6386 = vmatpush1.bf16.msra.mxu0 %v9787_v47  ;;  %v12411_v47 = vld [vmem:[#allocation42_spill] sm:$0xff] }
 0x327   : > { %12405 = vst [vmem:[#allocation63_spill] sm:$0xff] %v11487_v33  ;;  %v11493_v8 = vpop.f32.mrb[91].mxu0  ;;  %v11495_v11 = vpop.f32.mrb[91].mxu1  ;;  %6387 = vmatprep.subr.bf16.mxu0 %v9792_v17  ;;  %8453 = vmatpush3.bf16.msra.mxu1 %v9794_v46  ;;  %v12408_v17 = vld [vmem:[#allocation37_spill] sm:$0xff]  ;;  %v12412_v37 = vpack.c.bf16 %v12410_v2, %v12411_v47  ;;  %v9817_v2 = vld [vmem:[#allocation8 + $0x728] ss:$12 sps:$4 sm:$0xff]  }
 0x328   : > { %12406 = vst [vmem:[#allocation64_spill] sm:$0xff] %v11495_v11  ;;  %8454 = vmatprep.subr.bf16.mxu1 %v9801_v19  ;;  %v12409_v46 = vpack.c.bf16 %v12407_v9, %v12408_v17 }
 0x329   : > { %6313 = vmatmul.mubr.bf16.gmra.mrb[100].mxu0 %v3916_v31  ;;  %6941 = vmatmul.mubr.bf16.gmra.mrb[196].mxu1 %v3916_v31  ;;  %v3845_v62 = vadd.bf16 %v11391_v35, %v12412_v37  ;;  %v9818_v37 = vld [vmem:[#allocation8 + $0x668] ss:$12 sps:$4 sm:$0xff]  }
 0x32a   : > { %6322 = vmatprep.mubr.bf16.mxu0 %v3929_v22  ;;  %6388 = vmatpush1.bf16.msra.mxu0 %v9790_v42  ;;  %v3832_v33 = vadd.bf16 %v11419_v51, %v12409_v46  ;;  %v9810_v42 = vld [vmem:[#allocation8 + $0x650] ss:$12 sps:$4 sm:$0xff]   ;;  %v9808_v46 = vld [vmem:[#allocation8 + $0x694] ss:$12 sps:$4 sm:$0xff]  }
 0x32b   : > { %6948 = vmatprep.mubr.bf16.mxu1 %v3929_v22  ;;  %6389 = vmatprep.subr.bf16.mxu0 %v9797_v4  ;;  %v9798_v4 = vld [vmem:[#allocation8 + $0x660] ss:$12 sps:$4 sm:$0xff]   ;;  %v3941_v55 = vmax.bf16 %v12276_v61, %v3845_v62 }
 0x32c   : > { %v11511_v19 = vpop.f32.mrb[92].mxu0  ;;  %v11513_v31 = vpop.f32.mrb[92].mxu1  ;;  %8455 = vmatpush3.bf16.msra.mxu1 %v9802_v53  ;;  %v3928_v17 = vmax.bf16 %v12276_v61, %v3832_v33  ;;  %v12417_v33 = vld [vmem:[#allocation43_spill] sm:$0xff] }
 0x32d   : > { %12413 = vst [vmem:[#allocation39_spill] sm:$0xff] %v11513_v31  ;;  %v11515_v11 = vpop.f32.mrb[93].mxu0  ;;  %v11517_v40 = vpop.f32.mrb[93].mxu1  ;;  %8456 = vmatprep.subr.bf16.mxu1 %v9809_v45  ;;  %v9805_v45 = vld [vmem:[#allocation8 + $0x67c] ss:$12 sps:$4 sm:$0xff]  }
 0x32e   : > { %12414 = vst [vmem:[#allocation37_spill] sm:$0xff] %v11517_v40  ;;  %v11519_v9 = vpop.f32.mrb[94].mxu0  ;;  %v11521_v22 = vpop.f32.mrb[94].mxu1  ;;  %6390 = vmatpush1.bf16.msra.mxu0 %v9795_v49  ;;  %v9803_v31 = vld [vmem:[#allocation8 + $0x678] ss:$12 sps:$4 sm:$0xff]  }
 0x32f   : > { %12415 = vst [vmem:[#allocation44_spill] sm:$0xff] %v11521_v22  ;;  %v11527_v47 = vpop.f32.mrb[95].mxu0  ;;  %v11529_v53 = vpop.f32.mrb[95].mxu1  ;;  %6391 = vmatprep.subr.bf16.mxu0 %v9800_v0  ;;  %v9825_v22 = vld [vmem:[#allocation8 + $0x740] ss:$12 sps:$4 sm:$0xff]   ;;  %v12420_v49 = vld [vmem:[#allocation48_spill] sm:$0xff] }
 0x330   : > { %12416 = vst [vmem:[#allocation42_spill] sm:$0xff] %v11529_v53  ;;  %8457 = vmatpush3.bf16.msra.mxu1 %v9810_v42  ;;  %v12418_v0 = vld [vmem:[#allocation41_spill] sm:$0xff]  ;;  %v12421_v40 = vld [vmem:[#allocation46_spill] sm:$0xff] }
 0x331   : > { %6323 = vmatmul.mubr.bf16.gmra.mrb[104].mxu0 %v3928_v17  ;;  %6949 = vmatmul.mubr.bf16.gmra.mrb[200].mxu1 %v3928_v17  ;;  %v12419_v23 = vpack.c.bf16 %v12417_v33, %v12418_v0  ;;  %v12422_v62 = vpack.c.bf16 %v12420_v49, %v12421_v40  ;;  %v9826_v49 = vld [vmem:[#allocation8 + $0x680] ss:$12 sps:$4 sm:$0xff]  }
 0x332   : > { %6332 = vmatprep.mubr.bf16.mxu0 %v3941_v55  ;;  %6392 = vmatpush1.bf16.msra.mxu0 %v9798_v4 }
 0x333   : > { %v3844_v16 = vadd.bf16 %v11419_v51, %v12419_v23  ;;  %6956 = vmatprep.mubr.bf16.mxu1 %v3941_v55  ;;  %6393 = vmatprep.subr.bf16.mxu0 %v9805_v45  ;;  %v3857_v42 = vadd.bf16 %v11391_v35, %v12422_v62  ;;  %v9813_v23 = vld [vmem:[#allocation8 + $0x6ac] ss:$12 sps:$4 sm:$0xff]  }
 0x334   : > { %v8210_v53 = vpop.f32.mrb[96].mxu1  ;;  %8458 = vmatprep.subr.bf16.mxu1 %v9817_v2  ;;  %v9833_v2 = vld [vmem:[#allocation8 + $0x758] ss:$12 sps:$4 sm:$0xff]  }
 0x335   : > { %v8211_v17 = vpop.f32.mrb[97].mxu1  ;;  %8459 = vmatpush3.bf16.msra.mxu1 %v9818_v37  ;;  %v3940_v55 = vmax.bf16 %v12276_v61, %v3844_v16  ;;  %v3953_v40 = vmax.bf16 %v12276_v61, %v3857_v42  ;;  %v9811_v37 = vld [vmem:[#allocation8 + $0x6a8] ss:$12 sps:$4 sm:$0xff]   ;;  %v9816_v16 = vld [vmem:[#allocation8 + $0x6c4] ss:$12 sps:$4 sm:$0xff]  }
 0x336   : > { %v11545_v4 = vadd.f32 %v8211_v17, %v8210_v53  ;;  %6394 = vmatpush1.bf16.msra.mxu0 %v9803_v31  ;;  %v8213_v39 = vpop.f32.mrb[98].mxu1  ;;  %8460 = vmatprep.subr.bf16.mxu1 %v9825_v22  ;;  %v12423_v31 = vld [vmem:[#allocation47_spill] sm:$0xff]  ;;  %v12424_v53 = vld [vmem:[#allocation45_spill] sm:$0xff] }
 0x337   : > { %v8214_v33 = vpop.f32.mrb[99].mxu1  ;;  %6395 = vmatprep.subr.bf16.mxu0 %v9808_v46  ;;  %v12425_v0 = vpack.c.bf16 %v12423_v31, %v12424_v53  ;;  %v12426_v46 = vld [vmem:[#allocation52_spill] sm:$0xff]  ;;  %v9814_v31 = vld [vmem:[#allocation8 + $0x6c0] ss:$12 sps:$4 sm:$0xff]  }
 0x338   : > { %v11548_v45 = vadd.f32 %v8214_v33, %v8213_v39  ;;  %v12427_v39 = vld [vmem:[#allocation50_spill] sm:$0xff] }
 0x339   : > { %6333 = vmatmul.mubr.bf16.gmra.mrb[108].mxu0 %v3940_v55  ;;  %6957 = vmatmul.mubr.bf16.gmra.mrb[204].mxu1 %v3940_v55  ;;  %v3856_v22 = vadd.bf16 %v11419_v51, %v12425_v0  ;;  %v12428_v62 = vpack.c.bf16 %v12426_v46, %v12427_v39  ;;  %v9834_v33 = vld [vmem:[#allocation8 + $0x698] ss:$12 sps:$4 sm:$0xff]   ;;  %v9841_v39 = vld [vmem:[#allocation8 + $0x770] ss:$12 sps:$4 sm:$0xff]  }
 0x33a   : > { %6342 = vmatprep.mubr.bf16.mxu0 %v3953_v40  ;;  %6396 = vmatpush1.bf16.msra.mxu0 %v9806_v56 }
 0x33b   : > { %6964 = vmatprep.mubr.bf16.mxu1 %v3953_v40  ;;  %6397 = vmatprep.subr.bf16.mxu0 %v9813_v23  ;;  %v3869_v42 = vadd.bf16 %v11391_v35, %v12428_v62  ;;  %v3952_v40 = vmax.bf16 %v12276_v61, %v3856_v22  ;;  %v9821_v23 = vld [vmem:[#allocation8 + $0x6dc] ss:$12 sps:$4 sm:$0xff]  }
 0x33c   : > { %v8216_v17 = vpop.f32.mrb[100].mxu1  ;;  %8461 = vmatpush3.bf16.msra.mxu1 %v9826_v49  ;;  %v9842_v49 = vld [vmem:[#allocation8 + $0x6b0] ss:$12 sps:$4 sm:$0xff]  }
 0x33d   : > { %v8217_v55 = vpop.f32.mrb[101].mxu1  ;;  %8462 = vmatprep.subr.bf16.mxu1 %v9833_v2  ;;  %v3965_v46 = vmax.bf16 %v12276_v61, %v3869_v42  ;;  %v9819_v2 = vld [vmem:[#allocation8 + $0x6d8] ss:$12 sps:$4 sm:$0xff]   ;;  %v12429_v62 = vld [vmem:[#allocation51_spill] sm:$0xff] }
 0x33e   : > { %v11559_v56 = vadd.f32 %v8217_v55, %v8216_v17  ;;  %6398 = vmatpush1.bf16.msra.mxu0 %v9811_v37  ;;  %v8219_v28 = vpop.f32.mrb[102].mxu1  ;;  %v9849_v37 = vld [vmem:[#allocation8 + $0x848] ss:$12 sps:$4 sm:$0xff]   ;;  %v12430_v17 = vld [vmem:[#allocation49_spill] sm:$0xff] }
 0x33f   : > { %v8220_v53 = vpop.f32.mrb[103].mxu1  ;;  %6399 = vmatprep.subr.bf16.mxu0 %v9816_v16  ;;  %v12431_v55 = vpack.c.bf16 %v12429_v62, %v12430_v17  ;;  %v7836_v16 = vld.sshfl [vmem:[#allocation7 + $0x8] sm:$0x33 pattern:$0x75316420]  ;;  %v12433_v42 = vld [vmem:[#allocation54_spill] sm:$0xff] }
 0x340   : > { %v11562_v0 = vadd.f32 %v8220_v53, %v8219_v28  ;;  %8463 = vmatpush3.bf16.msra.mxu1 %v9834_v33  ;;  %v9824_v28 = vld [vmem:[#allocation8 + $0x6f4] ss:$12 sps:$4 sm:$0xff]   ;;  %v12432_v53 = vld [vmem:[#allocation56_spill] sm:$0xff]  ;;  %v9822_v17 = vld [vmem:[#allocation8 + $0x6f0] ss:$12 sps:$4 sm:$0xff]  }
 0x341   : > { %6343 = vmatmul.mubr.bf16.gmra.mrb[112].mxu0 %v3952_v40  ;;  %6965 = vmatmul.mubr.bf16.gmra.mrb[208].mxu1 %v3952_v40  ;;  %v3868_v22 = vadd.bf16 %v11419_v51, %v12431_v55  ;;  %v12434_v33 = vpack.c.bf16 %v12432_v53, %v12433_v42 }
 0x342   : > { %6352 = vmatprep.mubr.bf16.mxu0 %v3965_v46  ;;  %6400 = vmatpush1.bf16.msra.mxu0 %v9814_v31  ;;  %v3701_v31 = vcombine.high %v7836_v16, %v7836_v16 }
 0x343   : > { %6972 = vmatprep.mubr.bf16.mxu1 %v3965_v46  ;;  %6401 = vmatprep.subr.bf16.mxu0 %v9821_v23  ;;  %v3881_v30 = vadd.bf16 %v11391_v35, %v12434_v33  ;;  %v3964_v23 = vmax.bf16 %v12276_v61, %v3868_v22  ;;  %v9829_v46 = vld [vmem:[#allocation8 + $0x70c] ss:$12 sps:$4 sm:$0xff]   ;;  %v9832_v22 = vld [vmem:[#allocation8 + $0x724] ss:$12 sps:$4 sm:$0xff]  }
 0x344   : > { %v8222_v40 = vpop.f32.mrb[104].mxu1  ;;  %8464 = vmatprep.subr.bf16.mxu1 %v9841_v39  ;;  %v11580_v39 = vrot.slane %v3701_v31, %v10801_v10  ;;  %v12439_v33 = vld [vmem:[#allocation17_spill] sm:$0xff] }
 0x345   : > { %v8223_v13 = vpop.f32.mrb[105].mxu1  ;;  %8465 = vmatpush3.bf16.msra.mxu1 %v9842_v49  ;;  %v3977_v53 = vmax.bf16 %v12276_v61, %v3881_v30  ;;  %v12435_v49 = vld [vmem:[#allocation55_spill] sm:$0xff] }
 0x346   : > { %v11573_v20 = vadd.f32 %v8223_v13, %v8222_v40  ;;  %6402 = vmatpush1.bf16.msra.mxu0 %v9819_v2  ;;  %v8225_v62 = vpop.f32.mrb[106].mxu1  ;;  %8514 = vmatprep.subr.bf16.mxu1 %v9849_v37  ;;  %v9827_v13 = vld [vmem:[#allocation8 + $0x708] ss:$12 sps:$4 sm:$0xff]   ;;  %v12436_v2 = vld [vmem:[#allocation53_spill] sm:$0xff]  ;;  %v3782_v31 = vpack.i.b16 %v11580_v39, %v11580_v39 }
 0x347   : > { %v8226_v55 = vpop.f32.mrb[107].mxu1  ;;  %6403 = vmatprep.subr.bf16.mxu0 %v9824_v28  ;;  %v12437_v37 = vpack.c.bf16 %v12435_v49, %v12436_v2  ;;  %v12438_v28 = vld [vmem:[#allocation58_spill] sm:$0xff]  ;;  %v9830_v49 = vld [vmem:[#allocation8 + $0x720] ss:$12 sps:$4 sm:$0xff]  }
 0x348   : > { %v11576_v36 = vadd.f32 %v8226_v55, %v8225_v62  ;;  %v12440_v40 = vpack.c.bf16 %v12438_v28, %v12439_v33  ;;  %v11602_v33 = vrot.slane %v7836_v16, %v10801_v10  ;;  %v12444_v10 = vpack.c.bf16 %v11279_v60, %v11267_v48  ;;  %v9843_v60 = vld [vmem:[#allocation8 + $0x768] ss:$12 sps:$4 sm:$0xff]  }
 0x349   : > { %6353 = vmatmul.mubr.bf16.gmra.mrb[116].mxu0 %v3964_v23  ;;  %6973 = vmatmul.mubr.bf16.gmra.mrb[212].mxu1 %v3964_v23  ;;  %v3880_v42 = vadd.bf16 %v11419_v51, %v12437_v37  ;;  %v11596_v37 = vrot.slane %v3782_v31, %v10818_v38 }
 0x34a   : > { %6362 = vmatprep.mubr.bf16.mxu0 %v3977_v53  ;;  %6404 = vmatpush1.bf16.msra.mxu0 %v9822_v17  ;;  %v3893_v30 = vadd.bf16 %v11391_v35, %v12440_v40  ;;  %v12441_v40 = vld [vmem:[#allocation57_spill] sm:$0xff]  ;;  %v3775_v31 = vpack.i.b16 %v11602_v33, %v11602_v33 }
 0x34b   : > { %6980 = vmatprep.mubr.bf16.mxu1 %v3977_v53  ;;  %6405 = vmatprep.subr.bf16.mxu0 %v9829_v46  ;;  %v3976_v53 = vmax.bf16 %v12276_v61, %v3880_v42  ;;  %v9837_v46 = vld [vmem:[#allocation8 + $0x73c] ss:$12 sps:$4 sm:$0xff]   ;;  %v3811_v16 = vadd.bf16 %v11596_v37, %v12444_v10 }
 0x34c   : > { %v8228_v62 = vpop.f32.mrb[108].mxu1  ;;  %v3989_v35 = vmax.bf16 %v12276_v61, %v3893_v30 }
 0x34d   : > { %v8229_v55 = vpop.f32.mrb[109].mxu1  ;;  %v3907_v48 = vmax.bf16 %v12276_v61, %v3811_v16 }
 0x34e   : > { %v11592_v17 = vadd.f32 %v8229_v55, %v8228_v62  ;;  %6406 = vmatpush1.bf16.msra.mxu0 %v9827_v13  ;;  %v8231_v23 = vpop.f32.mrb[110].mxu1  ;;  %v9835_v13 = vld [vmem:[#allocation8 + $0x738] ss:$12 sps:$4 sm:$0xff]   ;;  %v12442_v62 = vld [vmem:[#allocation19_spill] sm:$0xff] }
 0x34f   : > { %v8232_v2 = vpop.f32.mrb[111].mxu1  ;;  %6407 = vmatprep.subr.bf16.mxu0 %v9832_v22  ;;  %v12443_v42 = vpack.c.bf16 %v12441_v40, %v12442_v62  ;;  %v9840_v55 = vld [vmem:[#allocation8 + $0x754] ss:$12 sps:$4 sm:$0xff]  }
 0x350   : > { %v11598_v28 = vadd.f32 %v8232_v2, %v8231_v23 }
 0x351   : > { %6363 = vmatmul.mubr.bf16.gmra.mrb[120].mxu0 %v3976_v53  ;;  %6981 = vmatmul.mubr.bf16.gmra.mrb[216].mxu1 %v3976_v53  ;;  %v3892_v22 = vadd.bf16 %v11419_v51, %v12443_v42  ;;  %v9838_v53 = vld [vmem:[#allocation8 + $0x750] ss:$12 sps:$4 sm:$0xff]   ;;  %v11617_v51 = vrot.slane %v3775_v31, %v10818_v38 }
 0x352   : > { %6372 = vmatprep.mubr.bf16.mxu0 %v3989_v35  ;;  %6408 = vmatpush1.bf16.msra.mxu0 %v9830_v49  ;;  %v9848_v31 = vld [vmem:[#allocation8 + $0x784] ss:$12 sps:$4 sm:$0xff]  }
 0x353   : > { %6988 = vmatprep.mubr.bf16.mxu1 %v3989_v35  ;;  %6409 = vmatprep.subr.bf16.mxu0 %v9837_v46  ;;  %v3988_v35 = vmax.bf16 %v12276_v61, %v3892_v22  ;;  %v9845_v46 = vld [vmem:[#allocation8 + $0x76c] ss:$12 sps:$4 sm:$0xff]   ;;  %v12446_v22 = vpack.c.bf16 %v11313_v18, %v11301_v32 }
 0x354   : > { %v8234_v30 = vpop.f32.mrb[112].mxu1  ;;  %v9857_v32 = vld [vmem:[#allocation8 + $0x860] ss:$12 sps:$4 sm:$0xff]   ;;  %v9851_v18 = vld [vmem:[#allocation8 + $0x798] ss:$12 sps:$4 sm:$0xff]  }
 0x355   : > { %v8235_v23 = vpop.f32.mrb[113].mxu1 }
 0x356   : > { %v11614_v49 = vadd.f32 %v8235_v23, %v8234_v30  ;;  %6410 = vmatpush1.bf16.msra.mxu0 %v9835_v13  ;;  %v8237_v2 = vpop.f32.mrb[114].mxu1  ;;  %v12445_v13 = vpack.c.bf16 %v11271_v14, %v11263_v29  ;;  %v9850_v14 = vld [vmem:[#allocation8 + $0x788] ss:$12 sps:$4 sm:$0xff]  }
 0x357   : > { %v8238_v40 = vpop.f32.mrb[115].mxu1  ;;  %6411 = vmatprep.subr.bf16.mxu0 %v9840_v55  ;;  %v3823_v55 = vadd.bf16 %v11596_v37, %v12446_v22 }
 0x358   : > { %v11620_v62 = vadd.f32 %v8238_v40, %v8237_v2  ;;  %v3810_v42 = vadd.bf16 %v11617_v51, %v12445_v13  ;;  %v9846_v2 = vld [vmem:[#allocation8 + $0x780] ss:$12 sps:$4 sm:$0xff]  }
 0x359   : > { %6373 = vmatmul.mubr.bf16.gmra.mrb[124].mxu0 %v3988_v35  ;;  %6989 = vmatmul.mubr.bf16.gmra.mrb[220].mxu1 %v3988_v35  ;;  %v3919_v35 = vmax.bf16 %v12276_v61, %v3823_v55  ;;  %v9856_v13 = vld [vmem:[#allocation8 + $0x7b4] ss:$12 sps:$4 sm:$0xff]  }
 0x35a   : > { %6412 = vmatpush1.bf16.msra.mxu0 %v9838_v53  ;;  %6415 = vmatprep.mubr.bf16.mxu0 %v3907_v48  ;;  %v3906_v53 = vmax.bf16 %v12276_v61, %v3810_v42  ;;  %v9858_v42 = vld [vmem:[#allocation8 + $0x7a0] ss:$12 sps:$4 sm:$0xff]  }
 0x35b   : > { %7029 = vmatprep.mubr.bf16.mxu1 %v3907_v48  ;;  %6413 = vmatprep.subr.bf16.mxu0 %v9845_v46  ;;  %v9853_v46 = vld [vmem:[#allocation8 + $0x79c] ss:$12 sps:$4 sm:$0xff]   ;;  %v12447_v48 = vpack.c.bf16 %v11305_v24, %v11297_v25 }
 0x35c   : > { %v8240_v10 = vpop.f32.mrb[116].mxu1  ;;  %v9854_v24 = vld [vmem:[#allocation8 + $0x7b0] ss:$12 sps:$4 sm:$0xff]  }
 0x35d   : > { %v8241_v16 = vpop.f32.mrb[117].mxu1 }
 0x35e   : > { %v11631_v30 = vadd.f32 %v8241_v16, %v8240_v10  ;;  %6414 = vmatpush1.bf16.msra.mxu0 %v9843_v60  ;;  %v8243_v23 = vpop.f32.mrb[118].mxu1  ;;  %v3822_v60 = vadd.bf16 %v11617_v51, %v12447_v48  ;;  %v9865_v10 = vld [vmem:[#allocation8 + $0x878] ss:$12 sps:$4 sm:$0xff]  }
 0x35f   : > { %v8244_v29 = vpop.f32.mrb[119].mxu1  ;;  %6496 = vmatprep.subr.bf16.mxu0 %v9848_v31  ;;  %v12448_v31 = vpack.c.bf16 %v11347_v59, %v11335_v43  ;;  %v9866_v59 = vld [vmem:[#allocation8 + $0x7b8] ss:$12 sps:$4 sm:$0xff]  }
 0x360   : > { %v11634_v40 = vadd.f32 %v8244_v29, %v8243_v23  ;;  %v9861_v29 = vld [vmem:[#allocation8 + $0x7cc] ss:$12 sps:$4 sm:$0xff]   ;;  %v9864_v48 = vld [vmem:[#allocation8 + $0x7e4] ss:$12 sps:$4 sm:$0xff]  }
 0x361   : > { %6416 = vmatmul.mubr.bf16.vlgmr.msra.gmra.mrb[96].mxu0 %v3906_v53  ;;  %7030 = vmatmul.mubr.bf16.vlgmr.msra.gmra.mrb[224].mxu1 %v3906_v53  ;;  %v3835_v22 = vadd.bf16 %v11596_v37, %v12448_v31  ;;  %v3918_v53 = vmax.bf16 %v12276_v61, %v3822_v60  ;;  %v12450_v60 = vpack.c.bf16 %v11385_v1, %v11371_v34  ;;  %v9874_v31 = vld [vmem:[#allocation8 + $0x7d0] ss:$12 sps:$4 sm:$0xff]  }
 0x362   : > { %6425 = vmatprep.mubr.bf16.mxu0 %v3919_v35  ;;  %6497 = vmatpush1.bf16.msra.mxu0 %v9846_v2  ;;  %v9869_v34 = vld [vmem:[#allocation8 + $0x7fc] ss:$12 sps:$4 sm:$0xff]  }
 0x363   : > { %7037 = vmatprep.mubr.bf16.mxu1 %v3919_v35  ;;  %8515 = vmatpush3.bf16.msra.mxu1 %v9850_v14  ;;  %v3931_v43 = vmax.bf16 %v12276_v61, %v3835_v22  ;;  %v9873_v35 = vld [vmem:[#allocation8 + $0x890] ss:$12 sps:$4 sm:$0xff]  }
 0x364   : > { %v8246_v55 = vpop.f32.mrb[120].mxu1  ;;  %6498 = vmatprep.subr.bf16.mxu0 %v9853_v46  ;;  %8516 = vmatprep.subr.bf16.mxu1 %v9857_v32  ;;  %v9859_v46 = vld [vmem:[#allocation8 + $0x7c8] ss:$12 sps:$4 sm:$0xff]   ;;  %v12449_v32 = vpack.c.bf16 %v11339_v12, %v11331_v21  ;;  %v9862_v12 = vld [vmem:[#allocation8 + $0x7e0] ss:$12 sps:$4 sm:$0xff]  }
 0x365   : > { %v8247_v16 = vpop.f32.mrb[121].mxu1 }
 0x366   : > { %v11645_v23 = vadd.f32 %v8247_v16, %v8246_v55  ;;  %6499 = vmatpush1.bf16.msra.mxu0 %v9851_v18  ;;  %v8249_v25 = vpop.f32.mrb[122].mxu1  ;;  %v3834_v18 = vadd.bf16 %v11617_v51, %v12449_v32  ;;  %v12451_v55 = vld [vmem:[#allocation36_spill] sm:$0xff]  ;;  %v12452_v32 = vpack.c.bf16 %v11375_v26, %v11367_v5  ;;  %v9870_v26 = vld [vmem:[#allocation8 + $0x810] ss:$12 sps:$4 sm:$0xff]  }
 0x367   : > { %v8250_v2 = vpop.f32.mrb[123].mxu1  ;;  %6500 = vmatprep.subr.bf16.mxu0 %v9856_v13  ;;  %8517 = vmatpush3.bf16.msra.mxu1 %v9858_v42  ;;  %v3847_v13 = vadd.bf16 %v11596_v37, %v12450_v60  ;;  %v12453_v60 = vpack.c.bf16 %v11425_v3, %v11410_v27 }
 0x368   : > { %v11648_v14 = vadd.f32 %v8250_v2, %v8249_v25  ;;  %8518 = vmatprep.subr.bf16.mxu1 %v9865_v10  ;;  %v4390_v10 = vsub.s32 2, %v12451_v55  ;;  %v11662_v25 = vld [vmem:[#allocation10] sm:$0x7]  ;;  %v3930_v2 = vmax.bf16 %v12276_v61, %v3834_v18  ;;  %v3846_v18 = vadd.bf16 %v11617_v51, %v12452_v32 }
 0x369   : > { %6426 = vmatmul.mubr.bf16.gmra.mrb[100].mxu0 %v3918_v53  ;;  %7038 = vmatmul.mubr.bf16.gmra.mrb[228].mxu1 %v3918_v53  ;;  %v3943_v53 = vmax.bf16 %v12276_v61, %v3847_v13  ;;  %v3859_v13 = vadd.bf16 %v11596_v37, %v12453_v60  ;;  %v12455_v32 = vpack.c.bf16 %v11460_v6, %v11447_v63  ;;  %v9898_v60 = vld [vmem:[#allocation8 + $0x818] ss:$12 sps:$4 sm:$0xff]  }
 0x36a   : > { %6435 = vmatprep.mubr.bf16.mxu0 %v3931_v43  ;;  %6501 = vmatpush1.bf16.msra.mxu0 %v9854_v24 }
 0x36b   : > { %7045 = vmatprep.mubr.bf16.mxu1 %v3931_v43  ;;  %6502 = vmatprep.subr.bf16.mxu0 %v9861_v29  ;;  %v9881_v29 = vld [vmem:[#allocation8 + $0x8a8] ss:$12 sps:$4 sm:$0xff]  }
 0x36c   : > { %v8252_v42 = vpop.f32.mrb[124].mxu1  ;;  %8519 = vmatpush3.bf16.msra.mxu1 %v9866_v59  ;;  %v9882_v43 = vld [vmem:[#allocation8 + $0x7e8] ss:$12 sps:$4 sm:$0xff]   ;;  %v11669_v59 = vrot.slane %v11662_v25, %v4390_v10 }
 0x36d   : > { %v8253_v22 = vpop.f32.mrb[125].mxu1  ;;  %8520 = vmatprep.subr.bf16.mxu1 %v9873_v35  ;;  %v9867_v35 = vld [vmem:[#allocation8 + $0x7f8] ss:$12 sps:$4 sm:$0xff]  }
 0x36e   : > { %v11660_v16 = vadd.f32 %v8253_v22, %v8252_v42  ;;  %6503 = vmatpush1.bf16.msra.mxu0 %v9859_v46  ;;  %v8255_v21 = vpop.f32.mrb[126].mxu1  ;;  %v9889_v46 = vld [vmem:[#allocation8 + $0x8c0] ss:$12 sps:$4 sm:$0xff]   ;;  %v6644_v22 = vadd.f32 %v11545_v4, %v11669_v59  ;;  %v6647_v27 = vadd.f32 %v11548_v45, %v11669_v59  ;;  %v9897_v4 = vld [vmem:[#allocation8 + $0x8d8] ss:$12 sps:$4 sm:$0xff]   ;;  %v6655_v63 = vadd.f32 %v11562_v0, %v11669_v59 }
 0x36f   : > { %v8256_v24 = vpop.f32.mrb[127].mxu1  ;;  %6504 = vmatprep.subr.bf16.mxu0 %v9864_v48  ;;  %v9872_v48 = vld [vmem:[#allocation8 + $0x814] ss:$12 sps:$4 sm:$0xff]   ;;  %v9880_v45 = vld [vmem:[#allocation8 + $0x844] ss:$12 sps:$4 sm:$0xff]  }
 0x370   : > { %v11665_v1 = vadd.f32 %v8256_v24, %v8255_v21  ;;  %8521 = vmatpush3.bf16.msra.mxu1 %v9874_v31  ;;  %v9877_v24 = vld [vmem:[#allocation8 + $0x82c] ss:$12 sps:$4 sm:$0xff]  }
 0x371   : > { %6436 = vmatmul.mubr.bf16.gmra.mrb[104].mxu0 %v3930_v2  ;;  %7046 = vmatmul.mubr.bf16.gmra.mrb[232].mxu1 %v3930_v2 }
 0x372   : > { %6445 = vmatprep.mubr.bf16.mxu0 %v3943_v53  ;;  %6505 = vmatpush1.bf16.msra.mxu0 %v9862_v12  ;;  %v3942_v12 = vmax.bf16 %v12276_v61, %v3846_v18  ;;  %v3871_v18 = vadd.bf16 %v11596_v37, %v12455_v32  ;;  %v3717_v32 = vcombine.high %v11580_v39, %v11580_v39  ;;  %v9891_v39 = vld [vmem:[#allocation8 + $0x888] ss:$12 sps:$4 sm:$0xff]  }
 0x373   : > { %7053 = vmatprep.mubr.bf16.mxu1 %v3943_v53  ;;  %6506 = vmatprep.subr.bf16.mxu0 %v9869_v34  ;;  %v3955_v34 = vmax.bf16 %v12276_v61, %v3859_v13  ;;  %v9890_v53 = vld [vmem:[#allocation8 + $0x800] ss:$12 sps:$4 sm:$0xff]  }
 0x374   : > { %v8274_v42 = vpop.f32.mrb[128].mxu1  ;;  %8522 = vmatprep.subr.bf16.mxu1 %v9881_v29 }
 0x375   : > { %v8275_v31 = vpop.f32.mrb[129].mxu1  ;;  %8523 = vmatpush3.bf16.msra.mxu1 %v9882_v43  ;;  %v9875_v43 = vld [vmem:[#allocation8 + $0x828] ss:$12 sps:$4 sm:$0xff]  }
 0x376   : > { %v8276_v10 = vadd.f32 %v8275_v31, %v8274_v42  ;;  %6507 = vmatpush1.bf16.msra.mxu0 %v9867_v35  ;;  %v8277_v5 = vpop.f32.mrb[130].mxu1  ;;  %8524 = vmatprep.subr.bf16.mxu1 %v9889_v46  ;;  %v12454_v35 = vpack.c.bf16 %v11414_v41, %v11406_v52  ;;  %v6652_v42 = vadd.f32 %v11559_v56, %v11669_v59  ;;  %v9878_v52 = vld [vmem:[#allocation8 + $0x840] ss:$12 sps:$4 sm:$0xff]   ;;  %v9906_v56 = vld [vmem:[#allocation8 + $0x830] ss:$12 sps:$4 sm:$0xff]  }
 0x377   : > { %v8278_v21 = vpop.f32.mrb[131].mxu1  ;;  %6508 = vmatprep.subr.bf16.mxu0 %v9872_v48 }
 0x378   : > { %v11684_v3 = vadd.f32 %v8276_v10, %v6644_v22  ;;  %v8279_v2 = vadd.f32 %v8278_v21, %v8277_v5  ;;  %v3858_v46 = vadd.bf16 %v11617_v51, %v12454_v35  ;;  %v9885_v5 = vld [vmem:[#allocation8 + $0x85c] ss:$12 sps:$4 sm:$0xff]   ;;  %v3967_v21 = vmax.bf16 %v12276_v61, %v3871_v18 }
 0x379   : > { %6446 = vmatmul.mubr.bf16.gmra.mrb[108].mxu0 %v3942_v12  ;;  %7054 = vmatmul.mubr.bf16.gmra.mrb[236].mxu1 %v3942_v12  ;;  %v9905_v12 = vld [vmem:[#allocation8 + $0x8f0] ss:$12 sps:$4 sm:$0xff]  }
 0x37a   : > { %v11687_v29 = vadd.f32 %v8279_v2, %v6647_v27  ;;  %6455 = vmatprep.mubr.bf16.mxu0 %v3955_v34  ;;  %6509 = vmatpush1.bf16.msra.mxu0 %v9870_v26  ;;  %v3954_v10 = vmax.bf16 %v12276_v61, %v3858_v46  ;;  %v9883_v27 = vld [vmem:[#allocation8 + $0x858] ss:$12 sps:$4 sm:$0xff]   ;;  %v12456_v2 = vpack.c.bf16 %v11451_v54, %v11443_v50  ;;  %v9886_v54 = vld [vmem:[#allocation8 + $0x870] ss:$12 sps:$4 sm:$0xff]  }
 0x37b   : > { %7061 = vmatprep.mubr.bf16.mxu1 %v3955_v34  ;;  %6510 = vmatprep.subr.bf16.mxu0 %v9877_v24  ;;  %v9888_v34 = vld [vmem:[#allocation8 + $0x874] ss:$12 sps:$4 sm:$0xff]   ;;  %v6660_v46 = vadd.f32 %v11573_v20, %v11669_v59 }
 0x37c   : > { %v8280_v48 = vpop.f32.mrb[132].mxu1  ;;  %8525 = vmatpush3.bf16.msra.mxu1 %v9890_v53  ;;  %v3870_v0 = vadd.bf16 %v11617_v51, %v12456_v2  ;;  %v12457_v53 = vpack.c.bf16 %v11493_v8, %v11481_v58  ;;  %v9893_v58 = vld [vmem:[#allocation8 + $0x88c] ss:$12 sps:$4 sm:$0xff]   ;;  %v6663_v8 = vadd.f32 %v11576_v36, %v11669_v59  ;;  %v9896_v36 = vld [vmem:[#allocation8 + $0x8a4] ss:$12 sps:$4 sm:$0xff]  }
 0x37d   : > { %v8281_v13 = vpop.f32.mrb[133].mxu1  ;;  %8526 = vmatprep.subr.bf16.mxu1 %v9897_v4 }
 0x37e   : > { %v8282_v31 = vadd.f32 %v8281_v13, %v8280_v48  ;;  %6511 = vmatpush1.bf16.msra.mxu0 %v9875_v43  ;;  %v8283_v41 = vpop.f32.mrb[134].mxu1  ;;  %v3883_v4 = vadd.bf16 %v11596_v37, %v12457_v53  ;;  %v3966_v48 = vmax.bf16 %v12276_v61, %v3870_v0 }
 0x37f   : > { %v8284_v22 = vpop.f32.mrb[135].mxu1  ;;  %6512 = vmatprep.subr.bf16.mxu0 %v9880_v45 }
 0x380   : > { %v11702_v6 = vadd.f32 %v8282_v31, %v6652_v42  ;;  %v8285_v26 = vadd.f32 %v8284_v22, %v8283_v41  ;;  %8527 = vmatpush3.bf16.msra.mxu1 %v9898_v60  ;;  %v3979_v20 = vmax.bf16 %v12276_v61, %v3883_v4  ;;  %v3796_v31 = vpack.i.b16 %v3717_v32, %v3717_v32 }
 0x381   : > { %6456 = vmatmul.mubr.bf16.gmra.mrb[112].mxu0 %v3954_v10  ;;  %7062 = vmatmul.mubr.bf16.gmra.mrb[240].mxu1 %v3954_v10  ;;  %v12458_v41 = vpack.c.bf16 %v11485_v44, %v11477_v57  ;;  %v12459_v22 = vpack.c.bf16 %v11527_v47, %v11515_v11  ;;  %v3716_v57 = vcombine.high %v11602_v33, %v11602_v33  ;;  %v9901_v47 = vld [vmem:[#allocation8 + $0x8bc] ss:$12 sps:$4 sm:$0xff]   ;;  %v9899_v33 = vld [vmem:[#allocation8 + $0x8b8] ss:$12 sps:$4 sm:$0xff]  }
 0x382   : > { %v11705_v24 = vadd.f32 %v8285_v26, %v6655_v63  ;;  %6465 = vmatprep.mubr.bf16.mxu0 %v3967_v21  ;;  %6513 = vmatpush1.bf16.msra.mxu0 %v9878_v52  ;;  %v6668_v26 = vadd.f32 %v11592_v17, %v11669_v59  ;;  %v11740_v44 = vrot.slane %v3796_v31, %v10818_v38  ;;  %v12463_v31 = vld [vmem:[#allocation18_spill] sm:$0xff] }
 0x383   : > { %7069 = vmatprep.mubr.bf16.mxu1 %v3967_v21  ;;  %6514 = vmatprep.subr.bf16.mxu0 %v9885_v5  ;;  %v3882_v52 = vadd.bf16 %v11617_v51, %v12458_v41  ;;  %v3895_v10 = vadd.bf16 %v11596_v37, %v12459_v22  ;;  %v6671_v37 = vadd.f32 %v11598_v28, %v11669_v59  ;;  %v9904_v28 = vld [vmem:[#allocation8 + $0x8d4] ss:$12 sps:$4 sm:$0xff]  }
 0x384   : > { %v8286_v43 = vpop.f32.mrb[136].mxu1  ;;  %8528 = vmatprep.subr.bf16.mxu1 %v9905_v12  ;;  %v3789_v53 = vpack.i.b16 %v3716_v57, %v3716_v57  ;;  %v12460_v4 = vpack.c.bf16 %v11519_v9, %v11511_v19 }
 0x385   : > { %v8287_v35 = vpop.f32.mrb[137].mxu1  ;;  %8529 = vmatpush3.bf16.msra.mxu1 %v9906_v56  ;;  %v9894_v56 = vld [vmem:[#allocation8 + $0x8a0] ss:$12 sps:$4 sm:$0xff]   ;;  %v3978_v11 = vmax.bf16 %v12276_v61, %v3882_v52  ;;  %v3991_v0 = vmax.bf16 %v12276_v61, %v3895_v10 }
 0x386   : > { %v8288_v45 = vadd.f32 %v8287_v35, %v8286_v43  ;;  %6515 = vmatpush1.bf16.msra.mxu0 %v9883_v27  ;;  %v8289_v50 = vpop.f32.mrb[138].mxu1  ;;  %v3894_v43 = vadd.bf16 %v11617_v51, %v12460_v4  ;;  %v12461_v35 = vpack.c.bf16 %v11281_v15, %v11269_v7  ;;  %v11761_v19 = vrot.slane %v3789_v53, %v10818_v38  ;;  %v12471_v4 = vld [vmem:[#allocation24_spill] sm:$0xff] }
 0x387   : > { %v8290_v18 = vpop.f32.mrb[139].mxu1  ;;  %6516 = vmatprep.subr.bf16.mxu0 %v9888_v34  ;;  %v6679_v7 = vadd.f32 %v11620_v62, %v11669_v59  ;;  %v12465_v62 = vld [vmem:[#allocation20_spill] sm:$0xff] }
 0x388   : > { %v11722_v60 = vadd.f32 %v8288_v45, %v6660_v46  ;;  %v8291_v13 = vadd.f32 %v8290_v18, %v8289_v50  ;;  %v3813_v46 = vadd.bf16 %v11740_v44, %v12461_v35  ;;  %v3990_v51 = vmax.bf16 %v12276_v61, %v3894_v43  ;;  %v12472_v43 = vld [vmem:[#allocation25_spill] sm:$0xff] }
 0x389   : > { %6466 = vmatmul.mubr.bf16.gmra.mrb[116].mxu0 %v3966_v48  ;;  %7070 = vmatmul.mubr.bf16.gmra.mrb[244].mxu1 %v3966_v48  ;;  %v9902_v48 = vld [vmem:[#allocation8 + $0x8d0] ss:$12 sps:$4 sm:$0xff]  }
 0x38a   : > { %v11725_v42 = vadd.f32 %v8291_v13, %v6663_v8  ;;  %6475 = vmatprep.mubr.bf16.mxu0 %v3979_v20  ;;  %6517 = vmatpush1.bf16.msra.mxu0 %v9886_v54  ;;  %v6676_v54 = vadd.f32 %v11614_v49, %v11669_v59  ;;  %v3909_v49 = vmax.bf16 %v12276_v61, %v3813_v46 }
 0x38b   : > { %7077 = vmatprep.mubr.bf16.mxu1 %v3979_v20  ;;  %6518 = vmatprep.subr.bf16.mxu0 %v9893_v58  ;;  %v9909_v58 = vld [vmem:[#allocation8 + $0x8ec] ss:$12 sps:$4 sm:$0xff]   ;;  %v9907_v20 = vld [vmem:[#allocation8 + $0x8e8] ss:$12 sps:$4 sm:$0xff]  }
 0x38c   : > { %v8292_v5 = vpop.f32.mrb[140].mxu1 }
 0x38d   : > { %v8293_v63 = vpop.f32.mrb[141].mxu1 }
 0x38e   : > { %v8294_v21 = vadd.f32 %v8293_v63, %v8292_v5  ;;  %6519 = vmatpush1.bf16.msra.mxu0 %v9891_v39  ;;  %v8295_v12 = vpop.f32.mrb[142].mxu1  ;;  %v12462_v39 = vld [vmem:[#allocation16_spill] sm:$0xff] }
 0x38f   : > { %v8296_v27 = vpop.f32.mrb[143].mxu1  ;;  %6520 = vmatprep.subr.bf16.mxu0 %v9896_v36  ;;  %v12464_v41 = vpack.c.bf16 %v12462_v39, %v12463_v31  ;;  %v12466_v36 = vld [vmem:[#allocation21_spill] sm:$0xff]  ;;  %v12477_v39 = vld [vmem:[#allocation28_spill] sm:$0xff] }
 0x390   : > { %v11745_v2 = vadd.f32 %v8294_v21, %v6668_v26  ;;  %v8297_v17 = vadd.f32 %v8296_v27, %v8295_v12  ;;  %v12467_v22 = vpack.c.bf16 %v12465_v62, %v12466_v36  ;;  %v6684_v26 = vadd.f32 %v11631_v30, %v11669_v59  ;;  %v12468_v30 = vld [vmem:[#allocation22_spill] sm:$0xff]  ;;  %v12478_v31 = vld [vmem:[#allocation29_spill] sm:$0xff] }
 0x391   : > { %6476 = vmatmul.mubr.bf16.gmra.mrb[120].mxu0 %v3978_v11  ;;  %7078 = vmatmul.mubr.bf16.gmra.mrb[248].mxu1 %v3978_v11  ;;  %v3812_v52 = vadd.bf16 %v11761_v19, %v12464_v41  ;;  %v6687_v27 = vadd.f32 %v11634_v40, %v11669_v59  ;;  %v12479_v41 = vpack.c.bf16 %v12477_v39, %v12478_v31 }
 0x392   : > { %v11748_v34 = vadd.f32 %v8297_v17, %v6671_v37  ;;  %6485 = vmatprep.mubr.bf16.mxu0 %v3991_v0  ;;  %6521 = vmatpush1.bf16.msra.mxu0 %v9894_v56  ;;  %v3825_v10 = vadd.bf16 %v11740_v44, %v12467_v22  ;;  %v6700_v36 = vadd.f32 %v11660_v16, %v11669_v59  ;;  %v12480_v16 = vld [vmem:[#allocation30_spill] sm:$0xff] }
 0x393   : > { %7085 = vmatprep.mubr.bf16.mxu1 %v3991_v0  ;;  %6522 = vmatprep.subr.bf16.mxu0 %v9901_v47  ;;  %v3908_v56 = vmax.bf16 %v12276_v61, %v3812_v52  ;;  %v12469_v0 = vld [vmem:[#allocation23_spill] sm:$0xff] }
 0x394   : > { %v8298_v45 = vpop.f32.mrb[144].mxu1  ;;  %v3921_v37 = vmax.bf16 %v12276_v61, %v3825_v10 }
 0x395   : > { %v8299_v50 = vpop.f32.mrb[145].mxu1 }
 0x396   : > { %v8300_v32 = vadd.f32 %v8299_v50, %v8298_v45  ;;  %6523 = vmatpush1.bf16.msra.mxu0 %v9899_v33  ;;  %v8301_v18 = vpop.f32.mrb[146].mxu1  ;;  %v12470_v33 = vpack.c.bf16 %v12468_v30, %v12469_v0  ;;  %v6692_v45 = vadd.f32 %v11645_v23, %v11669_v59  ;;  %v12474_v23 = vld [vmem:[#allocation26_spill] sm:$0xff]  ;;  %v12483_v30 = vld [vmem:[#allocation32_spill] sm:$0xff]  ;;  %v12484_v0 = vld [vmem:[#allocation33_spill] sm:$0xff] }
 0x397   : > { %v8302_v9 = vpop.f32.mrb[147].mxu1  ;;  %6524 = vmatprep.subr.bf16.mxu0 %v9904_v28  ;;  %v12473_v28 = vpack.c.bf16 %v12471_v4, %v12472_v43 }
 0x398   : > { %v11766_v15 = vadd.f32 %v8300_v32, %v6676_v54  ;;  %v8303_v8 = vadd.f32 %v8302_v9, %v8301_v18  ;;  %v3824_v53 = vadd.bf16 %v11761_v19, %v12470_v33  ;;  %v12485_v33 = vpack.c.bf16 %v12483_v30, %v12484_v0 }
 0x399   : > { %6486 = vmatmul.mubr.bf16.gmra.mrb[124].mxu0 %v3990_v51  ;;  %7086 = vmatmul.mubr.bf16.gmra.mrb[252].mxu1 %v3990_v51  ;;  %v3837_v40 = vadd.bf16 %v11740_v44, %v12473_v28 }
 0x39a   : > { %v11769_v13 = vadd.f32 %v8303_v8, %v6679_v7  ;;  %6525 = vmatpush1.bf16.msra.mxu0 %v9902_v48  ;;  %6528 = vmatprep.mubr.bf16.mxu0 %v3909_v49  ;;  %v3920_v18 = vmax.bf16 %v12276_v61, %v3824_v53  ;;  %v6695_v48 = vadd.f32 %v11648_v14, %v11669_v59  ;;  %v12475_v8 = vld [vmem:[#allocation27_spill] sm:$0xff] }
 0x39b   : > { %7126 = vmatprep.mubr.bf16.mxu1 %v3909_v49  ;;  %6526 = vmatprep.subr.bf16.mxu0 %v9909_v58  ;;  %v3933_v58 = vmax.bf16 %v12276_v61, %v3837_v40  ;;  %v12476_v49 = vpack.c.bf16 %v12474_v23, %v12475_v8  ;;  %v3849_v14 = vadd.bf16 %v11740_v44, %v12479_v41 }
 0x39c   : > { %v8304_v5 = vpop.f32.mrb[148].mxu1 }
 0x39d   : > { %v8305_v63 = vpop.f32.mrb[149].mxu1 }
 0x39e   : > { %v8306_v21 = vadd.f32 %v8305_v63, %v8304_v5  ;;  %6527 = vmatpush1.bf16.msra.mxu0 %v9907_v20  ;;  %v8307_v12 = vpop.f32.mrb[150].mxu1  ;;  %v3836_v20 = vadd.bf16 %v11761_v19, %v12476_v49 }
 0x39f   : > { %v8308_v57 = vpop.f32.mrb[151].mxu1 }
 0x3a0   : > { %v11784_v11 = vadd.f32 %v8306_v21, %v6684_v26  ;;  %v8309_v47 = vadd.f32 %v8308_v57, %v8307_v12  ;;  %v3932_v63 = vmax.bf16 %v12276_v61, %v3836_v20  ;;  %v6703_v26 = vadd.f32 %v11665_v1, %v11669_v59 }
 0x3a1   : > { %6529 = vmatmul.mubr.bf16.vlgmr.msra.gmra.mrb[96].mxu0 %v3908_v56  ;;  %7127 = vmatmul.mubr.bf16.vlgmr.msra.gmra.mrb[0].mxu1 %v3908_v56  ;;  %v3945_v56 = vmax.bf16 %v12276_v61, %v3849_v14  ;;  %v3861_v1 = vadd.bf16 %v11740_v44, %v12485_v33 }
 0x3a2   : > { %v11787_v17 = vadd.f32 %v8309_v47, %v6687_v27  ;;  %6538 = vmatprep.mubr.bf16.mxu0 %v3921_v37  ;;  %7134 = vmatprep.mubr.bf16.mxu1 %v3921_v37  ;;  %v12481_v27 = vld [vmem:[#allocation31_spill] sm:$0xff] }
 0x3a3   : > { %v12482_v47 = vpack.c.bf16 %v12480_v16, %v12481_v27 }
 0x3a4   : > { %v8310_v35 = vpop.f32.mrb[152].mxu1 }
 0x3a5   : > { %v8311_v46 = vpop.f32.mrb[153].mxu1  ;;  %v3848_v37 = vadd.bf16 %v11761_v19, %v12482_v47 }
 0x3a6   : > { %v8312_v50 = vadd.f32 %v8311_v46, %v8310_v35  ;;  %v8313_v54 = vpop.f32.mrb[154].mxu1 }
 0x3a7   : > { %v8314_v32 = vpop.f32.mrb[155].mxu1  ;;  %v3944_v40 = vmax.bf16 %v12276_v61, %v3848_v37 }
 0x3a8   : > { %v11802_v9 = vadd.f32 %v8312_v50, %v6692_v45  ;;  %v8315_v51 = vadd.f32 %v8314_v32, %v8313_v54  ;;  %v3957_v45 = vmax.bf16 %v12276_v61, %v3861_v1  ;;  %v12486_v54 = vld [vmem:[#allocation34_spill] sm:$0xff]  ;;  %v12487_v32 = vld [vmem:[#allocation35_spill] sm:$0xff] }
 0x3a9   : > { %6539 = vmatmul.mubr.bf16.gmra.mrb[100].mxu0 %v3920_v18  ;;  %7135 = vmatmul.mubr.bf16.gmra.mrb[4].mxu1 %v3920_v18  ;;  %v12488_v18 = vpack.c.bf16 %v12486_v54, %v12487_v32 }
 0x3aa   : > { %v11805_v7 = vadd.f32 %v8315_v51, %v6695_v48  ;;  %6548 = vmatprep.mubr.bf16.mxu0 %v3933_v58  ;;  %7142 = vmatprep.mubr.bf16.mxu1 %v3933_v58  ;;  %v12489_v51 = vld [vmem:[#allocation62_spill] sm:$0xff]  ;;  %v12490_v58 = vld [vmem:[#allocation60_spill] sm:$0xff] }
 0x3ab   : > { %v3860_v48 = vadd.bf16 %v11761_v19, %v12488_v18  ;;  %v12491_v23 = vpack.c.bf16 %v12489_v51, %v12490_v58 }
 0x3ac   : > { %v8316_v52 = vpop.f32.mrb[156].mxu1 }
 0x3ad   : > { %v8317_v62 = vpop.f32.mrb[157].mxu1 }
 0x3ae   : > { %v8318_v22 = vadd.f32 %v8317_v62, %v8316_v52  ;;  %v8319_v10 = vpop.f32.mrb[158].mxu1 }
 0x3af   : > { %v8320_v5 = vpop.f32.mrb[159].mxu1 }
 0x3b0   : > { %v11820_v21 = vadd.f32 %v8318_v22, %v6700_v36  ;;  %v8321_v12 = vadd.f32 %v8320_v5, %v8319_v10  ;;  %v12492_v36 = vld [vmem:[#allocation61_spill] sm:$0xff]  ;;  %v12493_v22 = vld [vmem:[#allocation59_spill] sm:$0xff] }
 0x3b1   : > { %6549 = vmatmul.mubr.bf16.gmra.mrb[104].mxu0 %v3932_v63  ;;  %7143 = vmatmul.mubr.bf16.gmra.mrb[8].mxu1 %v3932_v63  ;;  %v12494_v10 = vpack.c.bf16 %v12492_v36, %v12493_v22  ;;  %v12495_v63 = vld [vmem:[#allocation64_spill] sm:$0xff] }
 0x3b2   : > { %v11823_v57 = vadd.f32 %v8321_v12, %v6703_v26  ;;  %6558 = vmatprep.mubr.bf16.mxu0 %v3945_v56  ;;  %7150 = vmatprep.mubr.bf16.mxu1 %v3945_v56  ;;  %v12496_v26 = vld [vmem:[#allocation38_spill] sm:$0xff] }
 0x3b3   : > { %v3872_v5 = vadd.bf16 %v11761_v19, %v12494_v10  ;;  %v12497_v12 = vpack.c.bf16 %v12495_v63, %v12496_v26 }
 0x3b4   : > { %v8338_v59 = vpop.f32.mrb[160].mxu1 }
 0x3b5   : > { %v8339_v53 = vpop.f32.mrb[161].mxu1 }
 0x3b6   : > { %v8340_v4 = vadd.f32 %v8339_v53, %v8338_v59  ;;  %v8341_v43 = vpop.f32.mrb[162].mxu1  ;;  %v12498_v59 = vld [vmem:[#allocation63_spill] sm:$0xff]  ;;  %v12499_v53 = vld [vmem:[#allocation40_spill] sm:$0xff] }
 0x3b7   : > { %v8342_v28 = vpop.f32.mrb[163].mxu1 }
 0x3b8   : > { %v11835_v35 = vadd.f32 %v8340_v4, %v11684_v3  ;;  %v8343_v46 = vadd.f32 %v8342_v28, %v8341_v43  ;;  %v3873_v3 = vadd.bf16 %v11740_v44, %v12491_v23  ;;  %v12500_v4 = vpack.c.bf16 %v12498_v59, %v12499_v53  ;;  %v12501_v28 = vld [vmem:[#allocation42_spill] sm:$0xff] }
 0x3b9   : > { %6559 = vmatmul.mubr.bf16.gmra.mrb[108].mxu0 %v3944_v40  ;;  %7151 = vmatmul.mubr.bf16.gmra.mrb[12].mxu1 %v3944_v40  ;;  %v12502_v40 = vld [vmem:[#allocation37_spill] sm:$0xff] }
 0x3ba   : > { %v11839_v50 = vadd.f32 %v8343_v46, %v11687_v29  ;;  %6568 = vmatprep.mubr.bf16.mxu0 %v3957_v45  ;;  %7158 = vmatprep.mubr.bf16.mxu1 %v3957_v45  ;;  %v3956_v29 = vmax.bf16 %v12276_v61, %v3860_v48  ;;  %v3969_v52 = vmax.bf16 %v12276_v61, %v3873_v3 }
 0x3bb   : > { %v3884_v43 = vadd.bf16 %v11761_v19, %v12500_v4  ;;  %v12503_v46 = vpack.c.bf16 %v12501_v28, %v12502_v40 }
 0x3bc   : > { %v8344_v8 = vpop.f32.mrb[164].mxu1 }
 0x3bd   : > { %v8345_v49 = vpop.f32.mrb[165].mxu1 }
 0x3be   : > { %v8346_v20 = vadd.f32 %v8345_v49, %v8344_v8  ;;  %v8347_v39 = vpop.f32.mrb[166].mxu1  ;;  %v12505_v8 = vld [vmem:[#allocation39_spill] sm:$0xff] }
 0x3bf   : > { %v8348_v31 = vpop.f32.mrb[167].mxu1 }
 0x3c0   : > { %v11851_v41 = vadd.f32 %v8346_v20, %v11702_v6  ;;  %v8349_v14 = vadd.f32 %v8348_v31, %v8347_v39  ;;  %v3885_v6 = vadd.bf16 %v11740_v44, %v12497_v12 }
 0x3c1   : > { %6569 = vmatmul.mubr.bf16.gmra.mrb[112].mxu0 %v3956_v29  ;;  %7159 = vmatmul.mubr.bf16.gmra.mrb[16].mxu1 %v3956_v29 }
 0x3c2   : > { %v11855_v62 = vadd.f32 %v8349_v14, %v11705_v24  ;;  %6578 = vmatprep.mubr.bf16.mxu0 %v3969_v52  ;;  %7166 = vmatprep.mubr.bf16.mxu1 %v3969_v52  ;;  %v3968_v24 = vmax.bf16 %v12276_v61, %v3872_v5  ;;  %v3981_v33 = vmax.bf16 %v12276_v61, %v3885_v6 }
 0x3c4   : > { %v8350_v56 = vpop.f32.mrb[168].mxu1 }
 0x3c5   : > { %v8351_v16 = vpop.f32.mrb[169].mxu1 }
 0x3c6   : > { %v8352_v27 = vadd.f32 %v8351_v16, %v8350_v56  ;;  %v8353_v47 = vpop.f32.mrb[170].mxu1 }
 0x3c7   : > { %v8354_v37 = vpop.f32.mrb[171].mxu1 }
 0x3c8   : > { %v11867_v30 = vadd.f32 %v8352_v27, %v11722_v60  ;;  %v8355_v0 = vadd.f32 %v8354_v37, %v8353_v47  ;;  %v3897_v60 = vadd.bf16 %v11740_v44, %v12503_v46  ;;  %v12504_v44 = vld [vmem:[#allocation44_spill] sm:$0xff] }
 0x3c9   : > { %6579 = vmatmul.mubr.bf16.gmra.mrb[116].mxu0 %v3968_v24  ;;  %7167 = vmatmul.mubr.bf16.gmra.mrb[20].mxu1 %v3968_v24  ;;  %v12506_v49 = vpack.c.bf16 %v12504_v44, %v12505_v8 }
 0x3ca   : > { %v11871_v1 = vadd.f32 %v8355_v0, %v11725_v42  ;;  %6588 = vmatprep.mubr.bf16.mxu0 %v3981_v33  ;;  %7174 = vmatprep.mubr.bf16.mxu1 %v3981_v33  ;;  %v3980_v42 = vmax.bf16 %v12276_v61, %v3884_v43  ;;  %v3993_v23 = vmax.bf16 %v12276_v61, %v3897_v60 }
 0x3cb   : > { %v3896_v20 = vadd.bf16 %v11761_v19, %v12506_v49 }
 0x3cc   : > { %v8356_v45 = vpop.f32.mrb[172].mxu1 }
 0x3cd   : > { %v8357_v54 = vpop.f32.mrb[173].mxu1  ;;  %v3992_v52 = vmax.bf16 %v12276_v61, %v3896_v20 }
 0x3ce   : > { %v8358_v32 = vadd.f32 %v8357_v54, %v8356_v45  ;;  %v8359_v18 = vpop.f32.mrb[174].mxu1 }
 0x3cf   : > { %v8360_v48 = vpop.f32.mrb[175].mxu1 }
 0x3d0   : > { %v11883_v51 = vadd.f32 %v8358_v32, %v11745_v2  ;;  %v8361_v58 = vadd.f32 %v8360_v48, %v8359_v18 }
 0x3d1   : > { %6589 = vmatmul.mubr.bf16.gmra.mrb[120].mxu0 %v3980_v42  ;;  %7175 = vmatmul.mubr.bf16.gmra.mrb[24].mxu1 %v3980_v42 }
 0x3d2   : > { %v11887_v3 = vadd.f32 %v8361_v58, %v11748_v34  ;;  %6598 = vmatprep.mubr.bf16.mxu0 %v3993_v23  ;;  %7182 = vmatprep.mubr.bf16.mxu1 %v3993_v23 }
 0x3d4   : > { %v8362_v39 = vpop.f32.mrb[176].mxu1 }
 0x3d5   : > { %v8363_v31 = vpop.f32.mrb[177].mxu1 }
 0x3d6   : > { %v8364_v29 = vadd.f32 %v8363_v31, %v8362_v39  ;;  %v8365_v2 = vpop.f32.mrb[178].mxu1 }
 0x3d7   : > { %v8366_v14 = vpop.f32.mrb[179].mxu1 }
 0x3d8   : > { %v11895_v36 = vadd.f32 %v8364_v29, %v11766_v15  ;;  %v8367_v22 = vadd.f32 %v8366_v14, %v8365_v2 }
 0x3d9   : > { %6599 = vmatmul.mubr.bf16.gmra.mrb[124].mxu0 %v3992_v52  ;;  %7183 = vmatmul.mubr.bf16.gmra.mrb[28].mxu1 %v3992_v52 }
 0x3da   : > { %v11898_v34 = vadd.f32 %v8367_v22, %v11769_v13 }
 0x3dc   : > { %v8368_v10 = vpop.f32.mrb[180].mxu1 }
 0x3dd   : > { %v8369_v5 = vpop.f32.mrb[181].mxu1 }
 0x3de   : > { %v8370_v63 = vadd.f32 %v8369_v5, %v8368_v10  ;;  %v8371_v19 = vpop.f32.mrb[182].mxu1 }
 0x3df   : > { %v8372_v26 = vpop.f32.mrb[183].mxu1 }
 0x3e0   : > { %v11901_v12 = vadd.f32 %v8370_v63, %v11784_v11  ;;  %v8373_v6 = vadd.f32 %v8372_v26, %v8371_v19 }
 0x3e2   : > { %v11904_v61 = vadd.f32 %v8373_v6, %v11787_v17 }
 0x3e4   : > { %v8374_v15 = vpop.f32.mrb[184].mxu1 }
 0x3e5   : > { %v8375_v56 = vpop.f32.mrb[185].mxu1 }
 0x3e6   : > { %v8376_v16 = vadd.f32 %v8375_v56, %v8374_v15  ;;  %v8377_v27 = vpop.f32.mrb[186].mxu1 }
 0x3e7   : > { %v8378_v47 = vpop.f32.mrb[187].mxu1 }
 0x3e8   : > { %v11907_v13 = vadd.f32 %v8376_v16, %v11802_v9  ;;  %v8379_v37 = vadd.f32 %v8378_v47, %v8377_v27 }
 0x3ea   : > { %v11910_v24 = vadd.f32 %v8379_v37, %v11805_v7 }
 0x3ec   : > { %v8380_v0 = vpop.f32.mrb[188].mxu1 }
 0x3ed   : > { %v8381_v33 = vpop.f32.mrb[189].mxu1 }
 0x3ee   : > { %v8382_v11 = vadd.f32 %v8381_v33, %v8380_v0  ;;  %v8383_v59 = vpop.f32.mrb[190].mxu1 }
 0x3ef   : > { %v8384_v53 = vpop.f32.mrb[191].mxu1 }
 0x3f0   : > { %v11913_v17 = vadd.f32 %v8382_v11, %v11820_v21  ;;  %v8385_v4 = vadd.f32 %v8384_v53, %v8383_v59 }
 0x3f2   : > { %v11916_v43 = vadd.f32 %v8385_v4, %v11823_v57 }
 0x3f4   : > { %v8402_v28 = vpop.f32.mrb[192].mxu1 }
 0x3f5   : > { %v8403_v40 = vpop.f32.mrb[193].mxu1 }
 0x3f6   : > { %v8404_v9 = vadd.f32 %v8403_v40, %v8402_v28  ;;  %v8405_v46 = vpop.f32.mrb[194].mxu1 }
 0x3f7   : > { %v8406_v60 = vpop.f32.mrb[195].mxu1 }
 0x3f8   : > { %v11919_v7 = vadd.f32 %v8404_v9, %v11835_v35  ;;  %v8407_v45 = vadd.f32 %v8406_v60, %v8405_v46 }
 0x3fa   : > { %v11922_v54 = vadd.f32 %v8407_v45, %v11839_v50 }
 0x3fc   : > { %v8408_v32 = vpop.f32.mrb[196].mxu1 }
 0x3fd   : > { %v8409_v18 = vpop.f32.mrb[197].mxu1 }
 0x3fe   : > { %v8410_v21 = vadd.f32 %v8409_v18, %v8408_v32  ;;  %v8411_v48 = vpop.f32.mrb[198].mxu1 }
 0x3ff   : > { %v8412_v42 = vpop.f32.mrb[199].mxu1 }
 0x400   : > { %v11925_v57 = vadd.f32 %v8410_v21, %v11851_v41  ;;  %v8413_v58 = vadd.f32 %v8412_v42, %v8411_v48 }
 0x402   : > { %v11928_v23 = vadd.f32 %v8413_v58, %v11855_v62 }
 0x404   : > { %v8414_v44 = vpop.f32.mrb[200].mxu1 }
 0x405   : > { %v8415_v8 = vpop.f32.mrb[201].mxu1 }
 0x406   : > { %v8416_v35 = vadd.f32 %v8415_v8, %v8414_v44  ;;  %v8417_v49 = vpop.f32.mrb[202].mxu1 }
 0x407   : > { %v8418_v20 = vpop.f32.mrb[203].mxu1 }
 0x408   : > { %v11931_v50 = vadd.f32 %v8416_v35, %v11867_v30  ;;  %v8419_v39 = vadd.f32 %v8418_v20, %v8417_v49 }
 0x40a   : > { %v11934_v31 = vadd.f32 %v8419_v39, %v11871_v1 }
 0x40c   : > { %v8420_v29 = vpop.f32.mrb[204].mxu1 }
 0x40d   : > { %v8421_v2 = vpop.f32.mrb[205].mxu1 }
 0x40e   : > { %v8422_v41 = vadd.f32 %v8421_v2, %v8420_v29  ;;  %v8423_v14 = vpop.f32.mrb[206].mxu1 }
 0x40f   : > { %v8424_v52 = vpop.f32.mrb[207].mxu1 }
 0x410   : > { %v11937_v62 = vadd.f32 %v8422_v41, %v11883_v51  ;;  %v8425_v22 = vadd.f32 %v8424_v52, %v8423_v14 }
 0x412   : > { %v11940_v10 = vadd.f32 %v8425_v22, %v11887_v3 }
 0x414   : > { %v8426_v5 = vpop.f32.mrb[208].mxu1 }
 0x415   : > { %v8427_v63 = vpop.f32.mrb[209].mxu1 }
 0x416   : > { %v8428_v30 = vadd.f32 %v8427_v63, %v8426_v5  ;;  %v8429_v19 = vpop.f32.mrb[210].mxu1 }
 0x417   : > { %v8430_v26 = vpop.f32.mrb[211].mxu1 }
 0x418   : > { %v11943_v1 = vadd.f32 %v8428_v30, %v11895_v36  ;;  %v8431_v6 = vadd.f32 %v8430_v26, %v8429_v19 }
 0x41a   : > { %v11946_v15 = vadd.f32 %v8431_v6, %v11898_v34 }
 0x41c   : > { %v8432_v56 = vpop.f32.mrb[212].mxu1 }
 0x41d   : > { %v8433_v16 = vpop.f32.mrb[213].mxu1 }
 0x41e   : > { %v8434_v51 = vadd.f32 %v8433_v16, %v8432_v56  ;;  %v8435_v27 = vpop.f32.mrb[214].mxu1 }
 0x41f   : > { %v8436_v47 = vpop.f32.mrb[215].mxu1 }
 0x420   : > { %v11949_v3 = vadd.f32 %v8434_v51, %v11901_v12  ;;  %v8437_v37 = vadd.f32 %v8436_v47, %v8435_v27 }
 0x422   : > { %v11952_v0 = vadd.f32 %v8437_v37, %v11904_v61 }
 0x424   : > { %v8438_v33 = vpop.f32.mrb[216].mxu1 }
 0x425   : > { %v8439_v11 = vpop.f32.mrb[217].mxu1 }
 0x426   : > { %v8440_v36 = vadd.f32 %v8439_v11, %v8438_v33  ;;  %v8441_v59 = vpop.f32.mrb[218].mxu1 }
 0x427   : > { %v8442_v53 = vpop.f32.mrb[219].mxu1 }
 0x428   : > { %v11955_v34 = vadd.f32 %v8440_v36, %v11907_v13  ;;  %v8443_v4 = vadd.f32 %v8442_v53, %v8441_v59 }
 0x42a   : > { %v11958_v28 = vadd.f32 %v8443_v4, %v11910_v24 }
 0x42c   : > { %v8444_v40 = vpop.f32.mrb[220].mxu1 }
 0x42d   : > { %v8445_v9 = vpop.f32.mrb[221].mxu1 }
 0x42e   : > { %v8446_v12 = vadd.f32 %v8445_v9, %v8444_v40  ;;  %v8447_v46 = vpop.f32.mrb[222].mxu1 }
 0x42f   : > { %v8448_v60 = vpop.f32.mrb[223].mxu1 }
 0x430   : > { %v11961_v61 = vadd.f32 %v8446_v12, %v11913_v17  ;;  %v8449_v45 = vadd.f32 %v8448_v60, %v8447_v46 }
 0x432   : > { %v11964_v32 = vadd.f32 %v8449_v45, %v11916_v43 }
 0x434   : > { %v8466_v18 = vpop.f32.mrb[224].mxu1 }
 0x435   : > { %v8467_v21 = vpop.f32.mrb[225].mxu1 }
 0x436   : > { %v8468_v13 = vadd.f32 %v8467_v21, %v8466_v18  ;;  %v8469_v48 = vpop.f32.mrb[226].mxu1 }
 0x437   : > { %v8470_v42 = vpop.f32.mrb[227].mxu1 }
 0x438   : > { %v11967_v24 = vadd.f32 %v8468_v13, %v11919_v7  ;;  %v8471_v58 = vadd.f32 %v8470_v42, %v8469_v48  ;;  %v4386_v42 = vsub.s32 1, %v12451_v55 }
 0x43a   : > { %v11970_v44 = vadd.f32 %v8471_v58, %v11922_v54 }
 0x43c   : > { %v8472_v8 = vpop.f32.mrb[228].mxu1 }
 0x43d   : > { %v8473_v35 = vpop.f32.mrb[229].mxu1 }
 0x43e   : > { %v8474_v17 = vadd.f32 %v8473_v35, %v8472_v8  ;;  %v8475_v49 = vpop.f32.mrb[230].mxu1  ;;  %v12014_v35 = vrot.slane %v11662_v25, %v10818_v38 }
 0x43f   : > { %v8476_v20 = vpop.f32.mrb[231].mxu1 }
 0x440   : > { %v11973_v43 = vadd.f32 %v8474_v17, %v11925_v57  ;;  %v8477_v39 = vadd.f32 %v8476_v20, %v8475_v49 }
 0x442   : > { %v11976_v29 = vadd.f32 %v8477_v39, %v11928_v23 }
 0x444   : > { %v8478_v2 = vpop.f32.mrb[232].mxu1 }
 0x445   : > { %v8479_v41 = vpop.f32.mrb[233].mxu1 }
 0x446   : > { %v8480_v7 = vadd.f32 %v8479_v41, %v8478_v2  ;;  %v8481_v14 = vpop.f32.mrb[234].mxu1 }
 0x447   : > { %v8482_v52 = vpop.f32.mrb[235].mxu1 }
 0x448   : > { %v11979_v54 = vadd.f32 %v8480_v7, %v11931_v50  ;;  %v8483_v22 = vadd.f32 %v8482_v52, %v8481_v14 }
 0x44a   : > { %v11982_v5 = vadd.f32 %v8483_v22, %v11934_v31 }
 0x44c   : > { %v8484_v63 = vpop.f32.mrb[236].mxu1 }
 0x44d   : > { %v8485_v30 = vpop.f32.mrb[237].mxu1 }
 0x44e   : > { %v8486_v57 = vadd.f32 %v8485_v30, %v8484_v63  ;;  %v8487_v19 = vpop.f32.mrb[238].mxu1 }
 0x44f   : > { %v8488_v26 = vpop.f32.mrb[239].mxu1 }
 0x450   : > { %v11985_v23 = vadd.f32 %v8486_v57, %v11937_v62  ;;  %v8489_v6 = vadd.f32 %v8488_v26, %v8487_v19 }
 0x452   : > { %v11988_v56 = vadd.f32 %v8489_v6, %v11940_v10 }
 0x454   : > { %v8490_v16 = vpop.f32.mrb[240].mxu1 }
 0x455   : > { %v8491_v51 = vpop.f32.mrb[241].mxu1 }
 0x456   : > { %v8492_v50 = vadd.f32 %v8491_v51, %v8490_v16  ;;  %v8493_v27 = vpop.f32.mrb[242].mxu1 }
 0x457   : > { %v8494_v47 = vpop.f32.mrb[243].mxu1 }
 0x458   : > { %v11991_v31 = vadd.f32 %v8492_v50, %v11943_v1  ;;  %v8495_v37 = vadd.f32 %v8494_v47, %v8493_v27 }
 0x45a   : > { %v11994_v33 = vadd.f32 %v8495_v37, %v11946_v15 }
 0x45c   : > { %v8496_v11 = vpop.f32.mrb[244].mxu1 }
 0x45d   : > { %v8497_v36 = vpop.f32.mrb[245].mxu1 }
 0x45e   : > { %v8498_v62 = vadd.f32 %v8497_v36, %v8496_v11  ;;  %v8499_v59 = vpop.f32.mrb[246].mxu1 }
 0x45f   : > { %v8500_v53 = vpop.f32.mrb[247].mxu1 }
 0x460   : > { %v11997_v10 = vadd.f32 %v8498_v62, %v11949_v3  ;;  %v8501_v4 = vadd.f32 %v8500_v53, %v8499_v59 }
 0x462   : > { %v12000_v40 = vadd.f32 %v8501_v4, %v11952_v0 }
 0x464   : > { %v8502_v9 = vpop.f32.mrb[248].mxu1 }
 0x465   : > { %v8503_v12 = vpop.f32.mrb[249].mxu1 }
 0x466   : > { %v8504_v1 = vadd.f32 %v8503_v12, %v8502_v9  ;;  %v8505_v46 = vpop.f32.mrb[250].mxu1 }
 0x467   : > { %v8506_v60 = vpop.f32.mrb[251].mxu1 }
 0x468   : > { %v12003_v15 = vadd.f32 %v8504_v1, %v11955_v34  ;;  %v8507_v45 = vadd.f32 %v8506_v60, %v8505_v46 }
 0x46a   : > { %v12006_v18 = vadd.f32 %v8507_v45, %v11958_v28  ;;  %v12020_v28 = vrot.slane %v11662_v25, %v4386_v42 }
 0x46c   : > { %v8508_v21 = vpop.f32.mrb[252].mxu1 }
 0x46d   : > { %v8509_v13 = vpop.f32.mrb[253].mxu1 }
 0x46e   : > { %v8510_v3 = vadd.f32 %v8509_v13, %v8508_v21  ;;  %v8511_v48 = vpop.f32.mrb[254].mxu1 }
 0x46f   : > { %v8512_v0 = vpop.f32.mrb[255].mxu1 }
 0x470   : > { %v12010_v58 = vadd.f32 %v8510_v3, %v11961_v61  ;;  %v8513_v8 = vadd.f32 %v8512_v0, %v8511_v48 }
 0x472   : > { %v12017_v34 = vadd.f32 %v8513_v8, %v11964_v32 }
 0x474   : > { %v6530_v17 = vpop.f32.mrb[96].mxu0  ;;  %v8530_v49 = vpop.f32.mrb[0].mxu1 }
 0x475   : > { %v8578_v55 = vadd.f32 %v6530_v17, %v12014_v35  ;;  %v6532_v20 = vpop.f32.mrb[97].mxu0  ;;  %v8531_v39 = vpop.f32.mrb[1].mxu1 }
 0x476   : > { %v8579_v61 = vadd.f32 %v6532_v20, %v12020_v28  ;;  %v8532_v2 = vadd.f32 %v8531_v39, %v8530_v49  ;;  %v6534_v41 = vpop.f32.mrb[98].mxu0  ;;  %v8533_v7 = vpop.f32.mrb[2].mxu1 }
 0x477   : > { %v8580_v38 = vadd.f32 %v6534_v41, %v12014_v35  ;;  %v6536_v14 = vpop.f32.mrb[99].mxu0  ;;  %v8534_v32 = vpop.f32.mrb[3].mxu1 }
 0x478   : > { %v8162_v52 = vpack.c.bf16 %v8579_v61, %v8578_v55  ;;  %v7129_v25 = vadd.f32 %v8532_v2, %v11967_v24  ;;  %v8581_v22 = vadd.f32 %v6536_v14, %v12020_v28  ;;  %v8535_v63 = vadd.f32 %v8534_v32, %v8533_v7 }
 0x47a   : > { %7351 = vst [vmem:[%s12029_s24] sm:$0xff] %v8162_v52  ;;  %v8163_v30 = vpack.c.bf16 %v7129_v25, %v7129_v25  ;;  %v8164_v57 = vpack.c.bf16 %v8581_v22, %v8580_v38  ;;  %v7132_v19 = vadd.f32 %v8535_v63, %v11970_v44 }
 0x47c   : > { %7352 = vst [vmem:[%s12029_s24 + $0x8] sm:$0xf] %v8163_v30  ;;  %7353 = vst [vmem:[%s12029_s24 + $0xc] sm:$0xff] %v8164_v57  ;;  %v8165_v26 = vpack.c.bf16 %v7132_v19, %v7132_v19  ;;  %v6540_v6 = vpop.f32.mrb[100].mxu0  ;;  %v8536_v24 = vpop.f32.mrb[4].mxu1 }
 0x47d   : > { %v8582_v16 = vadd.f32 %v6540_v6, %v12014_v35  ;;  %v6542_v51 = vpop.f32.mrb[101].mxu0  ;;  %v8537_v50 = vpop.f32.mrb[5].mxu1 }
 0x47e   : > { %7354 = vst [vmem:[%s12029_s24 + $0x14] sm:$0xf] %v8165_v26  ;;  %v8583_v27 = vadd.f32 %v6542_v51, %v12020_v28  ;;  %v8538_v47 = vadd.f32 %v8537_v50, %v8536_v24  ;;  %v6544_v37 = vpop.f32.mrb[102].mxu0  ;;  %v8539_v11 = vpop.f32.mrb[6].mxu1 }
 0x47f   : > { %v8584_v44 = vadd.f32 %v6544_v37, %v12014_v35  ;;  %v6546_v36 = vpop.f32.mrb[103].mxu0  ;;  %v8540_v62 = vpop.f32.mrb[7].mxu1 }
 0x480   : > { %v8166_v59 = vpack.c.bf16 %v8583_v27, %v8582_v16  ;;  %v7137_v53 = vadd.f32 %v8538_v47, %v11973_v43  ;;  %v8585_v4 = vadd.f32 %v6546_v36, %v12020_v28  ;;  %v8541_v9 = vadd.f32 %v8540_v62, %v8539_v11 }
 0x482   : > { %7355 = vst [vmem:[%s12029_s24 + $0x18] sm:$0xff] %v8166_v59  ;;  %v8167_v12 = vpack.c.bf16 %v7137_v53, %v7137_v53  ;;  %v8168_v1 = vpack.c.bf16 %v8585_v4, %v8584_v44  ;;  %v7140_v46 = vadd.f32 %v8541_v9, %v11976_v29 }
 0x484   : > { %7356 = vst [vmem:[%s12029_s24 + $0x20] sm:$0xf] %v8167_v12  ;;  %7357 = vst [vmem:[%s12029_s24 + $0x24] sm:$0xff] %v8168_v1  ;;  %v8169_v60 = vpack.c.bf16 %v7140_v46, %v7140_v46  ;;  %v6550_v45 = vpop.f32.mrb[104].mxu0  ;;  %v8542_v21 = vpop.f32.mrb[8].mxu1 }
 0x485   : > { %v8586_v13 = vadd.f32 %v6550_v45, %v12014_v35  ;;  %v6552_v3 = vpop.f32.mrb[105].mxu0  ;;  %v8543_v48 = vpop.f32.mrb[9].mxu1 }
 0x486   : > { %7358 = vst [vmem:[%s12029_s24 + $0x2c] sm:$0xf] %v8169_v60  ;;  %v8587_v43 = vadd.f32 %v6552_v3, %v12020_v28  ;;  %v8544_v42 = vadd.f32 %v8543_v48, %v8542_v21  ;;  %v6554_v0 = vpop.f32.mrb[106].mxu0  ;;  %v8545_v8 = vpop.f32.mrb[10].mxu1 }
 0x487   : > { %v8588_v29 = vadd.f32 %v6554_v0, %v12014_v35  ;;  %v6556_v17 = vpop.f32.mrb[107].mxu0  ;;  %v8546_v49 = vpop.f32.mrb[11].mxu1 }
 0x488   : > { %v8170_v55 = vpack.c.bf16 %v8587_v43, %v8586_v13  ;;  %v7145_v20 = vadd.f32 %v8544_v42, %v11979_v54  ;;  %v8589_v39 = vadd.f32 %v6556_v17, %v12020_v28  ;;  %v8547_v61 = vadd.f32 %v8546_v49, %v8545_v8 }
 0x48a   : > { %7359 = vst [vmem:[%s12029_s24 + $0x30] sm:$0xff] %v8170_v55  ;;  %v8171_v2 = vpack.c.bf16 %v7145_v20, %v7145_v20  ;;  %v8172_v41 = vpack.c.bf16 %v8589_v39, %v8588_v29  ;;  %v7148_v7 = vadd.f32 %v8547_v61, %v11982_v5 }
 0x48c   : > { %7360 = vst [vmem:[%s12029_s24 + $0x38] sm:$0xf] %v8171_v2  ;;  %7361 = vst [vmem:[%s12029_s24 + $0x3c] sm:$0xff] %v8172_v41  ;;  %v8173_v38 = vpack.c.bf16 %v7148_v7, %v7148_v7  ;;  %v6560_v14 = vpop.f32.mrb[108].mxu0  ;;  %v8548_v32 = vpop.f32.mrb[12].mxu1 }
 0x48d   : > { %v8590_v52 = vadd.f32 %v6560_v14, %v12014_v35  ;;  %v6562_v25 = vpop.f32.mrb[109].mxu0  ;;  %v8549_v22 = vpop.f32.mrb[13].mxu1 }
 0x48e   : > { %7362 = vst [vmem:[%s12029_s24 + $0x44] sm:$0xf] %v8173_v38  ;;  %v8591_v54 = vadd.f32 %v6562_v25, %v12020_v28  ;;  %v8550_v63 = vadd.f32 %v8549_v22, %v8548_v32  ;;  %v6564_v30 = vpop.f32.mrb[110].mxu0  ;;  %v8551_v57 = vpop.f32.mrb[14].mxu1 }
 0x48f   : > { %v8592_v5 = vadd.f32 %v6564_v30, %v12014_v35  ;;  %v6566_v19 = vpop.f32.mrb[111].mxu0  ;;  %v8552_v26 = vpop.f32.mrb[15].mxu1 }
 0x490   : > { %v8174_v6 = vpack.c.bf16 %v8591_v54, %v8590_v52  ;;  %v7153_v24 = vadd.f32 %v8550_v63, %v11985_v23  ;;  %v8593_v16 = vadd.f32 %v6566_v19, %v12020_v28  ;;  %v8553_v51 = vadd.f32 %v8552_v26, %v8551_v57 }
 0x492   : > { %7363 = vst [vmem:[%s12029_s24 + $0x48] sm:$0xff] %v8174_v6  ;;  %v8175_v50 = vpack.c.bf16 %v7153_v24, %v7153_v24  ;;  %v8176_v27 = vpack.c.bf16 %v8593_v16, %v8592_v5  ;;  %v7156_v47 = vadd.f32 %v8553_v51, %v11988_v56 }
 0x494   : > { %7364 = vst [vmem:[%s12029_s24 + $0x50] sm:$0xf] %v8175_v50  ;;  %7365 = vst [vmem:[%s12029_s24 + $0x54] sm:$0xff] %v8176_v27  ;;  %v8177_v37 = vpack.c.bf16 %v7156_v47, %v7156_v47  ;;  %v6570_v11 = vpop.f32.mrb[112].mxu0  ;;  %v8554_v44 = vpop.f32.mrb[16].mxu1 }
 0x495   : > { %v8594_v36 = vadd.f32 %v6570_v11, %v12014_v35  ;;  %v6572_v62 = vpop.f32.mrb[113].mxu0  ;;  %v8555_v59 = vpop.f32.mrb[17].mxu1 }
 0x496   : > { %7366 = vst [vmem:[%s12029_s24 + $0x5c] sm:$0xf] %v8177_v37  ;;  %v8595_v23 = vadd.f32 %v6572_v62, %v12020_v28  ;;  %v8556_v53 = vadd.f32 %v8555_v59, %v8554_v44  ;;  %v6574_v4 = vpop.f32.mrb[114].mxu0  ;;  %v8557_v9 = vpop.f32.mrb[18].mxu1 }
 0x497   : > { %v8596_v56 = vadd.f32 %v6574_v4, %v12014_v35  ;;  %v6576_v12 = vpop.f32.mrb[115].mxu0  ;;  %v8558_v1 = vpop.f32.mrb[19].mxu1 }
 0x498   : > { %v8178_v46 = vpack.c.bf16 %v8595_v23, %v8594_v36  ;;  %v7161_v60 = vadd.f32 %v8556_v53, %v11991_v31  ;;  %v8597_v45 = vadd.f32 %v6576_v12, %v12020_v28  ;;  %v8559_v21 = vadd.f32 %v8558_v1, %v8557_v9 }
 0x49a   : > { %7367 = vst [vmem:[%s12029_s24 + $0x60] sm:$0xff] %v8178_v46  ;;  %v8179_v13 = vpack.c.bf16 %v7161_v60, %v7161_v60  ;;  %v8180_v3 = vpack.c.bf16 %v8597_v45, %v8596_v56  ;;  %v7164_v48 = vadd.f32 %v8559_v21, %v11994_v33 }
 0x49c   : > { %7368 = vst [vmem:[%s12029_s24 + $0x68] sm:$0xf] %v8179_v13  ;;  %7369 = vst [vmem:[%s12029_s24 + $0x6c] sm:$0xff] %v8180_v3  ;;  %v8181_v43 = vpack.c.bf16 %v7164_v48, %v7164_v48  ;;  %v6580_v42 = vpop.f32.mrb[116].mxu0  ;;  %v8560_v0 = vpop.f32.mrb[20].mxu1 }
 0x49d   : > { %v8598_v8 = vadd.f32 %v6580_v42, %v12014_v35  ;;  %v6582_v29 = vpop.f32.mrb[117].mxu0  ;;  %v8561_v17 = vpop.f32.mrb[21].mxu1 }
 0x49e   : > { %7370 = vst [vmem:[%s12029_s24 + $0x74] sm:$0xf] %v8181_v43  ;;  %v8599_v31 = vadd.f32 %v6582_v29, %v12020_v28  ;;  %v8562_v49 = vadd.f32 %v8561_v17, %v8560_v0  ;;  %v6584_v55 = vpop.f32.mrb[118].mxu0  ;;  %v8563_v20 = vpop.f32.mrb[22].mxu1 }
 0x49f   : > { %v8600_v33 = vadd.f32 %v6584_v55, %v12014_v35  ;;  %v6586_v39 = vpop.f32.mrb[119].mxu0  ;;  %v8564_v61 = vpop.f32.mrb[23].mxu1 }
 0x4a0   : > { %v8182_v2 = vpack.c.bf16 %v8599_v31, %v8598_v8  ;;  %v7169_v41 = vadd.f32 %v8562_v49, %v11997_v10  ;;  %v8601_v7 = vadd.f32 %v6586_v39, %v12020_v28  ;;  %v8565_v38 = vadd.f32 %v8564_v61, %v8563_v20 }
 0x4a2   : > { %7371 = vst [vmem:[%s12029_s24 + $0x78] sm:$0xff] %v8182_v2  ;;  %v8183_v14 = vpack.c.bf16 %v7169_v41, %v7169_v41  ;;  %v8184_v32 = vpack.c.bf16 %v8601_v7, %v8600_v33  ;;  %v7172_v52 = vadd.f32 %v8565_v38, %v12000_v40 }
 0x4a4   : > { %7372 = vst [vmem:[%s12029_s24 + $0x80] sm:$0xf] %v8183_v14  ;;  %7373 = vst [vmem:[%s12029_s24 + $0x84] sm:$0xff] %v8184_v32  ;;  %v8185_v25 = vpack.c.bf16 %v7172_v52, %v7172_v52  ;;  %v6590_v22 = vpop.f32.mrb[120].mxu0  ;;  %v8566_v54 = vpop.f32.mrb[24].mxu1 }
 0x4a5   : > { %v8602_v63 = vadd.f32 %v6590_v22, %v12014_v35  ;;  %v6592_v30 = vpop.f32.mrb[121].mxu0  ;;  %v8567_v57 = vpop.f32.mrb[25].mxu1 }
 0x4a6   : > { %7374 = vst [vmem:[%s12029_s24 + $0x8c] sm:$0xf] %v8185_v25  ;;  %v8603_v10 = vadd.f32 %v6592_v30, %v12020_v28  ;;  %v8568_v5 = vadd.f32 %v8567_v57, %v8566_v54  ;;  %v6594_v19 = vpop.f32.mrb[122].mxu0  ;;  %v8569_v26 = vpop.f32.mrb[26].mxu1 }
 0x4a7   : > { %v8604_v40 = vadd.f32 %v6594_v19, %v12014_v35  ;;  %v6596_v6 = vpop.f32.mrb[123].mxu0  ;;  %v8570_v24 = vpop.f32.mrb[27].mxu1 }
 0x4a8   : > { %v8186_v16 = vpack.c.bf16 %v8603_v10, %v8602_v63  ;;  %v7177_v51 = vadd.f32 %v8568_v5, %v12003_v15  ;;  %v8605_v50 = vadd.f32 %v6596_v6, %v12020_v28  ;;  %v8571_v27 = vadd.f32 %v8570_v24, %v8569_v26 }
 0x4aa   : > { %7375 = vst [vmem:[%s12029_s24 + $0x90] sm:$0xff] %v8186_v16  ;;  %v8187_v47 = vpack.c.bf16 %v7177_v51, %v7177_v51  ;;  %v8188_v37 = vpack.c.bf16 %v8605_v50, %v8604_v40  ;;  %v7180_v11 = vadd.f32 %v8571_v27, %v12006_v18 }
 0x4ac   : > { %7376 = vst [vmem:[%s12029_s24 + $0x98] sm:$0xf] %v8187_v47  ;;  %7377 = vst [vmem:[%s12029_s24 + $0x9c] sm:$0xff] %v8188_v37  ;;  %v8189_v44 = vpack.c.bf16 %v7180_v11, %v7180_v11  ;;  %v6600_v36 = vpop.f32.mrb[124].mxu0  ;;  %v8572_v62 = vpop.f32.mrb[28].mxu1 }
 0x4ad   : > { %v8606_v59 = vadd.f32 %v6600_v36, %v12014_v35  ;;  %v6602_v23 = vpop.f32.mrb[125].mxu0  ;;  %v8573_v15 = vpop.f32.mrb[29].mxu1 }
 0x4ae   : > { %7378 = vst [vmem:[%s12029_s24 + $0xa4] sm:$0xf] %v8189_v44  ;;  %v8607_v53 = vadd.f32 %v6602_v23, %v12020_v28  ;;  %v8574_v4 = vadd.f32 %v8573_v15, %v8572_v62  ;;  %v6604_v9 = vpop.f32.mrb[126].mxu0  ;;  %v8575_v56 = vpop.f32.mrb[30].mxu1 }
 0x4af   : > { %v8608_v18 = vadd.f32 %v6604_v9, %v12014_v35  ;;  %v6606_v12 = vpop.f32.mrb[127].mxu0  ;;  %v8576_v1 = vpop.f32.mrb[31].mxu1 }
 0x4b0   : > { %v8190_v46 = vpack.c.bf16 %v8607_v53, %v8606_v59  ;;  %v7185_v60 = vadd.f32 %v8574_v4, %v12010_v58  ;;  %v8609_v45 = vadd.f32 %v6606_v12, %v12020_v28  ;;  %v8577_v21 = vadd.f32 %v8576_v1, %v8575_v56 }
 0x4b2   : > { %7379 = vst [vmem:[%s12029_s24 + $0xa8] sm:$0xff] %v8190_v46  ;;  %v8191_v13 = vpack.c.bf16 %v7185_v60, %v7185_v60  ;;  %v8192_v3 = vpack.c.bf16 %v8609_v45, %v8608_v18  ;;  %v7188_v48 = vadd.f32 %v8577_v21, %v12017_v34 }
 0x4b4   : > { %7380 = vst [vmem:[%s12029_s24 + $0xb0] sm:$0xf] %v8191_v13  ;;  %7381 = vst [vmem:[%s12029_s24 + $0xb4] sm:$0xff] %v8192_v3  ;;  %v8193_v58 = vpack.c.bf16 %v7188_v48, %v7188_v48 }
 0x4b6   : > { %7382 = vst [vmem:[%s12029_s24 + $0xbc] sm:$0xf] %v8193_v58 }
 0x4b7   : > { %10105 = shalt.err (!%p10102_p13)
}
 0x4b8   : > { %s10106_s14 = scalar_lea.hbm %s12108_s17, 3072  ;;  %s10110_s13 = scalar_lea.hbm %s12162_s5, 6144 }
 0x4b9   : > { %p10107_p9 = scmp.ne.s32.totalorder %s12108_s17, %s10106_s14  ;;  %p10111_p6 = scmp.lt.u32.totalorder %s12108_s17, %s12162_s5 }
 0x4ba   : > { %p10112_p10 = scmp.lt.u32.totalorder %s10110_s13, %s10106_s14  ;;  %p10114_p4 = scmp.lt.u32.totalorder %s10106_s14, %s12108_s17 }
 0x4bb   : > { %p10108_p0 = pnand %p10107_p9, %p10382_p8 }
 0x4bc   : > { %p10113_p3 = por %p10112_p10, %p10111_p6 }
 0x4bd   : > { %p10109_p11 = pneg %p10108_p0 }
 0x4be   : > { %p10115_p5 = por %p10114_p4, %p10113_p3 }
 0x4c0   : > { %p10116_p7 = pnand %p10115_p5, %p10109_p11 }
 0x4c2   : > { %10119 = shalt.err (!%p10116_p7)
}
 0x4c3   : > { %s10180_s26 = smov 192   ;;  %s10181_s27 = smov 12  }
 0x4c4   : > { %8984 = dma.vmem_to_hbm [thread:$0]  (%p10382_p8), %s12110_s15, 3072, %s12108_s17, %s7384_s22, %s10180_s26, %s10180_s26, %s10181_s27  }
 0x4c5 PF: > { %s7413_s16 = sand.u32 1, %s10154_s18   ;;  %p12507_p12 = scmp.ne.s32.totalorder %s12246_s25, 0 }
 0x4c6   : > { %p12508_p2 = scmp.ge.s32.totalorder %s10166_s21, 2  ;;  %s7414_s28 = scalar_lea.sflag [#allocation4], %s7413_s16 }
 0x4c8   : > { %p9004_p1 = pnand %p12508_p2, %p12507_p12 }
 0x4ca   : > { %10149 = dma.done.wait (!%p9004_p1), %s7414_s28, 3072  }
 0x4cb   : > { %10151 = vsyncadd (!%p9004_p1), %s7414_s28, 4294964224  ;;  %p20_p13 = scmp.ge.s32.totalorder %s10369_s12, 4   ;;  %s12509_s18 = smov %s10158_s19 }
 0x4cc   : > { %s12510_s19 = smov %s10162_s20  ;;  %s12511_s20 = smov %s10378_s30 }
 0x4cd   : > { %s12512_s21 = smov %s10369_s12  ;;  %22 = sbr.rel (!%p20_p13) target bundleno = 7 (0x7), region = 101 }
 0x4d4   :  { %7419 = vsyncpa [#allocation3], 1 }
 0x4d5   :  { %7421 = vsyncpa [#allocation3 + $0x1], 1 }
 0x4d6   :  { %7422 = vsyncpa [#allocation6], 1 }
 0x4d7   :  { %7423 = vsyncpa [#allocation9], 1 }
 0x4d8   :  { %7424 = vsyncpa [#allocation4], 1 }
 0x4d9   :  { %7426 = vsyncpa [#allocation4 + $0x1], 1 }

</bundles_post_ra>
